<compile_context>
chip_gen: v5e
topology: v5e:2x2
jax: 0.10.0
libtpu: 0.0.40
codegen_flags: <defaults>
</compile_context>

<pallas_src>
import functools

import jax
import jax.numpy as jnp
from jax.experimental import pallas as pl
from jax.experimental.pallas import tpu as pltpu

EPS = 1e-5


def _round_up(a, b):
    return (a + b - 1) // b * b


# --------------------------------- JAX glue -------------------------------------

def _im2col_3x3(x_nhwc, stride, pad):
    """3x3 patches -> (N*Ho*Wo, 9*C), patch channel order (kh, kw, ci)."""
    if pad:
        x_nhwc = jnp.pad(x_nhwc, ((0, 0), (pad, pad), (pad, pad), (0, 0)))
    N, H, W, C = x_nhwc.shape
    Ho = (H - 3) // stride + 1
    Wo = (W - 3) // stride + 1
    cols = []
    for kh in range(3):
        for kw in range(3):
            cols.append(x_nhwc[:, kh:kh + stride * (Ho - 1) + 1:stride,
                               kw:kw + stride * (Wo - 1) + 1:stride, :])
    p = jnp.concatenate(cols, axis=-1)
    return p.reshape(N * Ho * Wo, 9 * C), Ho, Wo


def _oihw_to_mat(w):
    """OIHW -> (9*ci, co), matching the im2col (kh, kw, ci) patch order."""
    co, ci = w.shape[0], w.shape[1]
    return jnp.transpose(w, (2, 3, 1, 0)).reshape(9 * ci, co)


# ------------------------------ forward (Pallas) ---------------------------------

@functools.partial(jax.jit, static_argnames=("stride", "tile_m"))
def basic_block_forward(x_nchw, params, stride=1, tile_m=512):
    f32, bf16 = jnp.float32, jnp.bfloat16
    Wc1, Wc2, Wcs = params["W1"], params["W2"], params["Ws"]
    g1, b1 = params["g1"], params["b1"]
    g2, b2 = params["g2"], params["b2"]
    gs, bs = params["gs"], params["bs"]

    N, Cin, H, W = x_nchw.shape
    Cout = Wc1.shape[0]
    CF = _round_up(2 * Cout, 128)   # fused conv1+shortcut channels (lane-dense)
    C2 = _round_up(Cout, 128)       # single-path channels (lane-dense)

    # ---- conv1 / shortcut: shared im2col patches (3x3, stride, pad=0), bf16 ----
    x = jnp.transpose(x_nchw, (0, 2, 3, 1)).astype(f32)        # NCHW -> NHWC
    p1, H1, W1o = _im2col_3x3(x, stride, 0)                    # (M, 9*Cin)
    M = N * H1 * W1o
    K1 = 9 * Cin
    Mp = _round_up(M, tile_m)
    p1 = jnp.pad(p1, ((0, Mp - M), (0, 0))).astype(bf16)       # zero rows -> no stat impact

    # fused conv1 + shortcut weight: one wide MXU matmul (K1, CF)
    wf = jnp.concatenate([_oihw_to_mat(Wc1), _oihw_to_mat(Wcs)], axis=1)
    wf = jnp.pad(wf, ((0, 0), (0, CF - 2 * Cout))).astype(bf16)
    gamma_f = jnp.pad(jnp.concatenate([g1, gs]), (0, CF - 2 * Cout))
    beta_f = jnp.pad(jnp.concatenate([b1, bs]), (0, CF - 2 * Cout))

    grid_a = Mp // tile_m

    # ---- kernel A: fused conv1+shortcut matmul + BN sum/sumsq accumulation ----
    def conv1s_kernel(p_ref, w_ref, hf_ref, s_ref, q_ref):
        @pl.when(pl.program_id(0) == 0)
        def _():
            s_ref[...] = jnp.zeros_like(s_ref)
            q_ref[...] = jnp.zeros_like(q_ref)

        h = jnp.dot(p_ref[...], w_ref[...], preferred_element_type=jnp.float32)
        hf_ref[...] = h
        s_ref[...] += jnp.sum(h, axis=0, keepdims=True)
        q_ref[...] += jnp.sum(h * h, axis=0, keepdims=True)

    hf, s1, q1 = pl.pallas_call(
        conv1s_kernel,
        grid=(grid_a,),
        in_specs=[pl.BlockSpec((tile_m, K1), lambda i: (i, 0)),
                  pl.BlockSpec((K1, CF), lambda i: (0, 0))],
        out_specs=(pl.BlockSpec((tile_m, CF), lambda i: (i, 0)),
                   pl.BlockSpec((1, CF), lambda i: (0, 0)),
                   pl.BlockSpec((1, CF), lambda i: (0, 0))),
        out_shape=(jax.ShapeDtypeStruct((Mp, CF), f32),
                   jax.ShapeDtypeStruct((1, CF), f32),
                   jax.ShapeDtypeStruct((1, CF), f32)),
        compiler_params=pltpu.CompilerParams(dimension_semantics=("arbitrary",)),
    )(p1, wf)

    # ---- finalize BN1 / BN_shortcut affine (tiny, global stats over true M) ----
    mean1 = s1[0] / M
    var1 = jnp.maximum(q1[0] / M - mean1 * mean1, 0.0)
    scale1 = gamma_f * jax.lax.rsqrt(var1 + EPS)
    shift1 = beta_f - mean1 * scale1
    scale1 = scale1.reshape(1, CF).astype(f32)
    shift1 = shift1.reshape(1, CF).astype(f32)

    # ---- kernel B: apply BN (scale/shift) ; relu'd bf16 copy feeds conv2 ----
    def bn1_kernel(hf_ref, a_ref, c_ref, o1_ref, yn_ref):
        y = hf_ref[...] * a_ref[...] + c_ref[...]
        yn_ref[...] = y                                             # no relu (shortcut half)
        o1_ref[...] = jnp.maximum(y, 0.0)[:, :C2].astype(bf16)      # relu'd conv1 half

    o1b, yn = pl.pallas_call(
        bn1_kernel,
        grid=(grid_a,),
        in_specs=[pl.BlockSpec((tile_m, CF), lambda i: (i, 0)),
                  pl.BlockSpec((1, CF), lambda i: (0, 0)),
                  pl.BlockSpec((1, CF), lambda i: (0, 0))],
        out_specs=(pl.BlockSpec((tile_m, C2), lambda i: (i, 0)),
                   pl.BlockSpec((tile_m, CF), lambda i: (i, 0))),
        out_shape=(jax.ShapeDtypeStruct((Mp, C2), bf16),
                   jax.ShapeDtypeStruct((Mp, CF), f32)),
        compiler_params=pltpu.CompilerParams(dimension_semantics=("parallel",)),
    )(hf, scale1, shift1)

    # ---- conv2 prep: spatial pad + 3x "kw-unfold" (bf16); kh taps stay in-kernel ----
    Wp2 = _round_up(W1o + 2, 8)            # padded row width (8-aligned flat offsets)
    Rout = H1 * Wp2
    Rin = (H1 + 2) * Wp2

    o1sp = o1b[:M].reshape(N, H1, W1o, C2)
    o1sp = jnp.pad(o1sp, ((0, 0), (1, 1), (1, Wp2 + 1 - W1o), (0, 0)))
    xw = jnp.concatenate([o1sp[:, :, 0:Wp2, :],
                          o1sp[:, :, 1:Wp2 + 1, :],
                          o1sp[:, :, 2:Wp2 + 2, :]], axis=-1)      # (N, H1+2, Wp2, 3*C2)
    xw = xw.reshape(N, Rin, 3 * C2)

    # conv2 weights: (kh, kw*ci, co) stacked so K = 3*C2 per kh-tap
    w2t = jnp.transpose(Wc2, (2, 3, 1, 0))                         # (kh, kw, ci, co)
    w2t = jnp.pad(w2t, ((0, 0), (0, 0), (0, C2 - Cout), (0, C2 - Cout)))
    w2s = w2t.reshape(3, 3 * C2, C2).astype(bf16)

    # validity mask over the padded-width output rows (excludes the Wp2-W1o junk columns)
    vmask = jnp.tile((jnp.arange(Wp2) < W1o).astype(f32), (H1,)).reshape(Rout, 1)

    # ---- kernel C: conv2 as 3 aligned shifted-slice matmuls + fused BN2 stats ----
    def conv2_kernel(xw_ref, w_ref, m_ref, h2_ref, ss_ref, sq_ref, acc_ref):
        acc_ref[...] = jnp.zeros_like(acc_ref)
        for kh in range(3):                                        # unrolled, aligned offsets
            acc_ref[...] += jnp.dot(xw_ref[0, kh * Wp2:kh * Wp2 + Rout, :],
                                    w_ref[kh],
                                    preferred_element_type=jnp.float32)
        acc = acc_ref[...]
        h2_ref[0] = acc
        m = m_ref[...]
        ss_ref[0] = jnp.sum(acc * m, axis=0, keepdims=True)
        sq_ref[0] = jnp.sum(acc * acc * m, axis=0, keepdims=True)

    h2, s2s, s2q = pl.pallas_call(
        conv2_kernel,
        grid=(N,),
        in_specs=[pl.BlockSpec((1, Rin, 3 * C2), lambda n: (n, 0, 0)),
                  pl.BlockSpec((3, 3 * C2, C2), lambda n: (0, 0, 0)),
                  pl.BlockSpec((Rout, 1), lambda n: (0, 0))],
        out_specs=(pl.BlockSpec((1, Rout, C2), lambda n: (n, 0, 0)),
                   pl.BlockSpec((1, 1, C2), lambda n: (n, 0, 0)),
                   pl.BlockSpec((1, 1, C2), lambda n: (n, 0, 0))),
        out_shape=(jax.ShapeDtypeStruct((N, Rout, C2), f32),
                   jax.ShapeDtypeStruct((N, 1, C2), f32),
                   jax.ShapeDtypeStruct((N, 1, C2), f32)),
        scratch_shapes=[pltpu.VMEM((Rout, C2), f32)],
        compiler_params=pltpu.CompilerParams(dimension_semantics=("parallel",)),
    )(xw, w2s, vmask)

    # ---- finalize BN2 affine ----
    mean2 = jnp.sum(s2s[:, 0, :], axis=0) / M
    var2 = jnp.maximum(jnp.sum(s2q[:, 0, :], axis=0) / M - mean2 * mean2, 0.0)
    g2p = jnp.pad(g2, (0, C2 - Cout))
    b2p = jnp.pad(b2, (0, C2 - Cout))
    scale2 = g2p * jax.lax.rsqrt(var2 + EPS)
    shift2 = (b2p - mean2 * scale2).reshape(1, C2).astype(f32)
    scale2 = scale2.reshape(1, C2).astype(f32)

    # shortcut (already BN'd by kernel B) re-laid onto the padded-width grid
    scn = yn[:M, Cout:2 * Cout].reshape(N, H1, W1o, Cout)
    sc_pw = jnp.pad(scn, ((0, 0), (0, 0), (0, Wp2 - W1o), (0, C2 - Cout)))
    sc_pw = sc_pw.reshape(N, Rout, C2)

    # ---- kernel D: bn2 + residual add + final relu ----
    def out_kernel(h2_ref, scr_ref, a_ref, c_ref, o_ref):
        y = h2_ref[0] * a_ref[...] + c_ref[...] + scr_ref[0]
        o_ref[0] = jnp.maximum(y, 0.0)

    outp = pl.pallas_call(
        out_kernel,
        grid=(N,),
        in_specs=[pl.BlockSpec((1, Rout, C2), lambda n: (n, 0, 0)),
                  pl.BlockSpec((1, Rout, C2), lambda n: (n, 0, 0)),
                  pl.BlockSpec((1, C2), lambda n: (0, 0)),
                  pl.BlockSpec((1, C2), lambda n: (0, 0))],
        out_specs=pl.BlockSpec((1, Rout, C2), lambda n: (n, 0, 0)),
        out_shape=jax.ShapeDtypeStruct((N, Rout, C2), f32),
        compiler_params=pltpu.CompilerParams(dimension_semantics=("parallel",)),
    )(h2, sc_pw, scale2, shift2)

    out = outp.reshape(N, H1, Wp2, C2)[:, :, :W1o, :Cout]
    return jnp.transpose(out, (0, 3, 1, 2))                       # NHWC -> NCHW


# ----------------------------- params & reference --------------------------------

def init_params(key, cin, cout):
    ks = jax.random.split(key, 9)

    def conv_w(k, co, ci):
        return 0.1 * jax.random.normal(k, (co, ci, 3, 3), jnp.float32)  # OIHW (PyTorch)

    def affine(kg, kb):
        g = 1.0 + 0.1 * jax.random.normal(kg, (cout,), jnp.float32)
        b = 0.1 * jax.random.normal(kb, (cout,), jnp.float32)
        return g, b

    W1 = conv_w(ks[0], cout, cin)
    W2 = conv_w(ks[1], cout, cout)
    Ws = conv_w(ks[2], cout, cin)   # shortcut projection conv (see layout comment)
    g1, b1 = affine(ks[3], ks[4])
    g2, b2 = affine(ks[5], ks[6])
    gs, bs = affine(ks[7], ks[8])
    return dict(W1=W1, W2=W2, Ws=Ws, g1=g1, b1=b1, g2=g2, b2=b2, gs=gs, bs=bs)


def _ref_bn(h, gamma, beta):
    m = jnp.mean(h, axis=(0, 2, 3), keepdims=True)
    v = jnp.mean(jnp.square(h - m), axis=(0, 2, 3), keepdims=True)
    g = gamma.reshape(1, -1, 1, 1)
    b = beta.reshape(1, -1, 1, 1)
    return (h - m) * jax.lax.rsqrt(v + EPS) * g + b


def ref_forward(x, params, stride=1):
    dn = ("NCHW", "OIHW", "NCHW")
    conv = lambda inp, w, s, pad: jax.lax.conv_general_dilated(
        inp, w, (s, s), pad, dimension_numbers=dn, precision=jax.lax.Precision.HIGHEST)
    h1 = jnp.maximum(_ref_bn(conv(x, params["W1"], stride, "VALID"),
                             params["g1"], params["b1"]), 0.0)
    h2 = _ref_bn(conv(h1, params["W2"], 1, [(1, 1), (1, 1)]),
                 params["g2"], params["b2"])
    sc = _ref_bn(conv(x, params["Ws"], stride, "VALID"),
                 params["gs"], params["bs"])
    return jnp.maximum(h2 + sc, 0.0)


if __name__ == "__main__":
    key = jax.random.PRNGKey(0)
    kx, kp = jax.random.split(key)
    N, Cin, Cout, H, W, stride = 2, 4, 8, 16, 16, 1

    x = jax.random.normal(kx, (N, Cin, H, W), jnp.float32)
    params = init_params(kp, Cin, Cout)

    # tile_m=128 so the small test exercises the multi-step stats-accumulation grid.
    out = jax.block_until_ready(basic_block_forward(x, params, stride=stride, tile_m=128))
    ref = jax.block_until_ready(ref_forward(x, params, stride))

    assert out.shape == (N, Cout, H - 2, W - 2), out.shape
    # bf16 MXU inputs vs f32-HIGHEST reference -> slightly looser tolerance than the f32 version.
    assert bool(jnp.allclose(out, ref, atol=2e-2, rtol=2e-2)), \
        float(jnp.max(jnp.abs(out - ref)))
    print("KERNEL_OK")
</pallas_src>

<mosaic_0001>
module attributes {stable_mosaic.version = 11 : i64} {
  func.func @conv1s_kernel(%arg0: i32, %arg1: memref<128x36xbf16, #tpu.memory_space<vmem>>, %arg2: memref<36x128xbf16, #tpu.memory_space<vmem>>, %arg3: memref<128x128xf32, #tpu.memory_space<vmem>>, %arg4: memref<1x128xf32, #tpu.memory_space<vmem>>, %arg5: memref<1x128xf32, #tpu.memory_space<vmem>>) attributes {dimension_semantics = [#tpu.dimension_semantics<arbitrary>], iteration_bounds = array<i64: 4>, scalar_prefetch = 0 : i64, scratch_operands = 0 : i64, tpu.core_type = #tpu.core_type<tc>, window_params = [{transform_indices = @transform_0, window_bounds = array<i64: 128, 36>}, {pipeline_mode = #tpu.pipeline_mode<synchronous>, transform_indices = @transform_1, window_bounds = array<i64: 36, 128>}, {transform_indices = @transform_2, window_bounds = array<i64: 128, 128>}, {pipeline_mode = #tpu.pipeline_mode<synchronous>, transform_indices = @transform_3, window_bounds = array<i64: 1, 128>}, {pipeline_mode = #tpu.pipeline_mode<synchronous>, transform_indices = @transform_4, window_bounds = array<i64: 1, 128>}]} {
    %c0_i32 = arith.constant 0 : i32
    %0 = arith.cmpi eq, %arg0, %c0_i32 : i32
    %1 = arith.extui %0 : i1 to i32
    %c0_i32_0 = arith.constant 0 : i32
    %2 = arith.cmpi ne, %1, %c0_i32_0 : i32
    scf.if %2 {
      %cst_16 = arith.constant 0.000000e+00 : f32
      %18 = vector.broadcast %cst_16 : f32 to vector<1x128xf32>
      %c0_17 = arith.constant 0 : index
      %c0_18 = arith.constant 0 : index
      %19 = vector.load %arg4[%c0_17, %c0_18] : memref<1x128xf32, #tpu.memory_space<vmem>>, vector<1x128xf32>
      tpu.vector_store %arg4[%c0_17, %c0_18], %18 {strides = array<i32>} : memref<1x128xf32, #tpu.memory_space<vmem>>, vector<1x128xf32>,
      %cst_19 = arith.constant 0.000000e+00 : f32
      %20 = vector.broadcast %cst_19 : f32 to vector<1x128xf32>
      %c0_20 = arith.constant 0 : index
      %c0_21 = arith.constant 0 : index
      %21 = vector.load %arg5[%c0_20, %c0_21] : memref<1x128xf32, #tpu.memory_space<vmem>>, vector<1x128xf32>
      tpu.vector_store %arg5[%c0_20, %c0_21], %20 {strides = array<i32>} : memref<1x128xf32, #tpu.memory_space<vmem>>, vector<1x128xf32>,
    } else {
    }
    %c0 = arith.constant 0 : index
    %c0_1 = arith.constant 0 : index
    %3 = vector.load %arg1[%c0, %c0_1] : memref<128x36xbf16, #tpu.memory_space<vmem>>, vector<128x36xbf16>
    %c0_2 = arith.constant 0 : index
    %c0_3 = arith.constant 0 : index
    %4 = vector.load %arg2[%c0_2, %c0_3] : memref<36x128xbf16, #tpu.memory_space<vmem>>, vector<36x128xbf16>
    %cst = arith.constant dense<0.000000e+00> : vector<128x128xf32>
    %5 = tpu.matmul %3, %4, %cst {dimension_numbers = #tpu.dot_dimension_numbers<[1], [0], [0], [1], [0, 0, 1, 1], [], []>} : vector<128x36xbf16>, vector<36x128xbf16>, vector<128x128xf32> -> vector<128x128xf32>
    %c0_4 = arith.constant 0 : index
    %c0_5 = arith.constant 0 : index
    %6 = vector.load %arg3[%c0_4, %c0_5] : memref<128x128xf32, #tpu.memory_space<vmem>>, vector<128x128xf32>
    tpu.vector_store %arg3[%c0_4, %c0_5], %5 {strides = array<i32>} : memref<128x128xf32, #tpu.memory_space<vmem>>, vector<128x128xf32>,
    %c0_6 = arith.constant 0 : index
    %c0_7 = arith.constant 0 : index
    %7 = vector.load %arg4[%c0_6, %c0_7] : memref<1x128xf32, #tpu.memory_space<vmem>>, vector<1x128xf32>
    %cst_8 = arith.constant dense<0.000000e+00> : vector<128xf32>
    %8 = vector.multi_reduction <add>, %5, %cst_8 [0] : vector<128x128xf32> to vector<128xf32>
    %9 = vector.shape_cast %8 : vector<128xf32> to vector<1x128xf32>
    %10 = arith.addf %7, %9 : vector<1x128xf32>
    %c0_9 = arith.constant 0 : index
    %c0_10 = arith.constant 0 : index
    %11 = vector.load %arg4[%c0_9, %c0_10] : memref<1x128xf32, #tpu.memory_space<vmem>>, vector<1x128xf32>
    tpu.vector_store %arg4[%c0_9, %c0_10], %10 {strides = array<i32>} : memref<1x128xf32, #tpu.memory_space<vmem>>, vector<1x128xf32>,
    %c0_11 = arith.constant 0 : index
    %c0_12 = arith.constant 0 : index
    %12 = vector.load %arg5[%c0_11, %c0_12] : memref<1x128xf32, #tpu.memory_space<vmem>>, vector<1x128xf32>
    %13 = arith.mulf %5, %5 : vector<128x128xf32>
    %cst_13 = arith.constant dense<0.000000e+00> : vector<128xf32>
    %14 = vector.multi_reduction <add>, %13, %cst_13 [0] : vector<128x128xf32> to vector<128xf32>
    %15 = vector.shape_cast %14 : vector<128xf32> to vector<1x128xf32>
    %16 = arith.addf %12, %15 : vector<1x128xf32>
    %c0_14 = arith.constant 0 : index
    %c0_15 = arith.constant 0 : index
    %17 = vector.load %arg5[%c0_14, %c0_15] : memref<1x128xf32, #tpu.memory_space<vmem>>, vector<1x128xf32>
    tpu.vector_store %arg5[%c0_14, %c0_15], %16 {strides = array<i32>} : memref<1x128xf32, #tpu.memory_space<vmem>>, vector<1x128xf32>,
    return
  }
  func.func @transform_0(%arg0: i32) -> (i32, i32) {
    %c0_i32 = arith.constant 0 : i32
    %c0_i32_0 = arith.constant 0 : i32
    return %arg0, %c0_i32 : i32, i32
  }
  func.func @transform_1(%arg0: i32) -> (i32, i32) {
    %c0_i32 = arith.constant 0 : i32
    %c0_i32_0 = arith.constant 0 : i32
    %c0_i32_1 = arith.constant 0 : i32
    return %c0_i32, %c0_i32_0 : i32, i32
  }
  func.func @transform_2(%arg0: i32) -> (i32, i32) {
    %c0_i32 = arith.constant 0 : i32
    %c0_i32_0 = arith.constant 0 : i32
    return %arg0, %c0_i32 : i32, i32
  }
  func.func @transform_3(%arg0: i32) -> (i32, i32) {
    %c0_i32 = arith.constant 0 : i32
    %c0_i32_0 = arith.constant 0 : i32
    %c0_i32_1 = arith.constant 0 : i32
    return %c0_i32, %c0_i32_0 : i32, i32
  }
  func.func @transform_4(%arg0: i32) -> (i32, i32) {
    %c0_i32 = arith.constant 0 : i32
    %c0_i32_0 = arith.constant 0 : i32
    %c0_i32_1 = arith.constant 0 : i32
    return %c0_i32, %c0_i32_0 : i32, i32
  }
}

module attributes {stable_mosaic.version = 11 : i64} {
  func.func @bn1_kernel(%arg0: i32, %arg1: memref<128x128xf32, #tpu.memory_space<vmem>>, %arg2: memref<1x128xf32, #tpu.memory_space<vmem>>, %arg3: memref<1x128xf32, #tpu.memory_space<vmem>>, %arg4: memref<128x128xbf16, #tpu.memory_space<vmem>>, %arg5: memref<128x128xf32, #tpu.memory_space<vmem>>) attributes {dimension_semantics = [#tpu.dimension_semantics<parallel>], iteration_bounds = array<i64: 4>, scalar_prefetch = 0 : i64, scratch_operands = 0 : i64, tpu.core_type = #tpu.core_type<tc>, window_params = [{transform_indices = @transform_0, window_bounds = array<i64: 128, 128>}, {pipeline_mode = #tpu.pipeline_mode<synchronous>, transform_indices = @transform_1, window_bounds = array<i64: 1, 128>}, {pipeline_mode = #tpu.pipeline_mode<synchronous>, transform_indices = @transform_2, window_bounds = array<i64: 1, 128>}, {transform_indices = @transform_3, window_bounds = array<i64: 128, 128>}, {transform_indices = @transform_4, window_bounds = array<i64: 128, 128>}]} {
    %c0 = arith.constant 0 : index
    %c0_0 = arith.constant 0 : index
    %0 = vector.load %arg1[%c0, %c0_0] : memref<128x128xf32, #tpu.memory_space<vmem>>, vector<128x128xf32>
    %c0_1 = arith.constant 0 : index
    %c0_2 = arith.constant 0 : index
    %1 = vector.load %arg2[%c0_1, %c0_2] : memref<1x128xf32, #tpu.memory_space<vmem>>, vector<1x128xf32>
    %2 = vector.broadcast %1 : vector<1x128xf32> to vector<128x128xf32>
    %3 = arith.mulf %0, %2 : vector<128x128xf32>
    %c0_3 = arith.constant 0 : index
    %c0_4 = arith.constant 0 : index
    %4 = vector.load %arg3[%c0_3, %c0_4] : memref<1x128xf32, #tpu.memory_space<vmem>>, vector<1x128xf32>
    %5 = vector.broadcast %4 : vector<1x128xf32> to vector<128x128xf32>
    %6 = arith.addf %3, %5 : vector<128x128xf32>
    %c0_5 = arith.constant 0 : index
    %c0_6 = arith.constant 0 : index
    %7 = vector.load %arg5[%c0_5, %c0_6] : memref<128x128xf32, #tpu.memory_space<vmem>>, vector<128x128xf32>
    tpu.vector_store %arg5[%c0_5, %c0_6], %6 {strides = array<i32>} : memref<128x128xf32, #tpu.memory_space<vmem>>, vector<128x128xf32>,
    %cst = arith.constant 0.000000e+00 : f32
    %8 = vector.broadcast %cst : f32 to vector<128x128xf32>
    %9 = arith.maximumf %6, %8 : vector<128x128xf32>
    %10 = arith.truncf %9 : vector<128x128xf32> to vector<128x128xbf16>
    %c0_7 = arith.constant 0 : index
    %c0_8 = arith.constant 0 : index
    %11 = vector.load %arg4[%c0_7, %c0_8] : memref<128x128xbf16, #tpu.memory_space<vmem>>, vector<128x128xbf16>
    tpu.vector_store %arg4[%c0_7, %c0_8], %10 {strides = array<i32>} : memref<128x128xbf16, #tpu.memory_space<vmem>>, vector<128x128xbf16>,
    return
  }
  func.func @transform_0(%arg0: i32) -> (i32, i32) {
    %c0_i32 = arith.constant 0 : i32
    %c0_i32_0 = arith.constant 0 : i32
    return %arg0, %c0_i32 : i32, i32
  }
  func.func @transform_1(%arg0: i32) -> (i32, i32) {
    %c0_i32 = arith.constant 0 : i32
    %c0_i32_0 = arith.constant 0 : i32
    %c0_i32_1 = arith.constant 0 : i32
    return %c0_i32, %c0_i32_0 : i32, i32
  }
  func.func @transform_2(%arg0: i32) -> (i32, i32) {
    %c0_i32 = arith.constant 0 : i32
    %c0_i32_0 = arith.constant 0 : i32
    %c0_i32_1 = arith.constant 0 : i32
    return %c0_i32, %c0_i32_0 : i32, i32
  }
  func.func @transform_3(%arg0: i32) -> (i32, i32) {
    %c0_i32 = arith.constant 0 : i32
    %c0_i32_0 = arith.constant 0 : i32
    return %arg0, %c0_i32 : i32, i32
  }
  func.func @transform_4(%arg0: i32) -> (i32, i32) {
    %c0_i32 = arith.constant 0 : i32
    %c0_i32_0 = arith.constant 0 : i32
    return %arg0, %c0_i32 : i32, i32
  }
}

module attributes {stable_mosaic.version = 11 : i64} {
  func.func @conv2_kernel(%arg0: i32, %arg1: memref<1x256x384xbf16, #tpu.memory_space<vmem>>, %arg2: memref<3x384x128xbf16, #tpu.memory_space<vmem>>, %arg3: memref<224x1xf32, #tpu.memory_space<vmem>>, %arg4: memref<1x224x128xf32, #tpu.memory_space<vmem>>, %arg5: memref<1x1x128xf32, #tpu.memory_space<vmem>>, %arg6: memref<1x1x128xf32, #tpu.memory_space<vmem>>, %arg7: memref<224x128xf32, #tpu.memory_space<vmem>>) attributes {dimension_semantics = [#tpu.dimension_semantics<parallel>], iteration_bounds = array<i64: 2>, scalar_prefetch = 0 : i64, scratch_operands = 1 : i64, tpu.core_type = #tpu.core_type<tc>, window_params = [{transform_indices = @transform_0, window_bounds = array<i64: 1, 256, 384>}, {pipeline_mode = #tpu.pipeline_mode<synchronous>, transform_indices = @transform_1, window_bounds = array<i64: 3, 384, 128>}, {pipeline_mode = #tpu.pipeline_mode<synchronous>, transform_indices = @transform_2, window_bounds = array<i64: 224, 1>}, {transform_indices = @transform_3, window_bounds = array<i64: 1, 224, 128>}, {transform_indices = @transform_4, window_bounds = array<i64: 1, 1, 128>}, {transform_indices = @transform_5, window_bounds = array<i64: 1, 1, 128>}]} {
    %cst = arith.constant 0.000000e+00 : f32
    %0 = vector.broadcast %cst : f32 to vector<224x128xf32>
    %c0 = arith.constant 0 : index
    %c0_0 = arith.constant 0 : index
    %1 = vector.load %arg7[%c0, %c0_0] : memref<224x128xf32, #tpu.memory_space<vmem>>, vector<224x128xf32>
    tpu.vector_store %arg7[%c0, %c0_0], %0 {strides = array<i32>} : memref<224x128xf32, #tpu.memory_space<vmem>>, vector<224x128xf32>,
    %c0_1 = arith.constant 0 : index
    %c0_2 = arith.constant 0 : index
    %2 = vector.load %arg7[%c0_1, %c0_2] : memref<224x128xf32, #tpu.memory_space<vmem>>, vector<224x128xf32>
    %c0_3 = arith.constant 0 : index
    %c0_4 = arith.constant 0 : index
    %c0_5 = arith.constant 0 : index
    %3 = vector.load %arg1[%c0_3, %c0_4, %c0_5] : memref<1x256x384xbf16, #tpu.memory_space<vmem>>, vector<1x224x384xbf16>
    %4 = vector.shape_cast %3 : vector<1x224x384xbf16> to vector<224x384xbf16>
    %c0_6 = arith.constant 0 : index
    %c0_7 = arith.constant 0 : index
    %c0_8 = arith.constant 0 : index
    %5 = vector.load %arg2[%c0_6, %c0_7, %c0_8] : memref<3x384x128xbf16, #tpu.memory_space<vmem>>, vector<1x384x128xbf16>
    %6 = vector.shape_cast %5 : vector<1x384x128xbf16> to vector<384x128xbf16>
    %cst_9 = arith.constant dense<0.000000e+00> : vector<224x128xf32>
    %7 = tpu.matmul %4, %6, %cst_9 {dimension_numbers = #tpu.dot_dimension_numbers<[1], [0], [0], [1], [0, 0, 1, 1], [], []>} : vector<224x384xbf16>, vector<384x128xbf16>, vector<224x128xf32> -> vector<224x128xf32>
    %8 = arith.addf %2, %7 : vector<224x128xf32>
    %c0_10 = arith.constant 0 : index
    %c0_11 = arith.constant 0 : index
    %9 = vector.load %arg7[%c0_10, %c0_11] : memref<224x128xf32, #tpu.memory_space<vmem>>, vector<224x128xf32>
    tpu.vector_store %arg7[%c0_10, %c0_11], %8 {strides = array<i32>} : memref<224x128xf32, #tpu.memory_space<vmem>>, vector<224x128xf32>,
    %c0_12 = arith.constant 0 : index
    %c0_13 = arith.constant 0 : index
    %10 = vector.load %arg7[%c0_12, %c0_13] : memref<224x128xf32, #tpu.memory_space<vmem>>, vector<224x128xf32>
    %c0_14 = arith.constant 0 : index
    %c16 = arith.constant 16 : index
    %c0_15 = arith.constant 0 : index
    %11 = vector.load %arg1[%c0_14, %c16, %c0_15] : memref<1x256x384xbf16, #tpu.memory_space<vmem>>, vector<1x224x384xbf16>
    %12 = vector.shape_cast %11 : vector<1x224x384xbf16> to vector<224x384xbf16>
    %c1 = arith.constant 1 : index
    %c0_16 = arith.constant 0 : index
    %c0_17 = arith.constant 0 : index
    %13 = vector.load %arg2[%c1, %c0_16, %c0_17] : memref<3x384x128xbf16, #tpu.memory_space<vmem>>, vector<1x384x128xbf16>
    %14 = vector.shape_cast %13 : vector<1x384x128xbf16> to vector<384x128xbf16>
    %cst_18 = arith.constant dense<0.000000e+00> : vector<224x128xf32>
    %15 = tpu.matmul %12, %14, %cst_18 {dimension_numbers = #tpu.dot_dimension_numbers<[1], [0], [0], [1], [0, 0, 1, 1], [], []>} : vector<224x384xbf16>, vector<384x128xbf16>, vector<224x128xf32> -> vector<224x128xf32>
    %16 = arith.addf %10, %15 : vector<224x128xf32>
    %c0_19 = arith.constant 0 : index
    %c0_20 = arith.constant 0 : index
    %17 = vector.load %arg7[%c0_19, %c0_20] : memref<224x128xf32, #tpu.memory_space<vmem>>, vector<224x128xf32>
    tpu.vector_store %arg7[%c0_19, %c0_20], %16 {strides = array<i32>} : memref<224x128xf32, #tpu.memory_space<vmem>>, vector<224x128xf32>,
    %c0_21 = arith.constant 0 : index
    %c0_22 = arith.constant 0 : index
    %18 = vector.load %arg7[%c0_21, %c0_22] : memref<224x128xf32, #tpu.memory_space<vmem>>, vector<224x128xf32>
    %c0_23 = arith.constant 0 : index
    %c32 = arith.constant 32 : index
    %c0_24 = arith.constant 0 : index
    %19 = vector.load %arg1[%c0_23, %c32, %c0_24] : memref<1x256x384xbf16, #tpu.memory_space<vmem>>, vector<1x224x384xbf16>
    %20 = vector.shape_cast %19 : vector<1x224x384xbf16> to vector<224x384xbf16>
    %c2 = arith.constant 2 : index
    %c0_25 = arith.constant 0 : index
    %c0_26 = arith.constant 0 : index
    %21 = vector.load %arg2[%c2, %c0_25, %c0_26] : memref<3x384x128xbf16, #tpu.memory_space<vmem>>, vector<1x384x128xbf16>
    %22 = vector.shape_cast %21 : vector<1x384x128xbf16> to vector<384x128xbf16>
    %cst_27 = arith.constant dense<0.000000e+00> : vector<224x128xf32>
    %23 = tpu.matmul %20, %22, %cst_27 {dimension_numbers = #tpu.dot_dimension_numbers<[1], [0], [0], [1], [0, 0, 1, 1], [], []>} : vector<224x384xbf16>, vector<384x128xbf16>, vector<224x128xf32> -> vector<224x128xf32>
    %24 = arith.addf %18, %23 : vector<224x128xf32>
    %c0_28 = arith.constant 0 : index
    %c0_29 = arith.constant 0 : index
    %25 = vector.load %arg7[%c0_28, %c0_29] : memref<224x128xf32, #tpu.memory_space<vmem>>, vector<224x128xf32>
    tpu.vector_store %arg7[%c0_28, %c0_29], %24 {strides = array<i32>} : memref<224x128xf32, #tpu.memory_space<vmem>>, vector<224x128xf32>,
    %c0_30 = arith.constant 0 : index
    %c0_31 = arith.constant 0 : index
    %26 = vector.load %arg7[%c0_30, %c0_31] : memref<224x128xf32, #tpu.memory_space<vmem>>, vector<224x128xf32>
    %c0_32 = arith.constant 0 : index
    %c0_33 = arith.constant 0 : index
    %c0_34 = arith.constant 0 : index
    %27 = vector.load %arg4[%c0_32, %c0_33, %c0_34] : memref<1x224x128xf32, #tpu.memory_space<vmem>>, vector<1x224x128xf32>
    %28 = vector.shape_cast %27 : vector<1x224x128xf32> to vector<224x128xf32>
    %29 = vector.shape_cast %26 : vector<224x128xf32> to vector<1x224x128xf32>
    tpu.vector_store %arg4[%c0_32, %c0_33, %c0_34], %29 {strides = array<i32>} : memref<1x224x128xf32, #tpu.memory_space<vmem>>, vector<1x224x128xf32>,
    %c0_35 = arith.constant 0 : index
    %c0_36 = arith.constant 0 : index
    %30 = vector.load %arg3[%c0_35, %c0_36] : memref<224x1xf32, #tpu.memory_space<vmem>>, vector<224x1xf32>
    %31 = vector.broadcast %30 : vector<224x1xf32> to vector<224x128xf32>
    %32 = arith.mulf %26, %31 : vector<224x128xf32>
    %cst_37 = arith.constant dense<0.000000e+00> : vector<128xf32>
    %33 = vector.multi_reduction <add>, %32, %cst_37 [0] : vector<224x128xf32> to vector<128xf32>
    %34 = vector.shape_cast %33 : vector<128xf32> to vector<1x128xf32>
    %c0_38 = arith.constant 0 : index
    %c0_39 = arith.constant 0 : index
    %c0_40 = arith.constant 0 : index
    %35 = vector.load %arg5[%c0_38, %c0_39, %c0_40] : memref<1x1x128xf32, #tpu.memory_space<vmem>>, vector<1x1x128xf32>
    %36 = vector.shape_cast %35 : vector<1x1x128xf32> to vector<1x128xf32>
    %37 = vector.shape_cast %34 : vector<1x128xf32> to vector<1x1x128xf32>
    tpu.vector_store %arg5[%c0_38, %c0_39, %c0_40], %37 {strides = array<i32>} : memref<1x1x128xf32, #tpu.memory_space<vmem>>, vector<1x1x128xf32>,
    %38 = arith.mulf %26, %26 : vector<224x128xf32>
    %39 = vector.broadcast %30 : vector<224x1xf32> to vector<224x128xf32>
    %40 = arith.mulf %38, %39 : vector<224x128xf32>
    %cst_41 = arith.constant dense<0.000000e+00> : vector<128xf32>
    %41 = vector.multi_reduction <add>, %40, %cst_41 [0] : vector<224x128xf32> to vector<128xf32>
    %42 = vector.shape_cast %41 : vector<128xf32> to vector<1x128xf32>
    %c0_42 = arith.constant 0 : index
    %c0_43 = arith.constant 0 : index
    %c0_44 = arith.constant 0 : index
    %43 = vector.load %arg6[%c0_42, %c0_43, %c0_44] : memref<1x1x128xf32, #tpu.memory_space<vmem>>, vector<1x1x128xf32>
    %44 = vector.shape_cast %43 : vector<1x1x128xf32> to vector<1x128xf32>
    %45 = vector.shape_cast %42 : vector<1x128xf32> to vector<1x1x128xf32>
    tpu.vector_store %arg6[%c0_42, %c0_43, %c0_44], %45 {strides = array<i32>} : memref<1x1x128xf32, #tpu.memory_space<vmem>>, vector<1x1x128xf32>,
    return
  }
  func.func @transform_0(%arg0: i32) -> (i32, i32, i32) {
    %c0_i32 = arith.constant 0 : i32
    %c0_i32_0 = arith.constant 0 : i32
    %c0_i32_1 = arith.constant 0 : i32
    return %arg0, %c0_i32, %c0_i32_0 : i32, i32, i32
  }
  func.func @transform_1(%arg0: i32) -> (i32, i32, i32) {
    %c0_i32 = arith.constant 0 : i32
    %c0_i32_0 = arith.constant 0 : i32
    %c0_i32_1 = arith.constant 0 : i32
    %c0_i32_2 = arith.constant 0 : i32
    return %c0_i32, %c0_i32_0, %c0_i32_1 : i32, i32, i32
  }
  func.func @transform_2(%arg0: i32) -> (i32, i32) {
    %c0_i32 = arith.constant 0 : i32
    %c0_i32_0 = arith.constant 0 : i32
    %c0_i32_1 = arith.constant 0 : i32
    return %c0_i32, %c0_i32_0 : i32, i32
  }
  func.func @transform_3(%arg0: i32) -> (i32, i32, i32) {
    %c0_i32 = arith.constant 0 : i32
    %c0_i32_0 = arith.constant 0 : i32
    %c0_i32_1 = arith.constant 0 : i32
    return %arg0, %c0_i32, %c0_i32_0 : i32, i32, i32
  }
  func.func @transform_4(%arg0: i32) -> (i32, i32, i32) {
    %c0_i32 = arith.constant 0 : i32
    %c0_i32_0 = arith.constant 0 : i32
    %c0_i32_1 = arith.constant 0 : i32
    return %arg0, %c0_i32, %c0_i32_0 : i32, i32, i32
  }
  func.func @transform_5(%arg0: i32) -> (i32, i32, i32) {
    %c0_i32 = arith.constant 0 : i32
    %c0_i32_0 = arith.constant 0 : i32
    %c0_i32_1 = arith.constant 0 : i32
    return %arg0, %c0_i32, %c0_i32_0 : i32, i32, i32
  }
}

module attributes {stable_mosaic.version = 11 : i64} {
  func.func @out_kernel(%arg0: i32, %arg1: memref<1x224x128xf32, #tpu.memory_space<vmem>>, %arg2: memref<1x224x128xf32, #tpu.memory_space<vmem>>, %arg3: memref<1x128xf32, #tpu.memory_space<vmem>>, %arg4: memref<1x128xf32, #tpu.memory_space<vmem>>, %arg5: memref<1x224x128xf32, #tpu.memory_space<vmem>>) attributes {dimension_semantics = [#tpu.dimension_semantics<parallel>], iteration_bounds = array<i64: 2>, scalar_prefetch = 0 : i64, scratch_operands = 0 : i64, tpu.core_type = #tpu.core_type<tc>, window_params = [{transform_indices = @transform_0, window_bounds = array<i64: 1, 224, 128>}, {transform_indices = @transform_1, window_bounds = array<i64: 1, 224, 128>}, {pipeline_mode = #tpu.pipeline_mode<synchronous>, transform_indices = @transform_2, window_bounds = array<i64: 1, 128>}, {pipeline_mode = #tpu.pipeline_mode<synchronous>, transform_indices = @transform_3, window_bounds = array<i64: 1, 128>}, {transform_indices = @transform_4, window_bounds = array<i64: 1, 224, 128>}]} {
    %c0 = arith.constant 0 : index
    %c0_0 = arith.constant 0 : index
    %c0_1 = arith.constant 0 : index
    %0 = vector.load %arg1[%c0, %c0_0, %c0_1] : memref<1x224x128xf32, #tpu.memory_space<vmem>>, vector<1x224x128xf32>
    %1 = vector.shape_cast %0 : vector<1x224x128xf32> to vector<224x128xf32>
    %c0_2 = arith.constant 0 : index
    %c0_3 = arith.constant 0 : index
    %2 = vector.load %arg3[%c0_2, %c0_3] : memref<1x128xf32, #tpu.memory_space<vmem>>, vector<1x128xf32>
    %3 = vector.broadcast %2 : vector<1x128xf32> to vector<224x128xf32>
    %4 = arith.mulf %1, %3 : vector<224x128xf32>
    %c0_4 = arith.constant 0 : index
    %c0_5 = arith.constant 0 : index
    %5 = vector.load %arg4[%c0_4, %c0_5] : memref<1x128xf32, #tpu.memory_space<vmem>>, vector<1x128xf32>
    %6 = vector.broadcast %5 : vector<1x128xf32> to vector<224x128xf32>
    %7 = arith.addf %4, %6 : vector<224x128xf32>
    %c0_6 = arith.constant 0 : index
    %c0_7 = arith.constant 0 : index
    %c0_8 = arith.constant 0 : index
    %8 = vector.load %arg2[%c0_6, %c0_7, %c0_8] : memref<1x224x128xf32, #tpu.memory_space<vmem>>, vector<1x224x128xf32>
    %9 = vector.shape_cast %8 : vector<1x224x128xf32> to vector<224x128xf32>
    %10 = arith.addf %7, %9 : vector<224x128xf32>
    %cst = arith.constant 0.000000e+00 : f32
    %11 = vector.broadcast %cst : f32 to vector<224x128xf32>
    %12 = arith.maximumf %10, %11 : vector<224x128xf32>
    %c0_9 = arith.constant 0 : index
    %c0_10 = arith.constant 0 : index
    %c0_11 = arith.constant 0 : index
    %13 = vector.load %arg5[%c0_9, %c0_10, %c0_11] : memref<1x224x128xf32, #tpu.memory_space<vmem>>, vector<1x224x128xf32>
    %14 = vector.shape_cast %13 : vector<1x224x128xf32> to vector<224x128xf32>
    %15 = vector.shape_cast %12 : vector<224x128xf32> to vector<1x224x128xf32>
    tpu.vector_store %arg5[%c0_9, %c0_10, %c0_11], %15 {strides = array<i32>} : memref<1x224x128xf32, #tpu.memory_space<vmem>>, vector<1x224x128xf32>,
    return
  }
  func.func @transform_0(%arg0: i32) -> (i32, i32, i32) {
    %c0_i32 = arith.constant 0 : i32
    %c0_i32_0 = arith.constant 0 : i32
    %c0_i32_1 = arith.constant 0 : i32
    return %arg0, %c0_i32, %c0_i32_0 : i32, i32, i32
  }
  func.func @transform_1(%arg0: i32) -> (i32, i32, i32) {
    %c0_i32 = arith.constant 0 : i32
    %c0_i32_0 = arith.constant 0 : i32
    %c0_i32_1 = arith.constant 0 : i32
    return %arg0, %c0_i32, %c0_i32_0 : i32, i32, i32
  }
  func.func @transform_2(%arg0: i32) -> (i32, i32) {
    %c0_i32 = arith.constant 0 : i32
    %c0_i32_0 = arith.constant 0 : i32
    %c0_i32_1 = arith.constant 0 : i32
    return %c0_i32, %c0_i32_0 : i32, i32
  }
  func.func @transform_3(%arg0: i32) -> (i32, i32) {
    %c0_i32 = arith.constant 0 : i32
    %c0_i32_0 = arith.constant 0 : i32
    %c0_i32_1 = arith.constant 0 : i32
    return %c0_i32, %c0_i32_0 : i32, i32
  }
  func.func @transform_4(%arg0: i32) -> (i32, i32, i32) {
    %c0_i32 = arith.constant 0 : i32
    %c0_i32_0 = arith.constant 0 : i32
    %c0_i32_1 = arith.constant 0 : i32
    return %arg0, %c0_i32, %c0_i32_0 : i32, i32, i32
  }
}

</mosaic_0001>

<bundles_post_ra>
// kernel: basic_block_forward.5
= control target key start
LH: loop header
LB: loop body
LE: loop exit
PB: predicated region body
PF: predicated region fallthrough
CT: control target
= control target key end

     0   :  { %s528_s15 = smov 0   ;;  %s612_s0 = inlined_call_operand.vmem [shape: f32[512,128], index: 0, kind: input, shape index: {}]   ;;  %s613_s1 = inlined_call_operand.vmem [shape: f32[1,128], index: 1, kind: input, shape index: {}]   ;;  %s614_s2 = inlined_call_operand.vmem [shape: f32[1,128], index: 2, kind: input, shape index: {}]   ;;  %s615_s3 = inlined_call_operand.vmem [shape: bf16[512,128], index: 3, kind: output, shape index: {0}]   ;;  %s616_s4 = inlined_call_operand.vmem [shape: f32[512,128], index: 4, kind: output, shape index: {1}]  }
   0x1 LB: > { %s425_s16 = sadd.s32 4294967295, %s501_s15   ;;  %p429_p0 = scmp.ge.s32.totalorder %s501_s15, 1  ;;  %s501_s15 = sphi %s528_s15, %s15_s15  }
   0x2   : > { %p166_p1 = scmp.lt.s32.totalorder %s501_s15, 5 }
   0x4   : > { %p167_p2 = pnand %p429_p0, %p166_p1 }
   0x5   : > { %s430_s17 = sshll.u32 (!%p167_p2), %s425_s16, 4 }
   0x6   : > { %170 = sbr.rel (%p167_p2) target bundleno = 43 (0x2b), region = 32  ;;  %p198_p3 = scmp.lt.s32.totalorder (!%p167_p2), %s430_s17, 63 }
   0xb   : > { %s618_s17 = smov (!%p198_p3, %s430_s17), 63  ;;  %v493_v0 = vld [vmem:[%s613_s1] ss:$0 sm:$0xff] }
   0xc   : > { %s431_s20 = sshll.u32 %s618_s17, 3  ;;  %v550_v1 = vld [vmem:[%s614_s2] ss:$0 sm:$0xff]  ;;  %s433_s29 = sshll.u32 %s618_s17, 2 }
   0xd   : > { %s545_s23 = scalar_lea.vmem %s612_s0, %s431_s20  ;;  %s561_s28 = scalar_lea.vmem %s616_s4, %s431_s20 }
   0xe   : > { %v215_v2 = vld [vmem:[%s545_s23] sm:$0xff]  ;;  %v216_v3 = vld [vmem:[%s545_s23 + $0x8] sm:$0xff]  ;;  %v217_v4 = vld [vmem:[%s545_s23 + $0x10] sm:$0xff]  ;;  %s207_s6 = scalar_lea.vmem %s615_s3, %s433_s29 }
   0xf   : > { %v235_v5 = vmul.f32 %v493_v0, %v215_v2  ;;  %v236_v6 = vmul.f32 %v493_v0, %v216_v3  ;;  %v237_v7 = vmul.f32 %v493_v0, %v217_v4  ;;  %v218_v8 = vld [vmem:[%s545_s23 + $0x18] sm:$0xff]  ;;  %v219_v9 = vld [vmem:[%s545_s23 + $0x20] sm:$0xff]  ;;  %v220_v10 = vld [vmem:[%s545_s23 + $0x28] sm:$0xff] }
  0x10   : > { %v238_v11 = vmul.f32 %v493_v0, %v218_v8  ;;  %v221_v12 = vld [vmem:[%s545_s23 + $0x30] sm:$0xff]  ;;  %v239_v14 = vmul.f32 %v493_v0, %v219_v9  ;;  %v222_v15 = vld [vmem:[%s545_s23 + $0x38] sm:$0xff]  ;;  %v240_v17 = vmul.f32 %v493_v0, %v220_v10  ;;  %v223_v18 = vld [vmem:[%s545_s23 + $0x40] sm:$0xff] }
  0x11   : > { %v255_v13 = vadd.f32 %v550_v1, %v235_v5  ;;  %v256_v16 = vadd.f32 %v550_v1, %v236_v6  ;;  %v257_v19 = vadd.f32 %v550_v1, %v237_v7  ;;  %v241_v20 = vmul.f32 %v493_v0, %v221_v12  ;;  %v224_v21 = vld [vmem:[%s545_s23 + $0x48] sm:$0xff]  ;;  %v225_v24 = vld [vmem:[%s545_s23 + $0x50] sm:$0xff]  ;;  %v226_v27 = vld [vmem:[%s545_s23 + $0x58] sm:$0xff] }
  0x12   : > { %v258_v22 = vadd.f32 %v550_v1, %v238_v11  ;;  %v242_v23 = vmul.f32 %v493_v0, %v222_v15  ;;  %v259_v25 = vadd.f32 %v550_v1, %v239_v14  ;;  %v243_v26 = vmul.f32 %v493_v0, %v223_v18  ;;  %v227_v30 = vld [vmem:[%s545_s23 + $0x60] sm:$0xff]  ;;  %v228_v31 = vld [vmem:[%s545_s23 + $0x68] sm:$0xff]  ;;  %v229_v34 = vld [vmem:[%s545_s23 + $0x70] sm:$0xff] }
  0x13   : > { %271 = vst [vmem:[%s561_s28] sm:$0xff] %v255_v13  ;;  %v260_v28 = vadd.f32 %v550_v1, %v240_v17  ;;  %v244_v29 = vmul.f32 %v493_v0, %v224_v21  ;;  %v261_v32 = vadd.f32 %v550_v1, %v241_v20  ;;  %v245_v33 = vmul.f32 %v493_v0, %v225_v24  ;;  %v230_v35 = vld [vmem:[%s545_s23 + $0x78] sm:$0xff] }
  0x14   : > { %272 = vst [vmem:[%s561_s28 + $0x8] sm:$0xff] %v256_v16  ;;  %v262_v36 = vadd.f32 %v550_v1, %v242_v23  ;;  %v246_v37 = vmul.f32 %v493_v0, %v226_v27  ;;  %v263_v38 = vadd.f32 %v550_v1, %v243_v26  ;;  %v247_v39 = vmul.f32 %v493_v0, %v227_v30 }
  0x15   : > { %273 = vst [vmem:[%s561_s28 + $0x10] sm:$0xff] %v257_v19  ;;  %v248_v40 = vmul.f32 %v493_v0, %v228_v31  ;;  %v264_v41 = vadd.f32 %v550_v1, %v244_v29  ;;  %v249_v42 = vmul.f32 %v493_v0, %v229_v34  ;;  %v250_v43 = vmul.f32 %v493_v0, %v230_v35 }
  0x16   : > { %274 = vst [vmem:[%s561_s28 + $0x18] sm:$0xff] %v258_v22  ;;  %v265_v44 = vadd.f32 %v550_v1, %v245_v33  ;;  %v287_v45 = vmax.f32 %v255_v13, 0.0  ;;  %v288_v46 = vmax.f32 %v256_v16, 0.0  ;;  %v266_v47 = vadd.f32 %v550_v1, %v246_v37 }
  0x17   : > { %275 = vst [vmem:[%s561_s28 + $0x20] sm:$0xff] %v259_v25  ;;  %v289_v48 = vmax.f32 %v257_v19, 0.0  ;;  %v290_v49 = vmax.f32 %v258_v22, 0.0  ;;  %v267_v50 = vadd.f32 %v550_v1, %v247_v39  ;;  %v268_v51 = vadd.f32 %v550_v1, %v248_v40 }
  0x18   : > { %276 = vst [vmem:[%s561_s28 + $0x28] sm:$0xff] %v260_v28  ;;  %v291_v52 = vmax.f32 %v259_v25, 0.0  ;;  %v292_v53 = vmax.f32 %v260_v28, 0.0  ;;  %v269_v54 = vadd.f32 %v550_v1, %v249_v42  ;;  %v270_v55 = vadd.f32 %v550_v1, %v250_v43 }
  0x19   : > { %277 = vst [vmem:[%s561_s28 + $0x30] sm:$0xff] %v261_v32  ;;  %v293_v56 = vmax.f32 %v261_v32, 0.0  ;;  %v294_v57 = vmax.f32 %v262_v36, 0.0  ;;  %v441_v58 = vpack.c.bf16 %v288_v46, %v287_v45  ;;  %v295_v59 = vmax.f32 %v263_v38, 0.0 }
  0x1a   : > { %278 = vst [vmem:[%s561_s28 + $0x38] sm:$0xff] %v262_v36  ;;  %v296_v60 = vmax.f32 %v264_v41, 0.0  ;;  %v446_v61 = vpack.c.bf16 %v290_v49, %v289_v48  ;;  %v297_v62 = vmax.f32 %v265_v44, 0.0  ;;  %v298_v63 = vmax.f32 %v266_v47, 0.0 }
  0x1b   : > { %279 = vst [vmem:[%s561_s28 + $0x40] sm:$0xff] %v263_v38  ;;  %v451_v0 = vpack.c.bf16 %v292_v53, %v291_v52  ;;  %v299_v2 = vmax.f32 %v267_v50, 0.0  ;;  %v300_v3 = vmax.f32 %v268_v51, 0.0  ;;  %v456_v1 = vpack.c.bf16 %v294_v57, %v293_v56 }
  0x1c   : > { %280 = vst [vmem:[%s561_s28 + $0x48] sm:$0xff] %v264_v41  ;;  %v301_v4 = vmax.f32 %v269_v54, 0.0  ;;  %v302_v5 = vmax.f32 %v270_v55, 0.0  ;;  %v461_v6 = vpack.c.bf16 %v296_v60, %v295_v59  ;;  %v466_v7 = vpack.c.bf16 %v298_v63, %v297_v62 }
  0x1d   : > { %281 = vst [vmem:[%s561_s28 + $0x50] sm:$0xff] %v265_v44  ;;  %v471_v8 = vpack.c.bf16 %v300_v3, %v299_v2 }
  0x1e   : > { %282 = vst [vmem:[%s561_s28 + $0x58] sm:$0xff] %v266_v47  ;;  %v476_v9 = vpack.c.bf16 %v302_v5, %v301_v4 }
  0x1f   : > { %283 = vst [vmem:[%s561_s28 + $0x60] sm:$0xff] %v267_v50 }
  0x20   : > { %284 = vst [vmem:[%s561_s28 + $0x68] sm:$0xff] %v268_v51 }
  0x21   : > { %285 = vst [vmem:[%s561_s28 + $0x70] sm:$0xff] %v269_v54 }
  0x22   : > { %286 = vst [vmem:[%s561_s28 + $0x78] sm:$0xff] %v270_v55 }
  0x23   : > { %442 = vst [vmem:[%s207_s6] sm:$0xff] %v441_v58  }
  0x24   : > { %478 = vst [vmem:[%s207_s6 + $0x8] sm:$0xff] %v446_v61  }
  0x25   : > { %479 = vst [vmem:[%s207_s6 + $0x10] sm:$0xff] %v451_v0  }
  0x26   : > { %480 = vst [vmem:[%s207_s6 + $0x18] sm:$0xff] %v456_v1  }
  0x27   : > { %481 = vst [vmem:[%s207_s6 + $0x20] sm:$0xff] %v461_v6  }
  0x28   : > { %482 = vst [vmem:[%s207_s6 + $0x28] sm:$0xff] %v466_v7  }
  0x29   : > { %483 = vst [vmem:[%s207_s6 + $0x30] sm:$0xff] %v471_v8  }
  0x2a   : > { %484 = vst [vmem:[%s207_s6 + $0x38] sm:$0xff] %v476_v9  }
  0x2b PF: > { %s15_s15 = sadd.s32 1, %s501_s15  }
  0x2c   : > { %p12_p4 = scmp.ge.s32.totalorder %s15_s15, 6  }
  0x2e   :  { %14 = sbr.rel (!%p12_p4) target bundleno = 1 (0x1), region = 74 }

// kernel: basic_block_forward.4
= control target key start
LH: loop header
LB: loop body
LE: loop exit
PB: predicated region body
PF: predicated region fallthrough
CT: control target
= control target key end

     0   :  { %s627_s15 = smov 0   ;;  %s707_s0 = inlined_call_operand.vmem [shape: bf16[512,36], index: 0, kind: input, shape index: {}]   ;;  %s708_s1 = inlined_call_operand.vmem [shape: bf16[36,128], index: 1, kind: input, shape index: {}]   ;;  %s709_s2 = inlined_call_operand.vmem [shape: f32[512,128], index: 2, kind: output, shape index: {0}]   ;;  %s710_s3 = inlined_call_operand.vmem [shape: f32[1,128], index: 3, kind: output, shape index: {1}]   ;;  %s711_s4 = inlined_call_operand.vmem [shape: f32[1,128], index: 4, kind: output, shape index: {2}]  }
   0x1 LB: > { %s505_s16 = sadd.s32 4294967295, %s599_s15   ;;  %p509_p0 = scmp.ge.s32.totalorder %s599_s15, 1  ;;  %s599_s15 = sphi %s627_s15, %s15_s15  }
   0x2   : > { %p158_p1 = scmp.lt.s32.totalorder %s599_s15, 5 }
   0x4   : > { %p159_p2 = pnand %p509_p0, %p158_p1 }
   0x5   : > { %s510_s17 = sshll.u32 (!%p159_p2), %s505_s16, 4  ;;  %p514_p4 = scmp.ne.s32.totalorder (!%p159_p2), %s505_s16, 0 }
   0x6   : > { %162 = sbr.rel (%p159_p2) target bundleno = 229 (0xe5), region = 28  ;;  %p185_p3 = scmp.lt.s32.totalorder (!%p159_p2), %s510_s17, 63 }
   0xb   : > { %s713_s17 = smov (!%p185_p3, %s510_s17), 63  ;;  %200 = sbr.rel (%p514_p4) target bundleno = 19 (0x13), region = 32 }
   0xc   : > { %s511_s18 = sshll.u32 %s713_s17, 2  ;;  %s513_s19 = sshll.u32 %s713_s17, 3 }
   0xd   : > { %s638_s22 = scalar_lea.vmem %s707_s0, %s511_s18  ;;  %s643_s25 = scalar_lea.vmem %s709_s2, %s513_s19 }
  0x10   : > { %v601_v0 = vmov 0.0  }
  0x11   : > { %201 = vst [vmem:[%s710_s3] sm:$0x1] %v601_v0 }
  0x12   : > { %202 = vst [vmem:[%s711_s4] sm:$0x1] %v601_v0 }
  0x13 PF: > { %v223_v1 = vld [vmem:[%s708_s1 + $0x10] sm:$0x3]  ;;  %vm304_vm0 = vcmask 1041408   ;;  %v574_v5 = vld [vmem:[%s708_s1 + $0x8] sm:$0xff]  ;;  %v573_v6 = vld [vmem:[%s708_s1] sm:$0xff]  ;;  %vm279_vm1 = vcmask 293888  }
  0x14   : > { %v273_v2 = vunpack.c.l.b16 %v223_v1  ;;  %v565_v7 = vld [vmem:[%s638_s22] sm:$0xff]  ;;  %v567_v8 = vld [vmem:[%s638_s22 + $0x10] sm:$0xff]  ;;  %v566_v11 = vld [vmem:[%s638_s22 + $0x8] sm:$0xff] }
  0x15   : > { %v569_v9 = vld [vmem:[%s638_s22 + $0x20] sm:$0xff]  ;;  %v571_v10 = vld [vmem:[%s638_s22 + $0x30] sm:$0xff]  ;;  %v568_v12 = vld [vmem:[%s638_s22 + $0x18] sm:$0xff] }
  0x16   : > { %v276_v3 = vpack.c.b16 %v273_v2, %v273_v2  ;;  %v570_v13 = vld [vmem:[%s638_s22 + $0x28] sm:$0xff]  ;;  %v572_v14 = vld [vmem:[%s638_s22 + $0x38] sm:$0xff] }
  0x18   : > { %v306_v4 = vsel %vm304_vm0, %v276_v3, 0 }
  0x19   : > { %313 = vmatpush.bf16.msra.mxu0 %v306_v4  ;;  %575 = vmatpush.bf16.msra.mxu1 %v306_v4 }
  0x1a   : > { %576 = vmatpush.bf16.msra.mxu2 %v306_v4  ;;  %577 = vmatpush.bf16.msra.mxu3 %v306_v4 }
  0x1d   : > { %314 = vmatpush.bf16.msra.mxu0 %v574_v5  ;;  %578 = vmatpush.bf16.msra.mxu1 %v574_v5 }
  0x1e   : > { %579 = vmatpush.bf16.msra.mxu2 %v574_v5  ;;  %580 = vmatpush.bf16.msra.mxu3 %v574_v5 }
  0x21   : > { %315 = vmatpush.bf16.msra.mxu0 %v573_v6  ;;  %581 = vmatpush.bf16.msra.mxu1 %v573_v6 }
  0x22   : > { %582 = vmatpush.bf16.msra.mxu2 %v573_v6  ;;  %583 = vmatpush.bf16.msra.mxu3 %v573_v6 }
  0x24   : > { %555 = vmatmul.msk.bf16.vlgmr.msra.gmra.mxu0 %vm279_vm1, %v565_v7  ;;  %557 = vmatmul.msk.bf16.vlgmr.msra.gmra.mxu1 %vm279_vm1, %v567_v8 }
  0x25   : > { %559 = vmatmul.msk.bf16.vlgmr.msra.gmra.mxu2 %vm279_vm1, %v569_v9  ;;  %561 = vmatmul.msk.bf16.vlgmr.msra.gmra.mxu3 %vm279_vm1, %v571_v10 }
  0x34   : > { %556 = vmatmul.msk.bf16.gmra.mxu0 %vm279_vm1, %v566_v11  ;;  %558 = vmatmul.msk.bf16.gmra.mxu1 %vm279_vm1, %v568_v12 }
  0x35   : > { %560 = vmatmul.msk.bf16.gmra.mxu2 %vm279_vm1, %v570_v13  ;;  %562 = vmatmul.msk.bf16.gmra.mxu3 %vm279_vm1, %v572_v14 }
  0xa1   : > { %v317_v15 = vpop.f32.mrf.mxu0  ;;  %v327_v16 = vpop.f32.mrf.mxu1 }
  0xa2   : > { %357 = vst [vmem:[%s643_s25] sm:$0xff] %v317_v15  ;;  %v398_v26 = vmul.f32 %v317_v15, %v317_v15  ;;  %v402_v38 = vmul.f32 %v327_v16, %v327_v16 }
  0xa3   : > { %361 = vst [vmem:[%s643_s25 + $0x20] sm:$0xff] %v327_v16 }
  0xa8   : > { %v337_v17 = vpop.f32.mrf.mxu2  ;;  %v347_v18 = vpop.f32.mrf.mxu3 }
  0xa9   : > { %v319_v19 = vpop.f32.mrf.mxu0  ;;  %v329_v20 = vpop.f32.mrf.mxu1  ;;  %365 = vst [vmem:[%s643_s25 + $0x40] sm:$0xff] %v337_v17  ;;  %v406_v52 = vmul.f32 %v337_v17, %v337_v17  ;;  %v410_v0 = vmul.f32 %v347_v18, %v347_v18 }
  0xaa   : > { %358 = vst [vmem:[%s643_s25 + $0x8] sm:$0xff] %v319_v19  ;;  %v399_v25 = vmul.f32 %v319_v19, %v319_v19  ;;  %v374_v27 = vadd.f32 %v319_v19, %v317_v15  ;;  %v403_v41 = vmul.f32 %v329_v20, %v329_v20 }
  0xab   : > { %362 = vst [vmem:[%s643_s25 + $0x28] sm:$0xff] %v329_v20 }
  0xac   : > { %369 = vst [vmem:[%s643_s25 + $0x60] sm:$0xff] %v347_v18  ;;  %v414_v29 = vadd.f32 %v399_v25, %v398_v26  ;;  %v397_v25 = vld [vmem:[%s711_s4] sm:$0x1] }
  0xb0   : > { %v339_v21 = vpop.f32.mrf.mxu2  ;;  %v349_v22 = vpop.f32.mrf.mxu3 }
  0xb1   : > { %v322_v23 = vpop.f32.mrf.mxu0  ;;  %v332_v24 = vpop.f32.mrf.mxu1  ;;  %366 = vst [vmem:[%s643_s25 + $0x48] sm:$0xff] %v339_v21  ;;  %v407_v55 = vmul.f32 %v339_v21, %v339_v21  ;;  %v411_v3 = vmul.f32 %v349_v22, %v349_v22 }
  0xb2   : > { %359 = vst [vmem:[%s643_s25 + $0x10] sm:$0xff] %v322_v23  ;;  %v400_v28 = vmul.f32 %v322_v23, %v322_v23  ;;  %v375_v30 = vadd.f32 %v374_v27, %v322_v23  ;;  %v404_v44 = vmul.f32 %v332_v24, %v332_v24 }
  0xb3   : > { %363 = vst [vmem:[%s643_s25 + $0x30] sm:$0xff] %v332_v24 }
  0xb4   : > { %370 = vst [vmem:[%s643_s25 + $0x68] sm:$0xff] %v349_v22  ;;  %v415_v35 = vadd.f32 %v414_v29, %v400_v28 }
  0xb8   : > { %v342_v31 = vpop.f32.mrf.mxu2  ;;  %v352_v32 = vpop.f32.mrf.mxu3 }
  0xb9   : > { %v324_v33 = vpop.f32.mrf.mxu0  ;;  %v334_v34 = vpop.f32.mrf.mxu1  ;;  %367 = vst [vmem:[%s643_s25 + $0x50] sm:$0xff] %v342_v31  ;;  %v408_v59 = vmul.f32 %v342_v31, %v342_v31  ;;  %v412_v7 = vmul.f32 %v352_v32, %v352_v32 }
  0xba   : > { %360 = vst [vmem:[%s643_s25 + $0x18] sm:$0xff] %v324_v33  ;;  %v376_v36 = vadd.f32 %v375_v30, %v324_v33  ;;  %v401_v37 = vmul.f32 %v324_v33, %v324_v33  ;;  %v405_v50 = vmul.f32 %v334_v34, %v334_v34 }
  0xbb   : > { %364 = vst [vmem:[%s643_s25 + $0x38] sm:$0xff] %v334_v34 }
  0xbc   : > { %v377_v39 = vadd.f32 %v376_v36, %v327_v16  ;;  %v416_v40 = vadd.f32 %v415_v35, %v401_v37  ;;  %371 = vst [vmem:[%s643_s25 + $0x70] sm:$0xff] %v352_v32 }
  0xbe   : > { %v417_v42 = vadd.f32 %v416_v40, %v402_v38  ;;  %v378_v43 = vadd.f32 %v377_v39, %v329_v20 }
  0xc0   : > { %v379_v45 = vadd.f32 %v378_v43, %v332_v24  ;;  %v418_v46 = vadd.f32 %v417_v42, %v403_v41  ;;  %v344_v47 = vpop.f32.mrf.mxu2  ;;  %v354_v48 = vpop.f32.mrf.mxu3 }
  0xc1   : > { %368 = vst [vmem:[%s643_s25 + $0x58] sm:$0xff] %v344_v47  ;;  %v409_v63 = vmul.f32 %v344_v47, %v344_v47  ;;  %v413_v11 = vmul.f32 %v354_v48, %v354_v48 }
  0xc2   : > { %v380_v49 = vadd.f32 %v379_v45, %v334_v34  ;;  %v419_v51 = vadd.f32 %v418_v46, %v404_v44  ;;  %372 = vst [vmem:[%s643_s25 + $0x78] sm:$0xff] %v354_v48 }
  0xc4   : > { %v381_v53 = vadd.f32 %v380_v49, %v337_v17  ;;  %v420_v54 = vadd.f32 %v419_v51, %v405_v50 }
  0xc6   : > { %v421_v56 = vadd.f32 %v420_v54, %v406_v52  ;;  %v382_v57 = vadd.f32 %v381_v53, %v339_v21 }
  0xc8   : > { %v383_v58 = vadd.f32 %v382_v57, %v342_v31  ;;  %v422_v60 = vadd.f32 %v421_v56, %v407_v55 }
  0xca   : > { %v423_v61 = vadd.f32 %v422_v60, %v408_v59  ;;  %v384_v62 = vadd.f32 %v383_v58, %v344_v47 }
  0xcc   : > { %v385_v1 = vadd.f32 %v384_v62, %v347_v18  ;;  %v424_v2 = vadd.f32 %v423_v61, %v409_v63 }
  0xce   : > { %v425_v4 = vadd.f32 %v424_v2, %v410_v0  ;;  %v386_v5 = vadd.f32 %v385_v1, %v349_v22  ;;  %v373_v22 = vld [vmem:[%s710_s3] sm:$0x1] }
  0xd0   : > { %v387_v6 = vadd.f32 %v386_v5, %v352_v32  ;;  %v426_v8 = vadd.f32 %v425_v4, %v411_v3 }
  0xd2   : > { %v427_v9 = vadd.f32 %v426_v8, %v412_v7  ;;  %v388_v10 = vadd.f32 %v387_v6, %v354_v48 }
  0xd4   : > { %v389_v12 = vrot.slane %v388_v10, 4  ;;  %v428_v13 = vadd.f32 %v427_v9, %v413_v11 }
  0xd6   : > { %v390_v14 = vadd.f32 %v389_v12, %v388_v10  ;;  %v429_v15 = vrot.slane %v428_v13, 4 }
  0xd8   : > { %v391_v16 = vrot.slane %v390_v14, 2  ;;  %v430_v17 = vadd.f32 %v429_v15, %v428_v13 }
  0xda   : > { %v392_v19 = vadd.f32 %v391_v16, %v390_v14  ;;  %v431_v20 = vrot.slane %v430_v17, 2 }
  0xdc   : > { %v393_v21 = vrot.slane %v392_v19, 1  ;;  %v432_v18 = vadd.f32 %v431_v20, %v430_v17 }
  0xde   : > { %v394_v23 = vadd.f32 %v393_v21, %v392_v19  ;;  %v433_v24 = vrot.slane %v432_v18, 1 }
  0xe0   : > { %v395_v26 = vadd.f32 %v394_v23, %v373_v22  ;;  %v434_v27 = vadd.f32 %v433_v24, %v432_v18 }
  0xe2   : > { %396 = vst [vmem:[%s710_s3] sm:$0x1] %v395_v26  ;;  %v435_v28 = vadd.f32 %v434_v27, %v397_v25 }
  0xe4   : > { %436 = vst [vmem:[%s711_s4] sm:$0x1] %v435_v28 }
  0xe5 PF: > { %s15_s15 = sadd.s32 1, %s599_s15  }
  0xe6   : > { %p12_p5 = scmp.ge.s32.totalorder %s15_s15, 6  }
  0xe8   :  { %14 = sbr.rel (!%p12_p5) target bundleno = 1 (0x1), region = 78 }

// kernel: tile.8
= control target key start
LH: loop header
LB: loop body
LE: loop exit
PB: predicated region body
PF: predicated region fallthrough
CT: control target
= control target key end

     0   :  { %s28_s0 = inlined_call_operand.vmem [shape: f32[16], index: 0, kind: input, shape index: {}]   ;;  %s29_s1 = inlined_call_operand.vmem [shape: f32[14,16], index: 1, kind: output, shape index: {}]  }
   0x1   :  { %v4_v0 = vld [vmem:[%s28_s0] ss:$0 sm:$0xff] }
   0x2   :  { %5 = vst [vmem:[%s29_s1] sm:$0xff] %v4_v0 }
   0x3   :  { %8 = vst [vmem:[%s29_s1 + $0x8] sm:$0xff] %v4_v0 }

// kernel: tile.0
= control target key start
LH: loop header
LB: loop body
LE: loop exit
PB: predicated region body
PF: predicated region fallthrough
CT: control target
= control target key end

     0   :  { %s501_s8 = smov 126   ;;  %s502_s9 = smov 127   ;;  %vm3_vm0 = vcmask 7168   ;;  %s1025_s0 = inlined_call_operand.vmem [shape: f32[14,16], index: 0, kind: input, shape index: {}]   ;;  %s1026_s1 = inlined_call_operand.vmem [shape: f32[224,1], index: 1, kind: output, shape index: {}]  }
   0x1   :  { %v40_v0 = vld [vmem:[%s1025_s0] sm:$0xff]   ;;  %s503_s10 = smov 125   ;;  %v378_v1 = vld [vmem:[%s1025_s0 + $0x8] sm:$0x3f]   ;;  %s504_s19 = smov 124  }
   0x2   :  { %41 = vrot.lane.b32.xlu1 %v40_v0, %s501_s8  ;;  %18 = vrot.lane.b32.xlu0 %v40_v0, %s502_s9  ;;  %v370_v2 = vld [vmem:[%s1025_s0 + $0x8] sm:$0x3f]   ;;  %s505_s20 = smov 123   ;;  %s506_s25 = smov 122  }
   0x3   :  { %64 = vrot.lane.b32.xlu2 %v40_v0, %s503_s10  ;;  %v386_v3 = vld [vmem:[%s1025_s0 + $0x8] sm:$0x3f]   ;;  %s507_s28 = smov 121   ;;  %s508_s29 = smov 120  }
   0x4   :  { %v394_v4 = vld [vmem:[%s1025_s0 + $0x8] sm:$0x3f]   ;;  %s509_s5 = smov 119   ;;  %4 = vst.msk [vmem:[%s1026_s1] ss:$16 sm:$0x3] %vm3_vm0, %v40_v0  }
   0x5   :  { %v402_v5 = vld [vmem:[%s1025_s0 + $0x8] sm:$0x3f]   ;;  %5 = vst.msk [vmem:[%s1026_s1] ss:$16 sm:$0xc] %vm3_vm0, %v40_v0   ;;  %s510_s16 = smov 118  }
   0x6   :  { %v410_v6 = vld [vmem:[%s1025_s0 + $0x8] sm:$0x3f]   ;;  %6 = vst.msk [vmem:[%s1026_s1] ss:$16 sm:$0x30] %vm3_vm0, %v40_v0   ;;  %s511_s17 = smov 117  }
   0x7   :  { %v418_v7 = vld [vmem:[%s1025_s0 + $0x8] sm:$0x3f]   ;;  %7 = vst.msk [vmem:[%s1026_s1] ss:$16 sm:$0xc0] %vm3_vm0, %v40_v0   ;;  %s512_s22 = smov 116  }
   0x8   :  { %v426_v8 = vld [vmem:[%s1025_s0 + $0x8] sm:$0x3f]   ;;  %s514_s26 = smov 114   ;;  %s515_s2 = smov 113  }
   0x9   :  { %v434_v9 = vld [vmem:[%s1025_s0 + $0x8] sm:$0x3f]  }
   0xa   :  { %54 = vrot.lane.b32.xlu1 %v378_v1, %s501_s8  ;;  %31 = vrot.lane.b32.xlu0 %v370_v2, %s502_s9  ;;  %v442_v10 = vld [vmem:[%s1025_s0 + $0x8] sm:$0x3f]  }
   0xb   :  { %77 = vrot.lane.b32.xlu2 %v386_v3, %s503_s10  ;;  %v450_v11 = vld [vmem:[%s1025_s0 + $0x8] sm:$0x3f]  }
   0xc   :  { %v458_v12 = vld [vmem:[%s1025_s0 + $0x8] sm:$0x3f]  }
   0xd   :  { %v466_v13 = vld [vmem:[%s1025_s0 + $0x8] sm:$0x3f]  }
   0xe   :  { %v474_v14 = vld [vmem:[%s1025_s0 + $0x8] sm:$0x3f]  }
   0xf   :  { %v482_v15 = vld [vmem:[%s1025_s0 + $0x8] sm:$0x3f]  }
  0x10   :  { %v362_v46 = vld [vmem:[%s1025_s0 + $0x8] sm:$0x3f]  }
  0x11   :  { %363 = vst.msk [vmem:[%s1026_s1 + $0x80] ss:$16 sm:$0x3] %vm3_vm0, %v362_v46  }
  0x12   :  { %100 = vrot.lane.b32.xlu1 %v394_v4, %s504_s19  ;;  %87 = vrot.lane.b32.xlu0 %v40_v0, %s504_s19  ;;  %364 = vst.msk [vmem:[%s1026_s1 + $0x80] ss:$16 sm:$0xc] %vm3_vm0, %v362_v46  }
  0x13   :  { %110 = vrot.lane.b32.xlu2 %v40_v0, %s505_s20  ;;  %365 = vst.msk [vmem:[%s1026_s1 + $0x80] ss:$16 sm:$0x30] %vm3_vm0, %v362_v46  }
  0x1a   :  { %133 = vrot.lane.b32.xlu1 %v40_v0, %s506_s25  ;;  %123 = vrot.lane.b32.xlu0 %v402_v5, %s505_s20 }
  0x1b   :  { %146 = vrot.lane.b32.xlu2 %v410_v6, %s506_s25  ;;  %s513_s25 = smov 115  }
  0x22   :  { %169 = vrot.lane.b32.xlu1 %v418_v7, %s507_s28  ;;  %156 = vrot.lane.b32.xlu0 %v40_v0, %s507_s28 }
  0x23   :  { %179 = vrot.lane.b32.xlu2 %v40_v0, %s508_s29 }
  0x2a   :  { %202 = vrot.lane.b32.xlu1 %v40_v0, %s509_s5  ;;  %192 = vrot.lane.b32.xlu0 %v426_v8, %s508_s29 }
  0x2b   :  { %215 = vrot.lane.b32.xlu2 %v434_v9, %s509_s5 }
  0x32   :  { %238 = vrot.lane.b32.xlu1 %v442_v10, %s510_s16  ;;  %225 = vrot.lane.b32.xlu0 %v40_v0, %s510_s16 }
  0x33   :  { %248 = vrot.lane.b32.xlu2 %v40_v0, %s511_s17 }
  0x3a   :  { %271 = vrot.lane.b32.xlu1 %v40_v0, %s512_s22  ;;  %261 = vrot.lane.b32.xlu0 %v450_v11, %s511_s17 }
  0x3b   :  { %284 = vrot.lane.b32.xlu2 %v458_v12, %s512_s22 }
  0x42   :  { %307 = vrot.lane.b32.xlu1 %v466_v13, %s513_s25  ;;  %294 = vrot.lane.b32.xlu0 %v40_v0, %s513_s25 }
  0x43   :  { %317 = vrot.lane.b32.xlu2 %v40_v0, %s514_s26 }
  0x4a   :  { %340 = vrot.lane.b32.xlu1 %v40_v0, %s515_s2  ;;  %330 = vrot.lane.b32.xlu0 %v474_v14, %s514_s26 }
  0x4b   :  { %353 = vrot.lane.b32.xlu2 %v482_v15, %s515_s2 }
  0x5d   :  { %v65_v16 = vpop.permute.xlu2 %64  }
  0x5e   :  { %382 = vst.msk [vmem:[%s1026_s1 + $0x3] ss:$16 sm:$0x3] %vm3_vm0, %v65_v16  }
  0x5f   :  { %383 = vst.msk [vmem:[%s1026_s1 + $0x3] ss:$16 sm:$0xc] %vm3_vm0, %v65_v16  }
  0x60   :  { %384 = vst.msk [vmem:[%s1026_s1 + $0x3] ss:$16 sm:$0x30] %vm3_vm0, %v65_v16  }
  0x61   :  { %385 = vst.msk [vmem:[%s1026_s1 + $0x3] ss:$16 sm:$0xc0] %vm3_vm0, %v65_v16  }
  0x65   :  { %v78_v17 = vpop.permute.xlu2 %77  }
  0x66   :  { %387 = vst.msk [vmem:[%s1026_s1 + $0x83] ss:$16 sm:$0x3] %vm3_vm0, %v78_v17  }
  0x67   :  { %388 = vst.msk [vmem:[%s1026_s1 + $0x83] ss:$16 sm:$0xc] %vm3_vm0, %v78_v17  }
  0x68   :  { %389 = vst.msk [vmem:[%s1026_s1 + $0x83] ss:$16 sm:$0x30] %vm3_vm0, %v78_v17  }
  0x6d   :  { %v111_v18 = vpop.permute.xlu2 %110  }
  0x6e   :  { %398 = vst.msk [vmem:[%s1026_s1 + $0x5] ss:$16 sm:$0x3] %vm3_vm0, %v111_v18  }
  0x6f   :  { %399 = vst.msk [vmem:[%s1026_s1 + $0x5] ss:$16 sm:$0xc] %vm3_vm0, %v111_v18  }
  0x70   :  { %400 = vst.msk [vmem:[%s1026_s1 + $0x5] ss:$16 sm:$0x30] %vm3_vm0, %v111_v18  }
  0x71   :  { %401 = vst.msk [vmem:[%s1026_s1 + $0x5] ss:$16 sm:$0xc0] %vm3_vm0, %v111_v18  }
  0x74   :  { %v42_v19 = vpop.permute.xlu1 %41   ;;  %v19_v20 = vpop.permute.xlu0 %18  }
  0x75   :  { %374 = vst.msk [vmem:[%s1026_s1 + $0x2] ss:$16 sm:$0x3] %vm3_vm0, %v42_v19   ;;  %v147_v21 = vpop.permute.xlu2 %146  }
  0x76   :  { %375 = vst.msk [vmem:[%s1026_s1 + $0x2] ss:$16 sm:$0xc] %vm3_vm0, %v42_v19  }
  0x77   :  { %376 = vst.msk [vmem:[%s1026_s1 + $0x2] ss:$16 sm:$0x30] %vm3_vm0, %v42_v19  }
  0x78   :  { %377 = vst.msk [vmem:[%s1026_s1 + $0x2] ss:$16 sm:$0xc0] %vm3_vm0, %v42_v19  }
  0x79   :  { %366 = vst.msk [vmem:[%s1026_s1 + $0x1] ss:$16 sm:$0x3] %vm3_vm0, %v19_v20  }
  0x7a   :  { %367 = vst.msk [vmem:[%s1026_s1 + $0x1] ss:$16 sm:$0xc] %vm3_vm0, %v19_v20  }
  0x7b   :  { %368 = vst.msk [vmem:[%s1026_s1 + $0x1] ss:$16 sm:$0x30] %vm3_vm0, %v19_v20  }
  0x7c   :  { %369 = vst.msk [vmem:[%s1026_s1 + $0x1] ss:$16 sm:$0xc0] %vm3_vm0, %v19_v20   ;;  %v55_v22 = vpop.permute.xlu1 %54   ;;  %v32_v23 = vpop.permute.xlu0 %31  }
  0x7d   :  { %379 = vst.msk [vmem:[%s1026_s1 + $0x82] ss:$16 sm:$0x3] %vm3_vm0, %v55_v22   ;;  %v180_v24 = vpop.permute.xlu2 %179  }
  0x7e   :  { %380 = vst.msk [vmem:[%s1026_s1 + $0x82] ss:$16 sm:$0xc] %vm3_vm0, %v55_v22  }
  0x7f   :  { %381 = vst.msk [vmem:[%s1026_s1 + $0x82] ss:$16 sm:$0x30] %vm3_vm0, %v55_v22  }
  0x80   :  { %371 = vst.msk [vmem:[%s1026_s1 + $0x81] ss:$16 sm:$0x3] %vm3_vm0, %v32_v23  }
  0x81   :  { %372 = vst.msk [vmem:[%s1026_s1 + $0x81] ss:$16 sm:$0xc] %vm3_vm0, %v32_v23  }
  0x82   :  { %373 = vst.msk [vmem:[%s1026_s1 + $0x81] ss:$16 sm:$0x30] %vm3_vm0, %v32_v23  }
  0x83   :  { %411 = vst.msk [vmem:[%s1026_s1 + $0x86] ss:$16 sm:$0x3] %vm3_vm0, %v147_v21  }
  0x84   :  { %v101_v25 = vpop.permute.xlu1 %100   ;;  %v88_v26 = vpop.permute.xlu0 %87   ;;  %412 = vst.msk [vmem:[%s1026_s1 + $0x86] ss:$16 sm:$0xc] %vm3_vm0, %v147_v21  }
  0x85   :  { %395 = vst.msk [vmem:[%s1026_s1 + $0x84] ss:$16 sm:$0x3] %vm3_vm0, %v101_v25   ;;  %v216_v27 = vpop.permute.xlu2 %215  }
  0x86   :  { %396 = vst.msk [vmem:[%s1026_s1 + $0x84] ss:$16 sm:$0xc] %vm3_vm0, %v101_v25  }
  0x87   :  { %397 = vst.msk [vmem:[%s1026_s1 + $0x84] ss:$16 sm:$0x30] %vm3_vm0, %v101_v25  }
  0x88   :  { %390 = vst.msk [vmem:[%s1026_s1 + $0x4] ss:$16 sm:$0x3] %vm3_vm0, %v88_v26  }
  0x89   :  { %391 = vst.msk [vmem:[%s1026_s1 + $0x4] ss:$16 sm:$0xc] %vm3_vm0, %v88_v26  }
  0x8a   :  { %392 = vst.msk [vmem:[%s1026_s1 + $0x4] ss:$16 sm:$0x30] %vm3_vm0, %v88_v26  }
  0x8b   :  { %393 = vst.msk [vmem:[%s1026_s1 + $0x4] ss:$16 sm:$0xc0] %vm3_vm0, %v88_v26  }
  0x8c   :  { %413 = vst.msk [vmem:[%s1026_s1 + $0x86] ss:$16 sm:$0x30] %vm3_vm0, %v147_v21   ;;  %v134_v28 = vpop.permute.xlu1 %133   ;;  %v124_v29 = vpop.permute.xlu0 %123  }
  0x8d   :  { %406 = vst.msk [vmem:[%s1026_s1 + $0x6] ss:$16 sm:$0x3] %vm3_vm0, %v134_v28   ;;  %v249_v30 = vpop.permute.xlu2 %248  }
  0x8e   :  { %407 = vst.msk [vmem:[%s1026_s1 + $0x6] ss:$16 sm:$0xc] %vm3_vm0, %v134_v28  }
  0x8f   :  { %408 = vst.msk [vmem:[%s1026_s1 + $0x6] ss:$16 sm:$0x30] %vm3_vm0, %v134_v28  }
  0x90   :  { %409 = vst.msk [vmem:[%s1026_s1 + $0x6] ss:$16 sm:$0xc0] %vm3_vm0, %v134_v28  }
  0x91   :  { %403 = vst.msk [vmem:[%s1026_s1 + $0x85] ss:$16 sm:$0x3] %vm3_vm0, %v124_v29  }
  0x92   :  { %404 = vst.msk [vmem:[%s1026_s1 + $0x85] ss:$16 sm:$0xc] %vm3_vm0, %v124_v29  }
  0x93   :  { %405 = vst.msk [vmem:[%s1026_s1 + $0x85] ss:$16 sm:$0x30] %vm3_vm0, %v124_v29  }
  0x94   :  { %422 = vst.msk [vmem:[%s1026_s1 + $0x8] ss:$16 sm:$0x3] %vm3_vm0, %v180_v24   ;;  %v170_v31 = vpop.permute.xlu1 %169   ;;  %v157_v32 = vpop.permute.xlu0 %156  }
  0x95   :  { %423 = vst.msk [vmem:[%s1026_s1 + $0x8] ss:$16 sm:$0xc] %vm3_vm0, %v180_v24   ;;  %v285_v33 = vpop.permute.xlu2 %284  }
  0x96   :  { %424 = vst.msk [vmem:[%s1026_s1 + $0x8] ss:$16 sm:$0x30] %vm3_vm0, %v180_v24  }
  0x97   :  { %425 = vst.msk [vmem:[%s1026_s1 + $0x8] ss:$16 sm:$0xc0] %vm3_vm0, %v180_v24  }
  0x98   :  { %419 = vst.msk [vmem:[%s1026_s1 + $0x87] ss:$16 sm:$0x3] %vm3_vm0, %v170_v31  }
  0x99   :  { %420 = vst.msk [vmem:[%s1026_s1 + $0x87] ss:$16 sm:$0xc] %vm3_vm0, %v170_v31  }
  0x9a   :  { %421 = vst.msk [vmem:[%s1026_s1 + $0x87] ss:$16 sm:$0x30] %vm3_vm0, %v170_v31  }
  0x9b   :  { %414 = vst.msk [vmem:[%s1026_s1 + $0x7] ss:$16 sm:$0x3] %vm3_vm0, %v157_v32  }
  0x9c   :  { %415 = vst.msk [vmem:[%s1026_s1 + $0x7] ss:$16 sm:$0xc] %vm3_vm0, %v157_v32   ;;  %v203_v34 = vpop.permute.xlu1 %202   ;;  %v193_v35 = vpop.permute.xlu0 %192  }
  0x9d   :  { %416 = vst.msk [vmem:[%s1026_s1 + $0x7] ss:$16 sm:$0x30] %vm3_vm0, %v157_v32   ;;  %v318_v36 = vpop.permute.xlu2 %317  }
  0x9e   :  { %417 = vst.msk [vmem:[%s1026_s1 + $0x7] ss:$16 sm:$0xc0] %vm3_vm0, %v157_v32  }
  0x9f   :  { %435 = vst.msk [vmem:[%s1026_s1 + $0x89] ss:$16 sm:$0x3] %vm3_vm0, %v216_v27  }
  0xa0   :  { %436 = vst.msk [vmem:[%s1026_s1 + $0x89] ss:$16 sm:$0xc] %vm3_vm0, %v216_v27  }
  0xa1   :  { %437 = vst.msk [vmem:[%s1026_s1 + $0x89] ss:$16 sm:$0x30] %vm3_vm0, %v216_v27  }
  0xa2   :  { %430 = vst.msk [vmem:[%s1026_s1 + $0x9] ss:$16 sm:$0x3] %vm3_vm0, %v203_v34  }
  0xa3   :  { %431 = vst.msk [vmem:[%s1026_s1 + $0x9] ss:$16 sm:$0xc] %vm3_vm0, %v203_v34  }
  0xa4   :  { %432 = vst.msk [vmem:[%s1026_s1 + $0x9] ss:$16 sm:$0x30] %vm3_vm0, %v203_v34   ;;  %v239_v37 = vpop.permute.xlu1 %238   ;;  %v226_v38 = vpop.permute.xlu0 %225  }
  0xa5   :  { %433 = vst.msk [vmem:[%s1026_s1 + $0x9] ss:$16 sm:$0xc0] %vm3_vm0, %v203_v34   ;;  %v354_v39 = vpop.permute.xlu2 %353  }
  0xa6   :  { %427 = vst.msk [vmem:[%s1026_s1 + $0x88] ss:$16 sm:$0x3] %vm3_vm0, %v193_v35  }
  0xa7   :  { %428 = vst.msk [vmem:[%s1026_s1 + $0x88] ss:$16 sm:$0xc] %vm3_vm0, %v193_v35  }
  0xa8   :  { %429 = vst.msk [vmem:[%s1026_s1 + $0x88] ss:$16 sm:$0x30] %vm3_vm0, %v193_v35  }
  0xa9   :  { %446 = vst.msk [vmem:[%s1026_s1 + $0xb] ss:$16 sm:$0x3] %vm3_vm0, %v249_v30  }
  0xaa   :  { %447 = vst.msk [vmem:[%s1026_s1 + $0xb] ss:$16 sm:$0xc] %vm3_vm0, %v249_v30  }
  0xab   :  { %448 = vst.msk [vmem:[%s1026_s1 + $0xb] ss:$16 sm:$0x30] %vm3_vm0, %v249_v30  }
  0xac   :  { %449 = vst.msk [vmem:[%s1026_s1 + $0xb] ss:$16 sm:$0xc0] %vm3_vm0, %v249_v30   ;;  %v272_v40 = vpop.permute.xlu1 %271   ;;  %v262_v41 = vpop.permute.xlu0 %261  }
  0xad   :  { %443 = vst.msk [vmem:[%s1026_s1 + $0x8a] ss:$16 sm:$0x3] %vm3_vm0, %v239_v37  }
  0xae   :  { %444 = vst.msk [vmem:[%s1026_s1 + $0x8a] ss:$16 sm:$0xc] %vm3_vm0, %v239_v37  }
  0xaf   :  { %445 = vst.msk [vmem:[%s1026_s1 + $0x8a] ss:$16 sm:$0x30] %vm3_vm0, %v239_v37  }
  0xb0   :  { %438 = vst.msk [vmem:[%s1026_s1 + $0xa] ss:$16 sm:$0x3] %vm3_vm0, %v226_v38  }
  0xb1   :  { %439 = vst.msk [vmem:[%s1026_s1 + $0xa] ss:$16 sm:$0xc] %vm3_vm0, %v226_v38  }
  0xb2   :  { %440 = vst.msk [vmem:[%s1026_s1 + $0xa] ss:$16 sm:$0x30] %vm3_vm0, %v226_v38  }
  0xb3   :  { %441 = vst.msk [vmem:[%s1026_s1 + $0xa] ss:$16 sm:$0xc0] %vm3_vm0, %v226_v38  }
  0xb4   :  { %459 = vst.msk [vmem:[%s1026_s1 + $0x8c] ss:$16 sm:$0x3] %vm3_vm0, %v285_v33   ;;  %v308_v42 = vpop.permute.xlu1 %307   ;;  %v295_v43 = vpop.permute.xlu0 %294  }
  0xb5   :  { %460 = vst.msk [vmem:[%s1026_s1 + $0x8c] ss:$16 sm:$0xc] %vm3_vm0, %v285_v33  }
  0xb6   :  { %461 = vst.msk [vmem:[%s1026_s1 + $0x8c] ss:$16 sm:$0x30] %vm3_vm0, %v285_v33  }
  0xb7   :  { %454 = vst.msk [vmem:[%s1026_s1 + $0xc] ss:$16 sm:$0x3] %vm3_vm0, %v272_v40  }
  0xb8   :  { %455 = vst.msk [vmem:[%s1026_s1 + $0xc] ss:$16 sm:$0xc] %vm3_vm0, %v272_v40  }
  0xb9   :  { %456 = vst.msk [vmem:[%s1026_s1 + $0xc] ss:$16 sm:$0x30] %vm3_vm0, %v272_v40  }
  0xba   :  { %457 = vst.msk [vmem:[%s1026_s1 + $0xc] ss:$16 sm:$0xc0] %vm3_vm0, %v272_v40  }
  0xbb   :  { %451 = vst.msk [vmem:[%s1026_s1 + $0x8b] ss:$16 sm:$0x3] %vm3_vm0, %v262_v41  }
  0xbc   :  { %452 = vst.msk [vmem:[%s1026_s1 + $0x8b] ss:$16 sm:$0xc] %vm3_vm0, %v262_v41   ;;  %v341_v44 = vpop.permute.xlu1 %340   ;;  %v331_v45 = vpop.permute.xlu0 %330  }
  0xbd   :  { %453 = vst.msk [vmem:[%s1026_s1 + $0x8b] ss:$16 sm:$0x30] %vm3_vm0, %v262_v41  }
  0xbe   :  { %470 = vst.msk [vmem:[%s1026_s1 + $0xe] ss:$16 sm:$0x3] %vm3_vm0, %v318_v36  }
  0xbf   :  { %471 = vst.msk [vmem:[%s1026_s1 + $0xe] ss:$16 sm:$0xc] %vm3_vm0, %v318_v36  }
  0xc0   :  { %472 = vst.msk [vmem:[%s1026_s1 + $0xe] ss:$16 sm:$0x30] %vm3_vm0, %v318_v36  }
  0xc1   :  { %473 = vst.msk [vmem:[%s1026_s1 + $0xe] ss:$16 sm:$0xc0] %vm3_vm0, %v318_v36  }
  0xc2   :  { %467 = vst.msk [vmem:[%s1026_s1 + $0x8d] ss:$16 sm:$0x3] %vm3_vm0, %v308_v42  }
  0xc3   :  { %468 = vst.msk [vmem:[%s1026_s1 + $0x8d] ss:$16 sm:$0xc] %vm3_vm0, %v308_v42  }
  0xc4   :  { %469 = vst.msk [vmem:[%s1026_s1 + $0x8d] ss:$16 sm:$0x30] %vm3_vm0, %v308_v42  }
  0xc5   :  { %462 = vst.msk [vmem:[%s1026_s1 + $0xd] ss:$16 sm:$0x3] %vm3_vm0, %v295_v43  }
  0xc6   :  { %463 = vst.msk [vmem:[%s1026_s1 + $0xd] ss:$16 sm:$0xc] %vm3_vm0, %v295_v43  }
  0xc7   :  { %464 = vst.msk [vmem:[%s1026_s1 + $0xd] ss:$16 sm:$0x30] %vm3_vm0, %v295_v43  }
  0xc8   :  { %465 = vst.msk [vmem:[%s1026_s1 + $0xd] ss:$16 sm:$0xc0] %vm3_vm0, %v295_v43  }
  0xc9   :  { %483 = vst.msk [vmem:[%s1026_s1 + $0x8f] ss:$16 sm:$0x3] %vm3_vm0, %v354_v39  }
  0xca   :  { %484 = vst.msk [vmem:[%s1026_s1 + $0x8f] ss:$16 sm:$0xc] %vm3_vm0, %v354_v39  }
  0xcb   :  { %485 = vst.msk [vmem:[%s1026_s1 + $0x8f] ss:$16 sm:$0x30] %vm3_vm0, %v354_v39  }
  0xcc   :  { %478 = vst.msk [vmem:[%s1026_s1 + $0xf] ss:$16 sm:$0x3] %vm3_vm0, %v341_v44  }
  0xcd   :  { %479 = vst.msk [vmem:[%s1026_s1 + $0xf] ss:$16 sm:$0xc] %vm3_vm0, %v341_v44  }
  0xce   :  { %480 = vst.msk [vmem:[%s1026_s1 + $0xf] ss:$16 sm:$0x30] %vm3_vm0, %v341_v44  }
  0xcf   :  { %481 = vst.msk [vmem:[%s1026_s1 + $0xf] ss:$16 sm:$0xc0] %vm3_vm0, %v341_v44  }
  0xd0   :  { %475 = vst.msk [vmem:[%s1026_s1 + $0x8e] ss:$16 sm:$0x3] %vm3_vm0, %v331_v45  }
  0xd1   :  { %476 = vst.msk [vmem:[%s1026_s1 + $0x8e] ss:$16 sm:$0xc] %vm3_vm0, %v331_v45  }
  0xd2   :  { %477 = vst.msk [vmem:[%s1026_s1 + $0x8e] ss:$16 sm:$0x30] %vm3_vm0, %v331_v45  }

// kernel: basic_block_forward.7
= control target key start
LH: loop header
LB: loop body
LE: loop exit
PB: predicated region body
PF: predicated region fallthrough
CT: control target
= control target key end

     0   :  { %s543_s15 = smov 0   ;;  %s724_s0 = inlined_call_operand.vmem [shape: f32[2,224,128], index: 0, kind: input, shape index: {}]   ;;  %s725_s1 = inlined_call_operand.vmem [shape: f32[2,224,128], index: 1, kind: input, shape index: {}]   ;;  %s726_s2 = inlined_call_operand.vmem [shape: f32[1,128], index: 2, kind: input, shape index: {}]   ;;  %s727_s3 = inlined_call_operand.vmem [shape: f32[1,128], index: 3, kind: input, shape index: {}]   ;;  %s728_s4 = inlined_call_operand.vmem [shape: f32[2,224,128], index: 4, kind: output, shape index: {}]  }
   0x1 LB: > { %s489_s16 = sadd.s32 4294967295, %s516_s15   ;;  %p493_p0 = scmp.ge.s32.totalorder %s516_s15, 1  ;;  %s516_s15 = sphi %s543_s15, %s14_s15  }
   0x2   : > { %p172_p1 = scmp.lt.s32.totalorder %s516_s15, 3 }
   0x4   : > { %p173_p2 = pnand %p493_p0, %p172_p1 }
   0x5   : > { %p203_p3 = scmp.lt.s32.totalorder (!%p173_p2), %s489_s16, 1 }
   0x6   : > { %176 = sbr.rel (%p173_p2) target bundleno = 52 (0x34), region = 36 }
   0xb   : > { %s730_s16 = smov (!%p203_p3, %s489_s16), 1  ;;  %v556_v0 = vld [vmem:[%s726_s2] ss:$0 sm:$0xff] }
   0xc   : > { %s551_s17 = smul.u32 224, %s730_s16  ;;  %v573_v1 = vld [vmem:[%s727_s3] ss:$0 sm:$0xff] }
   0xe   : > { %s562_s22 = scalar_lea.vmem %s724_s0, %s551_s17  ;;  %s568_s25 = scalar_lea.vmem %s725_s1, %s551_s17 }
   0xf   : > { %v218_v2 = vld [vmem:[%s562_s22] sm:$0xff]  ;;  %v219_v3 = vld [vmem:[%s562_s22 + $0x8] sm:$0xff]  ;;  %v220_v7 = vld [vmem:[%s562_s22 + $0x10] sm:$0xff]  ;;  %s604_s30 = scalar_lea.vmem %s728_s4, %s551_s17 }
  0x10   : > { %v250_v4 = vmul.f32 %v556_v0, %v218_v2  ;;  %v310_v5 = vld [vmem:[%s568_s25] sm:$0xff]  ;;  %v251_v6 = vmul.f32 %v556_v0, %v219_v3  ;;  %v311_v8 = vld [vmem:[%s568_s25 + $0x8] sm:$0xff]  ;;  %v252_v9 = vmul.f32 %v556_v0, %v220_v7  ;;  %v221_v10 = vld [vmem:[%s562_s22 + $0x18] sm:$0xff] }
  0x11   : > { %v222_v11 = vld [vmem:[%s562_s22 + $0x20] sm:$0xff]  ;;  %v312_v14 = vld [vmem:[%s568_s25 + $0x10] sm:$0xff]  ;;  %v253_v15 = vmul.f32 %v556_v0, %v221_v10  ;;  %v313_v16 = vld [vmem:[%s568_s25 + $0x18] sm:$0xff] }
  0x12   : > { %v282_v12 = vadd.f32 %v573_v1, %v250_v4  ;;  %v283_v13 = vadd.f32 %v573_v1, %v251_v6  ;;  %v254_v17 = vmul.f32 %v556_v0, %v222_v11  ;;  %v223_v18 = vld [vmem:[%s562_s22 + $0x28] sm:$0xff]  ;;  %v284_v19 = vadd.f32 %v573_v1, %v252_v9  ;;  %v314_v20 = vld [vmem:[%s568_s25 + $0x20] sm:$0xff]  ;;  %v224_v22 = vld [vmem:[%s562_s22 + $0x30] sm:$0xff] }
  0x13   : > { %v255_v21 = vmul.f32 %v556_v0, %v223_v18  ;;  %v225_v23 = vld [vmem:[%s562_s22 + $0x38] sm:$0xff]  ;;  %v285_v26 = vadd.f32 %v573_v1, %v253_v15  ;;  %v315_v28 = vld [vmem:[%s568_s25 + $0x28] sm:$0xff]  ;;  %v256_v31 = vmul.f32 %v556_v0, %v224_v22  ;;  %v226_v33 = vld [vmem:[%s562_s22 + $0x40] sm:$0xff] }
  0x14   : > { %v338_v24 = vadd.f32 %v310_v5, %v282_v12  ;;  %v339_v25 = vadd.f32 %v311_v8, %v283_v13  ;;  %v286_v27 = vadd.f32 %v573_v1, %v254_v17  ;;  %v340_v29 = vadd.f32 %v312_v14, %v284_v19  ;;  %v227_v34 = vld [vmem:[%s562_s22 + $0x48] sm:$0xff]  ;;  %v316_v39 = vld [vmem:[%s568_s25 + $0x30] sm:$0xff]  ;;  %v317_v40 = vld [vmem:[%s568_s25 + $0x38] sm:$0xff] }
  0x15   : > { %v287_v30 = vadd.f32 %v573_v1, %v255_v21  ;;  %v257_v32 = vmul.f32 %v556_v0, %v225_v23  ;;  %v341_v37 = vadd.f32 %v313_v16, %v285_v26  ;;  %v228_v41 = vld [vmem:[%s562_s22 + $0x50] sm:$0xff]  ;;  %v288_v44 = vadd.f32 %v573_v1, %v256_v31  ;;  %v229_v46 = vld [vmem:[%s562_s22 + $0x58] sm:$0xff]  ;;  %v230_v47 = vld [vmem:[%s562_s22 + $0x60] sm:$0xff] }
  0x16   : > { %v366_v35 = vmax.f32 %v338_v24, 0.0  ;;  %v367_v36 = vmax.f32 %v339_v25, 0.0  ;;  %v342_v38 = vadd.f32 %v314_v20, %v286_v27  ;;  %v368_v42 = vmax.f32 %v340_v29, 0.0  ;;  %v231_v52 = vld [vmem:[%s562_s22 + $0x68] sm:$0xff]  ;;  %v318_v56 = vld [vmem:[%s568_s25 + $0x40] sm:$0xff]  ;;  %v320_v61 = vld [vmem:[%s568_s25 + $0x50] sm:$0xff] }
  0x17   : > { %v343_v43 = vadd.f32 %v315_v28, %v287_v30  ;;  %v289_v45 = vadd.f32 %v573_v1, %v257_v32  ;;  %v369_v48 = vmax.f32 %v341_v37, 0.0  ;;  %v258_v50 = vmul.f32 %v556_v0, %v226_v33  ;;  %v319_v57 = vld [vmem:[%s568_s25 + $0x48] sm:$0xff]  ;;  %v232_v2 = vld [vmem:[%s562_s22 + $0x70] sm:$0xff]  ;;  %v233_v3 = vld [vmem:[%s562_s22 + $0x78] sm:$0xff] }
  0x18   : > { %394 = vst [vmem:[%s604_s30] sm:$0xff] %v366_v35  ;;  %v370_v49 = vmax.f32 %v342_v38, 0.0  ;;  %v259_v51 = vmul.f32 %v556_v0, %v227_v34  ;;  %v344_v54 = vadd.f32 %v316_v39, %v288_v44  ;;  %v260_v58 = vmul.f32 %v556_v0, %v228_v41  ;;  %v321_v7 = vld [vmem:[%s568_s25 + $0x58] sm:$0xff]  ;;  %v322_v8 = vld [vmem:[%s568_s25 + $0x60] sm:$0xff]  ;;  %v323_v14 = vld [vmem:[%s568_s25 + $0x68] sm:$0xff] }
  0x19   : > { %395 = vst [vmem:[%s604_s30 + $0x8] sm:$0xff] %v367_v36  ;;  %v371_v53 = vmax.f32 %v343_v43, 0.0  ;;  %v345_v55 = vadd.f32 %v317_v40, %v289_v45  ;;  %v290_v59 = vadd.f32 %v573_v1, %v258_v50  ;;  %v261_v62 = vmul.f32 %v556_v0, %v229_v46  ;;  %v234_v19 = vld [vmem:[%s562_s22 + $0x80] sm:$0xff]  ;;  %v235_v20 = vld [vmem:[%s562_s22 + $0x88] sm:$0xff]  ;;  %v324_v25 = vld [vmem:[%s568_s25 + $0x70] sm:$0xff] }
  0x1a   : > { %396 = vst [vmem:[%s604_s30 + $0x10] sm:$0xff] %v368_v42  ;;  %v291_v60 = vadd.f32 %v573_v1, %v259_v51  ;;  %v262_v63 = vmul.f32 %v556_v0, %v230_v47  ;;  %v372_v4 = vmax.f32 %v344_v54, 0.0  ;;  %v292_v6 = vadd.f32 %v573_v1, %v260_v58  ;;  %v325_v26 = vld [vmem:[%s568_s25 + $0x78] sm:$0xff]  ;;  %v236_v27 = vld [vmem:[%s562_s22 + $0x90] sm:$0xff]  ;;  %v238_v33 = vld [vmem:[%s562_s22 + $0xa0] sm:$0xff] }
  0x1b   : > { %397 = vst [vmem:[%s604_s30 + $0x18] sm:$0xff] %v369_v48  ;;  %v373_v5 = vmax.f32 %v345_v55, 0.0  ;;  %v263_v9 = vmul.f32 %v556_v0, %v231_v52  ;;  %v346_v10 = vadd.f32 %v318_v56, %v290_v59  ;;  %v293_v12 = vadd.f32 %v573_v1, %v261_v62  ;;  %v237_v32 = vld [vmem:[%s562_s22 + $0x98] sm:$0xff]  ;;  %v239_v38 = vld [vmem:[%s562_s22 + $0xa8] sm:$0xff]  ;;  %v326_v42 = vld [vmem:[%s568_s25 + $0x80] sm:$0xff] }
  0x1c   : > { %398 = vst [vmem:[%s604_s30 + $0x20] sm:$0xff] %v370_v49  ;;  %v347_v11 = vadd.f32 %v319_v57, %v291_v60  ;;  %v294_v13 = vadd.f32 %v573_v1, %v262_v63  ;;  %v348_v15 = vadd.f32 %v320_v61, %v292_v6  ;;  %v264_v17 = vmul.f32 %v556_v0, %v232_v2  ;;  %v327_v43 = vld [vmem:[%s568_s25 + $0x88] sm:$0xff]  ;;  %v328_v47 = vld [vmem:[%s568_s25 + $0x90] sm:$0xff]  ;;  %v241_v51 = vld [vmem:[%s562_s22 + $0xb8] sm:$0xff] }
  0x1d   : > { %399 = vst [vmem:[%s604_s30 + $0x28] sm:$0xff] %v371_v53  ;;  %v295_v16 = vadd.f32 %v573_v1, %v263_v9  ;;  %v265_v18 = vmul.f32 %v556_v0, %v233_v3  ;;  %v374_v21 = vmax.f32 %v346_v10, 0.0  ;;  %v349_v23 = vadd.f32 %v321_v7, %v293_v12  ;;  %v240_v50 = vld [vmem:[%s562_s22 + $0xb0] sm:$0xff]  ;;  %v329_v55 = vld [vmem:[%s568_s25 + $0x98] sm:$0xff]  ;;  %v330_v56 = vld [vmem:[%s568_s25 + $0xa0] sm:$0xff] }
  0x1e   : > { %400 = vst [vmem:[%s604_s30 + $0x30] sm:$0xff] %v372_v4  ;;  %v375_v22 = vmax.f32 %v347_v11, 0.0  ;;  %v350_v24 = vadd.f32 %v322_v8, %v294_v13  ;;  %v376_v28 = vmax.f32 %v348_v15, 0.0  ;;  %v296_v30 = vadd.f32 %v573_v1, %v264_v17  ;;  %v331_v62 = vld [vmem:[%s568_s25 + $0xa8] sm:$0xff]  ;;  %v332_v11 = vld [vmem:[%s568_s25 + $0xb0] sm:$0xff]  ;;  %v333_v12 = vld [vmem:[%s568_s25 + $0xb8] sm:$0xff] }
  0x1f   : > { %401 = vst [vmem:[%s604_s30 + $0x38] sm:$0xff] %v373_v5  ;;  %v351_v29 = vadd.f32 %v323_v14, %v295_v16  ;;  %v297_v31 = vadd.f32 %v573_v1, %v265_v18  ;;  %v377_v34 = vmax.f32 %v349_v23, 0.0  ;;  %v266_v36 = vmul.f32 %v556_v0, %v234_v19  ;;  %v242_v5 = vld [vmem:[%s562_s22 + $0xc0] sm:$0xff]  ;;  %v243_v6 = vld [vmem:[%s562_s22 + $0xc8] sm:$0xff]  ;;  %v244_v13 = vld [vmem:[%s562_s22 + $0xd0] sm:$0xff] }
  0x20   : > { %402 = vst [vmem:[%s604_s30 + $0x40] sm:$0xff] %v374_v21  ;;  %v378_v35 = vmax.f32 %v350_v24, 0.0  ;;  %v267_v37 = vmul.f32 %v556_v0, %v235_v20  ;;  %v352_v40 = vadd.f32 %v324_v25, %v296_v30  ;;  %v268_v44 = vmul.f32 %v556_v0, %v236_v27  ;;  %v245_v18 = vld [vmem:[%s562_s22 + $0xd8] sm:$0xff]  ;;  %v335_v27 = vld [vmem:[%s568_s25 + $0xc8] sm:$0xff] }
  0x21   : > { %403 = vst [vmem:[%s604_s30 + $0x48] sm:$0xff] %v375_v22  ;;  %v379_v39 = vmax.f32 %v351_v29, 0.0  ;;  %v353_v41 = vadd.f32 %v325_v26, %v297_v31  ;;  %v298_v45 = vadd.f32 %v573_v1, %v266_v36  ;;  %v269_v48 = vmul.f32 %v556_v0, %v237_v32  ;;  %v334_v26 = vld [vmem:[%s568_s25 + $0xc0] sm:$0xff]  ;;  %v336_v31 = vld [vmem:[%s568_s25 + $0xd0] sm:$0xff]  ;;  %v337_v36 = vld [vmem:[%s568_s25 + $0xd8] sm:$0xff] }
  0x22   : > { %404 = vst [vmem:[%s604_s30 + $0x50] sm:$0xff] %v376_v28  ;;  %v299_v46 = vadd.f32 %v573_v1, %v267_v37  ;;  %v270_v49 = vmul.f32 %v556_v0, %v238_v33  ;;  %v380_v52 = vmax.f32 %v352_v40, 0.0  ;;  %v300_v54 = vadd.f32 %v573_v1, %v268_v44 }
  0x23   : > { %405 = vst [vmem:[%s604_s30 + $0x58] sm:$0xff] %v377_v34  ;;  %v381_v53 = vmax.f32 %v353_v41, 0.0  ;;  %v271_v57 = vmul.f32 %v556_v0, %v239_v38  ;;  %v354_v58 = vadd.f32 %v326_v42, %v298_v45  ;;  %v301_v60 = vadd.f32 %v573_v1, %v269_v48 }
  0x24   : > { %406 = vst [vmem:[%s604_s30 + $0x60] sm:$0xff] %v378_v35  ;;  %v355_v59 = vadd.f32 %v327_v43, %v299_v46  ;;  %v302_v61 = vadd.f32 %v573_v1, %v270_v49  ;;  %v356_v63 = vadd.f32 %v328_v47, %v300_v54  ;;  %v272_v3 = vmul.f32 %v556_v0, %v240_v50 }
  0x25   : > { %407 = vst [vmem:[%s604_s30 + $0x68] sm:$0xff] %v379_v39  ;;  %v303_v2 = vadd.f32 %v573_v1, %v271_v57  ;;  %v273_v4 = vmul.f32 %v556_v0, %v241_v51  ;;  %v382_v7 = vmax.f32 %v354_v58, 0.0  ;;  %v357_v9 = vadd.f32 %v329_v55, %v301_v60 }
  0x26   : > { %408 = vst [vmem:[%s604_s30 + $0x70] sm:$0xff] %v380_v52  ;;  %v383_v8 = vmax.f32 %v355_v59, 0.0  ;;  %v358_v10 = vadd.f32 %v330_v56, %v302_v61  ;;  %v384_v14 = vmax.f32 %v356_v63, 0.0  ;;  %v304_v16 = vadd.f32 %v573_v1, %v272_v3 }
  0x27   : > { %409 = vst [vmem:[%s604_s30 + $0x78] sm:$0xff] %v381_v53  ;;  %v359_v15 = vadd.f32 %v331_v62, %v303_v2  ;;  %v305_v17 = vadd.f32 %v573_v1, %v273_v4  ;;  %v385_v19 = vmax.f32 %v357_v9, 0.0  ;;  %v274_v21 = vmul.f32 %v556_v0, %v242_v5 }
  0x28   : > { %410 = vst [vmem:[%s604_s30 + $0x80] sm:$0xff] %v382_v7  ;;  %v386_v20 = vmax.f32 %v358_v10, 0.0  ;;  %v275_v22 = vmul.f32 %v556_v0, %v243_v6  ;;  %v360_v24 = vadd.f32 %v332_v11, %v304_v16  ;;  %v276_v28 = vmul.f32 %v556_v0, %v244_v13 }
  0x29   : > { %411 = vst [vmem:[%s604_s30 + $0x88] sm:$0xff] %v383_v8  ;;  %v387_v23 = vmax.f32 %v359_v15, 0.0  ;;  %v361_v25 = vadd.f32 %v333_v12, %v305_v17  ;;  %v306_v29 = vadd.f32 %v573_v1, %v274_v21  ;;  %v277_v32 = vmul.f32 %v556_v0, %v245_v18 }
  0x2a   : > { %412 = vst [vmem:[%s604_s30 + $0x90] sm:$0xff] %v384_v14  ;;  %v307_v30 = vadd.f32 %v573_v1, %v275_v22  ;;  %v388_v33 = vmax.f32 %v360_v24, 0.0  ;;  %v308_v35 = vadd.f32 %v573_v1, %v276_v28 }
  0x2b   : > { %413 = vst [vmem:[%s604_s30 + $0x98] sm:$0xff] %v385_v19  ;;  %v389_v34 = vmax.f32 %v361_v25, 0.0  ;;  %v362_v37 = vadd.f32 %v334_v26, %v306_v29  ;;  %v309_v39 = vadd.f32 %v573_v1, %v277_v32 }
  0x2c   : > { %414 = vst [vmem:[%s604_s30 + $0xa0] sm:$0xff] %v386_v20  ;;  %v363_v38 = vadd.f32 %v335_v27, %v307_v30  ;;  %v364_v40 = vadd.f32 %v336_v31, %v308_v35 }
  0x2d   : > { %415 = vst [vmem:[%s604_s30 + $0xa8] sm:$0xff] %v387_v23  ;;  %v390_v0 = vmax.f32 %v362_v37, 0.0  ;;  %v365_v42 = vadd.f32 %v337_v36, %v309_v39 }
  0x2e   : > { %416 = vst [vmem:[%s604_s30 + $0xb0] sm:$0xff] %v388_v33  ;;  %v391_v41 = vmax.f32 %v363_v38, 0.0  ;;  %v392_v43 = vmax.f32 %v364_v40, 0.0 }
  0x2f   : > { %417 = vst [vmem:[%s604_s30 + $0xb8] sm:$0xff] %v389_v34  ;;  %v393_v44 = vmax.f32 %v365_v42, 0.0 }
  0x30   : > { %418 = vst [vmem:[%s604_s30 + $0xc0] sm:$0xff] %v390_v0 }
  0x31   : > { %419 = vst [vmem:[%s604_s30 + $0xc8] sm:$0xff] %v391_v41 }
  0x32   : > { %420 = vst [vmem:[%s604_s30 + $0xd0] sm:$0xff] %v392_v43 }
  0x33   : > { %421 = vst [vmem:[%s604_s30 + $0xd8] sm:$0xff] %v393_v44 }
  0x34 PF: > { %s14_s15 = sadd.s32 1, %s516_s15  }
  0x35   : > { %p11_p4 = scmp.ge.s32.totalorder %s14_s15, 4  }
  0x37   :  { %13 = sbr.rel (!%p11_p4) target bundleno = 1 (0x1), region = 69 }

// kernel: basic_block_forward.6
= control target key start
LH: loop header
LB: loop body
LE: loop exit
PB: predicated region body
PF: predicated region fallthrough
CT: control target
= control target key end

     0   :  { %s4304_s18 = smov 0   ;;  %s5208_s0 = inlined_call_operand.vmem [shape: bf16[2,256,384], index: 0, kind: input, shape index: {}]   ;;  %s5209_s1 = inlined_call_operand.vmem [shape: bf16[3,384,128], index: 1, kind: input, shape index: {}]   ;;  %s5210_s2 = inlined_call_operand.vmem [shape: f32[224,1], index: 2, kind: input, shape index: {}]   ;;  %s5211_s3 = inlined_call_operand.vmem [shape: f32[2,224,128], index: 3, kind: output, shape index: {0}]   ;;  %s5212_s4 = inlined_call_operand.vmem [shape: f32[2,1,128], index: 4, kind: output, shape index: {1}]   ;;  %s5213_s5 = inlined_call_operand.vmem [shape: f32[2,1,128], index: 5, kind: output, shape index: {2}]  }
   0x1 LB: > { %s3132_s19 = sadd.s32 4294967295, %s4271_s18   ;;  %p3136_p0 = scmp.ge.s32.totalorder %s4271_s18, 1  ;;  %s4271_s18 = sphi %s4304_s18, %s16_s18  }
   0x2   : > { %p192_p1 = scmp.lt.s32.totalorder %s4271_s18, 3 }
   0x4   : > { %p193_p2 = pnand %p3136_p0, %p192_p1 }
   0x6   : > { %196 = sbr.rel (%p193_p2) target bundleno = 707 (0x2c3), region = 32 }
   0xb   : > { %v4078_v0 = vld [vmem:[%s5209_s1 + $0x38] sm:$0xff]  ;;  %v4077_v1 = vld [vmem:[%s5209_s1 + $0x30] sm:$0xff]  ;;  %v4076_v2 = vld [vmem:[%s5209_s1 + $0x28] sm:$0xff]  ;;  %p226_p3 = scmp.lt.s32.totalorder %s3132_s19, 1 }
   0xc   : > { %770 = vmatpush.bf16.msra.mxu0 %v4078_v0  ;;  %4227 = vmatpush.bf16.msra.mxu1 %v4078_v0  ;;  %v4075_v3 = vld [vmem:[%s5209_s1 + $0x20] sm:$0xff]  ;;  %v4074_v4 = vld [vmem:[%s5209_s1 + $0x18] sm:$0xff]  ;;  %v4073_v5 = vld [vmem:[%s5209_s1 + $0x10] sm:$0xff] }
   0xd   : > { %4229 = vmatpush.bf16.msra.mxu3 %v4078_v0  ;;  %4228 = vmatpush.bf16.msra.mxu2 %v4078_v0  ;;  %s5249_s19 = smov (!%p226_p3, %s3132_s19), 1  ;;  %v4072_v6 = vld [vmem:[%s5209_s1 + $0x8] sm:$0xff]  ;;  %v4071_v7 = vld [vmem:[%s5209_s1] sm:$0xff]  ;;  %v4086_v14 = vld [vmem:[%s5209_s1 + $0x78] sm:$0xff] }
   0xe   : > { %s4251_s7 = smul.u32 384, %s5249_s19  ;;  %v4144_v15 = vld [vmem:[%s5209_s1 + $0xf8] sm:$0xff]  ;;  %v4085_v22 = vld [vmem:[%s5209_s1 + $0x70] sm:$0xff]  ;;  %v4084_v27 = vld [vmem:[%s5209_s1 + $0x68] sm:$0xff]  ;;  %s238_s30 = scalar_lea.vmem %s5212_s4, %s5249_s19 }
   0xf   : > { %v4152_v16 = vld [vmem:[%s5209_s1 + $0x138] sm:$0xff]  ;;  %v4143_v24 = vld [vmem:[%s5209_s1 + $0xf0] sm:$0xff]  ;;  %v4142_v29 = vld [vmem:[%s5209_s1 + $0xe8] sm:$0xff]  ;;  %s4252_s8 = smul.u32 224, %s5249_s19 }
  0x10   : > { %771 = vmatpush.bf16.msra.mxu0 %v4077_v1  ;;  %4230 = vmatpush.bf16.msra.mxu1 %v4077_v1  ;;  %s4339_s12 = scalar_lea.vmem %s5208_s0, %s4251_s7  ;;  %v4094_v23 = vld [vmem:[%s5209_s1 + $0xb8] sm:$0xff]  ;;  %v4151_v25 = vld [vmem:[%s5209_s1 + $0x130] sm:$0xff]  ;;  %v4150_v30 = vld [vmem:[%s5209_s1 + $0x128] sm:$0xff] }
  0x11   : > { %4232 = vmatpush.bf16.msra.mxu3 %v4077_v1  ;;  %4231 = vmatpush.bf16.msra.mxu2 %v4077_v1  ;;  %v3141_v8 = vld [vmem:[%s4339_s12] sm:$0xf]  ;;  %v4030_v9 = vld [vmem:[%s4339_s12 + $0x8] sm:$0xf0]  ;;  %v3261_v12 = vld [vmem:[%s4339_s12 + $0xf0] sm:$0xf]  ;;  %s5032_s14 = scalar_lea.vmem %s5211_s3, %s4252_s8  ;;  %s241_s8 = scalar_lea.vmem %s5213_s5, %s5249_s19 }
  0x12   : > { %v3189_v10 = vld [vmem:[%s4339_s12 + $0x60] sm:$0xf]  ;;  %v4042_v11 = vld [vmem:[%s4339_s12 + $0x68] sm:$0xf0]  ;;  %v4060_v13 = vld [vmem:[%s4339_s12 + $0xf8] sm:$0xf0]  ;;  %v3142_v17 = vor.u32 %v4030_v9, %v3141_v8 }
  0x13   : > { %v3190_v18 = vor.u32 %v4042_v11, %v3189_v10  ;;  %v3262_v19 = vor.u32 %v4060_v13, %v3261_v12  ;;  %v3237_v20 = vld [vmem:[%s4339_s12 + $0xc0] sm:$0xf]  ;;  %v4054_v21 = vld [vmem:[%s4339_s12 + $0xc8] sm:$0xf0]  ;;  %v4093_v28 = vld [vmem:[%s5209_s1 + $0xb0] sm:$0xff] }
  0x14   : > { %772 = vmatpush.bf16.msra.mxu0 %v4076_v2  ;;  %4233 = vmatpush.bf16.msra.mxu1 %v4076_v2  ;;  %v3238_v26 = vor.u32 %v4054_v21, %v3237_v20  ;;  %v4083_v31 = vld [vmem:[%s5209_s1 + $0x60] sm:$0xff]  ;;  %v4092_v32 = vld [vmem:[%s5209_s1 + $0xa8] sm:$0xff]  ;;  %v3153_v35 = vld [vmem:[%s4339_s12 + $0x18] sm:$0xf] }
  0x15   : > { %4235 = vmatpush.bf16.msra.mxu3 %v4076_v2  ;;  %4234 = vmatpush.bf16.msra.mxu2 %v4076_v2  ;;  %v4141_v33 = vld [vmem:[%s5209_s1 + $0xe0] sm:$0xff]  ;;  %v3201_v37 = vld [vmem:[%s4339_s12 + $0x78] sm:$0xf]  ;;  %v3273_v39 = vld [vmem:[%s4339_s12 + $0x108] sm:$0xf] }
  0x16   : > { %v4149_v34 = vld [vmem:[%s5209_s1 + $0x120] sm:$0xff]  ;;  %v4063_v40 = vld [vmem:[%s4339_s12 + $0x110] sm:$0xf0]  ;;  %v4082_v42 = vld [vmem:[%s5209_s1 + $0x58] sm:$0xff] }
  0x17   : > { %v4033_v36 = vld [vmem:[%s4339_s12 + $0x20] sm:$0xf0]  ;;  %v4140_v43 = vld [vmem:[%s5209_s1 + $0xd8] sm:$0xff]  ;;  %v3274_v47 = vor.u32 %v4063_v40, %v3273_v39  ;;  %v4081_v51 = vld [vmem:[%s5209_s1 + $0x50] sm:$0xff] }
  0x18   : > { %773 = vmatpush.bf16.msra.mxu0 %v4075_v3  ;;  %4236 = vmatpush.bf16.msra.mxu1 %v4075_v3  ;;  %v4045_v38 = vld [vmem:[%s4339_s12 + $0x80] sm:$0xf0]  ;;  %v4148_v44 = vld [vmem:[%s5209_s1 + $0x118] sm:$0xff]  ;;  %v3154_v45 = vor.u32 %v4033_v36, %v3153_v35  ;;  %v4139_v52 = vld [vmem:[%s5209_s1 + $0xd0] sm:$0xff] }
  0x19   : > { %4238 = vmatpush.bf16.msra.mxu3 %v4075_v3  ;;  %4237 = vmatpush.bf16.msra.mxu2 %v4075_v3  ;;  %v4091_v41 = vld [vmem:[%s5209_s1 + $0xa0] sm:$0xff]  ;;  %v3202_v46 = vor.u32 %v4045_v38, %v3201_v37  ;;  %v3249_v48 = vld [vmem:[%s4339_s12 + $0xd8] sm:$0xf]  ;;  %v4147_v54 = vld [vmem:[%s5209_s1 + $0x110] sm:$0xff] }
  0x1a   : > { %v4057_v49 = vld [vmem:[%s4339_s12 + $0xe0] sm:$0xf0]  ;;  %v4090_v50 = vld [vmem:[%s5209_s1 + $0x98] sm:$0xff]  ;;  %v4089_v55 = vld [vmem:[%s5209_s1 + $0x90] sm:$0xff] }
  0x1b   : > { %v3250_v53 = vor.u32 %v4057_v49, %v3249_v48  ;;  %v4080_v56 = vld [vmem:[%s5209_s1 + $0x48] sm:$0xff]  ;;  %v4079_v60 = vld [vmem:[%s5209_s1 + $0x40] sm:$0xff]  ;;  %v3165_v63 = vld [vmem:[%s4339_s12 + $0x30] sm:$0xf] }
  0x1c   : > { %774 = vmatpush.bf16.msra.mxu0 %v4074_v4  ;;  %4239 = vmatpush.bf16.msra.mxu1 %v4074_v4  ;;  %v4138_v57 = vld [vmem:[%s5209_s1 + $0xc8] sm:$0xff]  ;;  %v4137_v61 = vld [vmem:[%s5209_s1 + $0xc0] sm:$0xff]  ;;  %v4036_v0 = vld [vmem:[%s4339_s12 + $0x38] sm:$0xf0] }
  0x1d   : > { %4241 = vmatpush.bf16.msra.mxu3 %v4074_v4  ;;  %4240 = vmatpush.bf16.msra.mxu2 %v4074_v4  ;;  %v4146_v58 = vld [vmem:[%s5209_s1 + $0x108] sm:$0xff]  ;;  %v4145_v62 = vld [vmem:[%s5209_s1 + $0x100] sm:$0xff]  ;;  %v3213_v1 = vld [vmem:[%s4339_s12 + $0x90] sm:$0xf] }
  0x1e   : > { %v4088_v59 = vld [vmem:[%s5209_s1 + $0x88] sm:$0xff]  ;;  %v4048_v2 = vld [vmem:[%s4339_s12 + $0x98] sm:$0xf0]  ;;  %v3285_v3 = vld [vmem:[%s4339_s12 + $0x120] sm:$0xf] }
  0x1f   : > { %v4066_v4 = vld [vmem:[%s4339_s12 + $0x128] sm:$0xf0]  ;;  %v3149_v9 = vld [vmem:[%s4339_s12 + $0x8] sm:$0xf]  ;;  %v4031_v10 = vld [vmem:[%s4339_s12 + $0x10] sm:$0xf0] }
  0x20   : > { %775 = vmatpush.bf16.msra.mxu0 %v4073_v5  ;;  %4242 = vmatpush.bf16.msra.mxu1 %v4073_v5  ;;  %v3286_v8 = vor.u32 %v4066_v4, %v3285_v3  ;;  %v3150_v11 = vor.u32 %v4031_v10, %v3149_v9  ;;  %v4210_v12 = vld [vmem:[%s5209_s1 + $0x1b8] sm:$0xff]  ;;  %v4069_v21 = vld [vmem:[%s4339_s12 + $0x140] sm:$0xf0]  ;;  %v3465_v48 = vld [vmem:[%s4339_s12 + $0x30] sm:$0xf] }
  0x21   : > { %4244 = vmatpush.bf16.msra.mxu3 %v4073_v5  ;;  %4243 = vmatpush.bf16.msra.mxu2 %v4073_v5  ;;  %v4087_v5 = vld [vmem:[%s5209_s1 + $0x80] sm:$0xff]  ;;  %v4218_v13 = vld [vmem:[%s5209_s1 + $0x1f8] sm:$0xff]  ;;  %v3197_v3 = vld [vmem:[%s4339_s12 + $0x68] sm:$0xf] }
  0x22   : > { %v3297_v20 = vld [vmem:[%s4339_s12 + $0x138] sm:$0xf]  ;;  %v4096_v35 = vld [vmem:[%s4339_s12 + $0x20] sm:$0xf0]  ;;  %v4099_v49 = vld [vmem:[%s4339_s12 + $0x38] sm:$0xf0] }
  0x23   : > { %v3173_v39 = vld [vmem:[%s4339_s12 + $0x38] sm:$0xf]  ;;  %v4037_v40 = vld [vmem:[%s4339_s12 + $0x40] sm:$0xf0]  ;;  %v4043_v4 = vld [vmem:[%s4339_s12 + $0x70] sm:$0xf0] }
  0x24   : > { %776 = vmatpush.bf16.msra.mxu0 %v4072_v6  ;;  %4245 = vmatpush.bf16.msra.mxu1 %v4072_v6  ;;  %v3179_v9 = vld [vmem:[%s4339_s12 + $0x54] sm:$0xf0]  ;;  %v4104_v10 = vld [vmem:[%s4339_s12 + $0x64] sm:$0xf] }
  0x25   : > { %4247 = vmatpush.bf16.msra.mxu3 %v4072_v6  ;;  %4246 = vmatpush.bf16.msra.mxu2 %v4072_v6  ;;  %v3166_v6 = vor.u32 %v4036_v0, %v3165_v63  ;;  %v4102_v63 = vld [vmem:[%s4339_s12 + $0x50] sm:$0xf0] }
  0x28   : > { %777 = vmatpush.bf16.msra.mxu0 %v4071_v7  ;;  %4248 = vmatpush.bf16.msra.mxu1 %v4071_v7 }
  0x29   : > { %4250 = vmatpush.bf16.msra.mxu3 %v4071_v7  ;;  %4249 = vmatpush.bf16.msra.mxu2 %v4071_v7  ;;  %v3214_v7 = vor.u32 %v4048_v2, %v3213_v1 }
  0x2b   : > { %778 = vmatmul.bf16.vlgmr.msra.gmra.mxu0 %v3142_v17  ;;  %798 = vmatmul.bf16.vlgmr.msra.gmra.mxu1 %v3190_v18  ;;  %v4039_v17 = vld [vmem:[%s4339_s12 + $0x50] sm:$0xf0]  ;;  %v3225_v18 = vld [vmem:[%s4339_s12 + $0xa8] sm:$0xf] }
  0x2c   : > { %849 = vmatpush.bf16.msrb.mxu1 %v4086_v14  ;;  %1643 = vmatpush.bf16.msrb.mxu0 %v4152_v16  ;;  %v4160_v14 = vld [vmem:[%s5209_s1 + $0x178] sm:$0xff]  ;;  %v3177_v16 = vld [vmem:[%s4339_s12 + $0x48] sm:$0xf] }
  0x2d   : > { %1564 = vmatpush.bf16.msrb.mxu3 %v4144_v15  ;;  %928 = vmatpush.bf16.msrb.mxu2 %v4094_v23  ;;  %v4226_v15 = vld [vmem:[%s5209_s1 + $0x238] sm:$0xff] }
  0x2e   : > { %828 = vmatmul.bf16.vlgmr.msra.gmra.mxu3 %v3262_v19  ;;  %818 = vmatmul.bf16.vlgmr.msra.gmra.mxu2 %v3238_v26  ;;  %v4051_v19 = vld [vmem:[%s4339_s12 + $0xb0] sm:$0xf0]  ;;  %v4034_v26 = vld [vmem:[%s4339_s12 + $0x28] sm:$0xf0] }
  0x2f   : > { %v3226_v23 = vor.u32 %v4051_v19, %v3225_v18  ;;  %v4046_v18 = vld [vmem:[%s4339_s12 + $0x88] sm:$0xf0] }
  0x30   : > { %850 = vmatpush.bf16.msrb.mxu1 %v4085_v22  ;;  %1644 = vmatpush.bf16.msrb.mxu0 %v4151_v25  ;;  %v3178_v22 = vor.u32 %v4039_v17, %v3177_v16  ;;  %v3161_v25 = vld [vmem:[%s4339_s12 + $0x20] sm:$0xf] }
  0x31   : > { %1565 = vmatpush.bf16.msrb.mxu3 %v4143_v24  ;;  %929 = vmatpush.bf16.msrb.mxu2 %v4093_v28  ;;  %v3298_v24 = vor.u32 %v4069_v21, %v3297_v20  ;;  %v4209_v28 = vld [vmem:[%s5209_s1 + $0x1b0] sm:$0xff]  ;;  %v3209_v17 = vld [vmem:[%s4339_s12 + $0x80] sm:$0xf] }
  0x32   : > { %v3210_v19 = vor.u32 %v4046_v18, %v3209_v17  ;;  %v4207_v20 = vld [vmem:[%s5209_s1 + $0x1a0] sm:$0xff] }
  0x33   : > { %v4215_v21 = vld [vmem:[%s5209_s1 + $0x1e0] sm:$0xff] }
  0x34   : > { %851 = vmatpush.bf16.msrb.mxu1 %v4084_v27  ;;  %1645 = vmatpush.bf16.msrb.mxu0 %v4150_v30  ;;  %v3162_v27 = vor.u32 %v4034_v26, %v3161_v25  ;;  %v4029_v30 = vld [vmem:[%s4339_s12 + $0x4] sm:$0xf]  ;;  %v4107_v25 = vld [vmem:[%s4339_s12 + $0x7c] sm:$0xf]  ;;  %v3503_v26 = vld [vmem:[%s4339_s12 + $0x84] sm:$0xf0] }
  0x35   : > { %1566 = vmatpush.bf16.msrb.mxu3 %v4142_v29  ;;  %930 = vmatpush.bf16.msrb.mxu2 %v4092_v32  ;;  %v4217_v29 = vld [vmem:[%s5209_s1 + $0x1f0] sm:$0xff]  ;;  %v4095_v32 = vld [vmem:[%s4339_s12 + $0x1c] sm:$0xf] }
  0x38   : > { %852 = vmatpush.bf16.msrb.mxu1 %v4083_v31  ;;  %1646 = vmatpush.bf16.msrb.mxu0 %v4149_v34  ;;  %v3143_v31 = vld [vmem:[%s4339_s12 + $0xc] sm:$0xf0]  ;;  %v3453_v34 = vld [vmem:[%s4339_s12 + $0x18] sm:$0xf] }
  0x39   : > { %1567 = vmatpush.bf16.msrb.mxu3 %v4141_v33  ;;  %931 = vmatpush.bf16.msrb.mxu2 %v4091_v41  ;;  %v3455_v33 = vld [vmem:[%s4339_s12 + $0x24] sm:$0xf0]  ;;  %v3146_v36 = vor.u32 %v4029_v30, %v3143_v31  ;;  %v3454_v38 = vor.u32 %v4096_v35, %v3453_v34  ;;  %v3174_v41 = vor.u32 %v4037_v40, %v3173_v39  ;;  %v4223_v31 = vld [vmem:[%s5209_s1 + $0x220] sm:$0xff]  ;;  %v3221_v35 = vld [vmem:[%s4339_s12 + $0x98] sm:$0xf] }
  0x3a   : > { %v3458_v37 = vor.u32 %v4095_v32, %v3455_v33  ;;  %v3506_v30 = vor.u32 %v4107_v25, %v3503_v26  ;;  %v3539_v25 = vld [vmem:[%s4339_s12 + $0xcc] sm:$0xf0]  ;;  %v3537_v26 = vld [vmem:[%s4339_s12 + $0xc0] sm:$0xf] }
  0x3b   : > { %783 = vmatmul.bf16.gmra.mxu0 %v3154_v45  ;;  %803 = vmatmul.bf16.gmra.mxu1 %v3202_v46  ;;  %v3155_v45 = vld [vmem:[%s4339_s12 + $0x24] sm:$0xf0]  ;;  %v4098_v46 = vld [vmem:[%s4339_s12 + $0x34] sm:$0xf] }
  0x3c   : > { %853 = vmatpush.bf16.msrb.mxu1 %v4082_v42  ;;  %1647 = vmatpush.bf16.msrb.mxu0 %v4148_v44  ;;  %v4159_v42 = vld [vmem:[%s5209_s1 + $0x170] sm:$0xff]  ;;  %v4032_v44 = vld [vmem:[%s4339_s12 + $0x1c] sm:$0xf] }
  0x3d   : > { %1568 = vmatpush.bf16.msrb.mxu3 %v4140_v43  ;;  %932 = vmatpush.bf16.msrb.mxu2 %v4090_v50  ;;  %v4225_v43 = vld [vmem:[%s5209_s1 + $0x230] sm:$0xff]  ;;  %v3158_v50 = vor.u32 %v4032_v44, %v3155_v45  ;;  %v3515_v45 = vld [vmem:[%s4339_s12 + $0x9c] sm:$0xf0] }
  0x3e   : > { %833 = vmatmul.bf16.gmra.mxu3 %v3274_v47  ;;  %823 = vmatmul.bf16.gmra.mxu2 %v3250_v53  ;;  %v3467_v47 = vld [vmem:[%s4339_s12 + $0x3c] sm:$0xf0]  ;;  %v3185_v53 = vld [vmem:[%s4339_s12 + $0x50] sm:$0xf]  ;;  %v4110_v44 = vld [vmem:[%s4339_s12 + $0x94] sm:$0xf] }
  0x40   : > { %854 = vmatpush.bf16.msrb.mxu1 %v4081_v51  ;;  %1648 = vmatpush.bf16.msrb.mxu0 %v4147_v54  ;;  %v3470_v51 = vor.u32 %v4098_v46, %v3467_v47  ;;  %v4040_v54 = vld [vmem:[%s4339_s12 + $0x58] sm:$0xf0]  ;;  %v3513_v46 = vld [vmem:[%s4339_s12 + $0x90] sm:$0xf] }
  0x41   : > { %1569 = vmatpush.bf16.msrb.mxu3 %v4139_v52  ;;  %933 = vmatpush.bf16.msrb.mxu2 %v4089_v55  ;;  %v3466_v52 = vor.u32 %v4099_v49, %v3465_v48  ;;  %v3186_v55 = vor.u32 %v4040_v54, %v3185_v53  ;;  %v4111_v47 = vld [vmem:[%s4339_s12 + $0x98] sm:$0xf0]  ;;  %v3233_v54 = vld [vmem:[%s4339_s12 + $0xb0] sm:$0xf] }
  0x42   : > { %v3514_v53 = vor.u32 %v4111_v47, %v3513_v46  ;;  %v4155_v46 = vld [vmem:[%s5209_s1 + $0x150] sm:$0xff] }
  0x44   : > { %855 = vmatpush.bf16.msrb.mxu1 %v4080_v56  ;;  %1649 = vmatpush.bf16.msrb.mxu0 %v4146_v58  ;;  %v4208_v56 = vld [vmem:[%s5209_s1 + $0x1a8] sm:$0xff]  ;;  %v4035_v58 = vld [vmem:[%s4339_s12 + $0x34] sm:$0xf] }
  0x45   : > { %1570 = vmatpush.bf16.msrb.mxu3 %v4138_v57  ;;  %934 = vmatpush.bf16.msrb.mxu2 %v4088_v59  ;;  %v4216_v57 = vld [vmem:[%s5209_s1 + $0x1e8] sm:$0xff]  ;;  %v3167_v59 = vld [vmem:[%s4339_s12 + $0x3c] sm:$0xf0] }
  0x46   : > { %v3170_v0 = vor.u32 %v4035_v58, %v3167_v59  ;;  %v4206_v58 = vld [vmem:[%s5209_s1 + $0x198] sm:$0xff] }
  0x47   : > { %v4214_v59 = vld [vmem:[%s5209_s1 + $0x1d8] sm:$0xff] }
  0x48   : > { %856 = vmatpush.bf16.msrb.mxu1 %v4079_v60  ;;  %1650 = vmatpush.bf16.msrb.mxu0 %v4145_v62  ;;  %v4101_v60 = vld [vmem:[%s4339_s12 + $0x4c] sm:$0xf]  ;;  %v3477_v62 = vld [vmem:[%s4339_s12 + $0x48] sm:$0xf] }
  0x49   : > { %1571 = vmatpush.bf16.msrb.mxu3 %v4137_v61  ;;  %935 = vmatpush.bf16.msrb.mxu2 %v4087_v5  ;;  %v3479_v61 = vld [vmem:[%s4339_s12 + $0x54] sm:$0xf0]  ;;  %v3478_v2 = vor.u32 %v4102_v63, %v3477_v62  ;;  %v4158_v5 = vld [vmem:[%s5209_s1 + $0x168] sm:$0xff] }
  0x4a   : > { %v3482_v1 = vor.u32 %v4101_v60, %v3479_v61  ;;  %v4156_v63 = vld [vmem:[%s5209_s1 + $0x158] sm:$0xff] }
  0x4b   : > { %788 = vmatmul.bf16.gmra.mxu0 %v3166_v6  ;;  %808 = vmatmul.bf16.gmra.mxu1 %v3214_v7  ;;  %v3198_v6 = vor.u32 %v4043_v4, %v3197_v3  ;;  %v4224_v7 = vld [vmem:[%s5209_s1 + $0x228] sm:$0xff]  ;;  %v3215_v3 = vld [vmem:[%s4339_s12 + $0x9c] sm:$0xf0] }
  0x4c   : > { %1722 = vmatpush.bf16.msra.mxu1 %v4160_v14  ;;  %2516 = vmatpush.bf16.msra.mxu0 %v4226_v15  ;;  %v4113_v4 = vld [vmem:[%s4339_s12 + $0xac] sm:$0xf] }
  0x4d   : > { %2358 = vmatpush.bf16.msra.mxu2 %v4210_v12  ;;  %2437 = vmatpush.bf16.msra.mxu3 %v4218_v13  ;;  %v3489_v12 = vld [vmem:[%s4339_s12 + $0x60] sm:$0xf]  ;;  %v4105_v13 = vld [vmem:[%s4339_s12 + $0x68] sm:$0xf0] }
  0x4e   : > { %838 = vmatmul.bf16.gmra.mxu3 %v3286_v8  ;;  %936 = vmatmul.bf16.vlgmr.msrb.gmra.mxu2 %v3150_v11  ;;  %v4038_v8 = vld [vmem:[%s4339_s12 + $0x4c] sm:$0xf]  ;;  %v3491_v11 = vld [vmem:[%s4339_s12 + $0x6c] sm:$0xf0]  ;;  %v3490_v16 = vor.u32 %v4105_v13, %v3489_v12 }
  0x4f   : > { %v3182_v14 = vor.u32 %v4038_v8, %v3179_v9  ;;  %v3494_v15 = vor.u32 %v4104_v10, %v3491_v11 }
  0x50   : > { %1723 = vmatpush.bf16.msra.mxu1 %v4159_v42  ;;  %2517 = vmatpush.bf16.msra.mxu0 %v4225_v43  ;;  %v4044_v42 = vld [vmem:[%s4339_s12 + $0x7c] sm:$0xf]  ;;  %v3203_v43 = vld [vmem:[%s4339_s12 + $0x84] sm:$0xf0] }
  0x51   : > { %2359 = vmatpush.bf16.msra.mxu2 %v4209_v28  ;;  %2438 = vmatpush.bf16.msra.mxu3 %v4217_v29  ;;  %v4108_v28 = vld [vmem:[%s4339_s12 + $0x80] sm:$0xf0]  ;;  %v3206_v49 = vor.u32 %v4044_v42, %v3203_v43  ;;  %v4205_v42 = vld [vmem:[%s5209_s1 + $0x190] sm:$0xff] }
  0x52   : > { %v4213_v43 = vld [vmem:[%s5209_s1 + $0x1d0] sm:$0xff] }
  0x54   : > { %1724 = vmatpush.bf16.msra.mxu1 %v4158_v5  ;;  %2518 = vmatpush.bf16.msra.mxu0 %v4224_v7  ;;  %v3527_v5 = vld [vmem:[%s4339_s12 + $0xb4] sm:$0xf0]  ;;  %v4114_v7 = vld [vmem:[%s4339_s12 + $0xb0] sm:$0xf0] }
  0x55   : > { %2360 = vmatpush.bf16.msra.mxu2 %v4208_v56  ;;  %2439 = vmatpush.bf16.msra.mxu3 %v4216_v57  ;;  %v3530_v10 = vor.u32 %v4113_v4, %v3527_v5 }
  0x58   : > { %2519 = vmatpush.bf16.msra.mxu0 %v4223_v31  ;;  %v3257_v31 = vld [vmem:[%s4339_s12 + $0xe0] sm:$0xf] }
  0x59   : > { %2361 = vmatpush.bf16.msra.mxu2 %v4207_v20  ;;  %2440 = vmatpush.bf16.msra.mxu3 %v4215_v21 }
  0x5b   : > { %793 = vmatmul.bf16.gmra.mxu0 %v3178_v22  ;;  %813 = vmatmul.bf16.gmra.mxu1 %v3226_v23  ;;  %v4157_v22 = vld [vmem:[%s5209_s1 + $0x160] sm:$0xff] }
  0x5c   : > { %1725 = vmatpush.bf16.msra.mxu1 %v4157_v22  ;;  %v4041_v23 = vld [vmem:[%s4339_s12 + $0x64] sm:$0xf]  ;;  %v4050_v22 = vld [vmem:[%s4339_s12 + $0xac] sm:$0xf] }
  0x5d   : > { %2362 = vmatpush.bf16.msra.mxu2 %v4206_v58  ;;  %2441 = vmatpush.bf16.msra.mxu3 %v4214_v59  ;;  %v4119_v58 = vld [vmem:[%s4339_s12 + $0xdc] sm:$0xf]  ;;  %v3551_v59 = vld [vmem:[%s4339_s12 + $0xe4] sm:$0xf0] }
  0x5e   : > { %843 = vmatmul.bf16.gmra.mxu3 %v3298_v24  ;;  %941 = vmatmul.bf16.gmra.mxu2 %v3162_v27  ;;  %v3191_v24 = vld [vmem:[%s4339_s12 + $0x6c] sm:$0xf0]  ;;  %v3501_v27 = vld [vmem:[%s4339_s12 + $0x78] sm:$0xf]  ;;  %v3554_v4 = vor.u32 %v4119_v58, %v3551_v59  ;;  %v4064_v59 = vld [vmem:[%s4339_s12 + $0x118] sm:$0xf0] }
  0x5f   : > { %v3194_v29 = vor.u32 %v4041_v23, %v3191_v24  ;;  %v3502_v34 = vor.u32 %v4108_v28, %v3501_v27  ;;  %v3227_v23 = vld [vmem:[%s4339_s12 + $0xb4] sm:$0xf0]  ;;  %v4116_v24 = vld [vmem:[%s4339_s12 + $0xc4] sm:$0xf]  ;;  %v4117_v27 = vld [vmem:[%s4339_s12 + $0xc8] sm:$0xf0] }
  0x60   : > { %1726 = vmatpush.bf16.msra.mxu1 %v4156_v63  ;;  %v3549_v63 = vld [vmem:[%s4339_s12 + $0xd8] sm:$0xf]  ;;  %v3281_v58 = vld [vmem:[%s4339_s12 + $0x110] sm:$0xf] }
  0x61   : > { %2363 = vmatpush.bf16.msra.mxu2 %v4205_v42  ;;  %2442 = vmatpush.bf16.msra.mxu3 %v4213_v43  ;;  %v3561_v42 = vld [vmem:[%s4339_s12 + $0xf0] sm:$0xf]  ;;  %v4123_v43 = vld [vmem:[%s4339_s12 + $0xf8] sm:$0xf0] }
  0x64   : > { %1727 = vmatpush.bf16.msra.mxu1 %v4155_v46 }
  0x6b   : > { %857 = vmatmul.bf16.vlgmr.msrb.gmra.mxu1 %v3146_v36  ;;  %1651 = vmatmul.bf16.vlgmr.msrb.gmra.mxu0 %v3458_v37  ;;  %v4049_v36 = vld [vmem:[%s4339_s12 + $0xa0] sm:$0xf0] }
  0x6c   : > { %v3222_v37 = vor.u32 %v4049_v36, %v3221_v35  ;;  %v3538_v36 = vor.u32 %v4117_v27, %v3537_v26  ;;  %v4056_v27 = vld [vmem:[%s4339_s12 + $0xdc] sm:$0xf] }
  0x6e   : > { %1572 = vmatmul.bf16.vlgmr.msrb.gmra.mxu3 %v3454_v38  ;;  %946 = vmatmul.bf16.gmra.mxu2 %v3174_v41 }
  0x7b   : > { %862 = vmatmul.bf16.gmra.mxu1 %v3158_v50  ;;  %1656 = vmatmul.bf16.gmra.mxu0 %v3470_v51  ;;  %v3518_v50 = vor.u32 %v4110_v44, %v3515_v45 }
  0x7e   : > { %1577 = vmatmul.bf16.gmra.mxu3 %v3466_v52  ;;  %951 = vmatmul.bf16.gmra.mxu2 %v3186_v55  ;;  %v4052_v55 = vld [vmem:[%s4339_s12 + $0xb8] sm:$0xf0] }
  0x7f   : > { %v3234_v57 = vor.u32 %v4052_v55, %v3233_v54  ;;  %v4053_v55 = vld [vmem:[%s4339_s12 + $0xc4] sm:$0xf] }
  0x8b   : > { %867 = vmatmul.bf16.gmra.mxu1 %v3170_v0  ;;  %1661 = vmatmul.bf16.gmra.mxu0 %v3482_v1  ;;  %v4222_v0 = vld [vmem:[%s5209_s1 + $0x218] sm:$0xff] }
  0x8c   : > { %2520 = vmatpush.bf16.msra.mxu0 %v4222_v0  ;;  %v4120_v0 = vld [vmem:[%s4339_s12 + $0xe0] sm:$0xf0] }
  0x8e   : > { %1582 = vmatmul.bf16.gmra.mxu3 %v3478_v2  ;;  %956 = vmatmul.bf16.gmra.mxu2 %v3198_v6  ;;  %v4047_v2 = vld [vmem:[%s4339_s12 + $0x94] sm:$0xf]  ;;  %v3525_v6 = vld [vmem:[%s4339_s12 + $0xa8] sm:$0xf] }
  0x8f   : > { %v3218_v9 = vor.u32 %v4047_v2, %v3215_v3  ;;  %v3526_v13 = vor.u32 %v4114_v7, %v3525_v6  ;;  %v3550_v7 = vor.u32 %v4120_v0, %v3549_v63 }
  0x9b   : > { %872 = vmatmul.bf16.gmra.mxu1 %v3182_v14  ;;  %1666 = vmatmul.bf16.gmra.mxu0 %v3494_v15  ;;  %v3245_v14 = vld [vmem:[%s4339_s12 + $0xc8] sm:$0xf]  ;;  %v4055_v15 = vld [vmem:[%s4339_s12 + $0xd0] sm:$0xf0] }
  0x9c   : > { %v3246_v17 = vor.u32 %v4055_v15, %v3245_v14 }
  0x9e   : > { %1587 = vmatmul.bf16.gmra.mxu3 %v3490_v16  ;;  %961 = vmatmul.bf16.gmra.mxu2 %v3210_v19 }
  0xa8   : > { %v4558_v32 = vpop.f32.mrf.mxu0  ;;  %v4560_v33 = vpop.f32.mrf.mxu1 }
  0xab   : > { %877 = vmatmul.bf16.gmra.mxu1 %v3194_v29  ;;  %1671 = vmatmul.bf16.gmra.mxu0 %v3506_v30  ;;  %v3230_v29 = vor.u32 %v4050_v22, %v3227_v23  ;;  %v3542_v30 = vor.u32 %v4116_v24, %v3539_v25 }
  0xae   : > { %1592 = vmatmul.bf16.gmra.mxu3 %v3502_v34  ;;  %966 = vmatmul.bf16.gmra.mxu2 %v3222_v37  ;;  %v4058_v37 = vld [vmem:[%s4339_s12 + $0xe8] sm:$0xf0] }
  0xaf   : > { %v3258_v45 = vor.u32 %v4058_v37, %v3257_v31  ;;  %v3251_v31 = vld [vmem:[%s4339_s12 + $0xe4] sm:$0xf0]  ;;  %v3563_v37 = vld [vmem:[%s4339_s12 + $0xfc] sm:$0xf0] }
  0xb0   : > { %v4566_v39 = vpop.f32.mrf.mxu0  ;;  %v4568_v40 = vpop.f32.mrf.mxu1 }
  0xb1   : > { %v4564_v38 = vpop.f32.mrf.mxu3  ;;  %v4570_v41 = vpop.f32.mrf.mxu2 }
  0xb8   : > { %v4580_v51 = vpop.f32.mrf.mxu0  ;;  %v4582_v52 = vpop.f32.mrf.mxu1 }
  0xb9   : > { %v4578_v48 = vpop.f32.mrf.mxu3  ;;  %v4586_v56 = vpop.f32.mrf.mxu2 }
  0xbb   : > { %882 = vmatmul.bf16.gmra.mxu1 %v3206_v49  ;;  %1676 = vmatmul.bf16.gmra.mxu0 %v3518_v50 }
  0xbe   : > { %1597 = vmatmul.bf16.gmra.mxu3 %v3514_v53  ;;  %971 = vmatmul.bf16.gmra.mxu2 %v3234_v57  ;;  %v4221_v53 = vld [vmem:[%s5209_s1 + $0x210] sm:$0xff] }
  0xbf   : > { %2521 = vmatpush.bf16.msra.mxu0 %v4221_v53  ;;  %v3239_v57 = vld [vmem:[%s4339_s12 + $0xcc] sm:$0xf0] }
  0xc0   : > { %v4596_v61 = vpop.f32.mrf.mxu0  ;;  %v4598_v62 = vpop.f32.mrf.mxu1  ;;  %v3242_v3 = vor.u32 %v4053_v55, %v3239_v57  ;;  %v3562_v57 = vor.u32 %v4123_v43, %v3561_v42 }
  0xc1   : > { %v4594_v60 = vpop.f32.mrf.mxu3  ;;  %v4606_v1 = vpop.f32.mrf.mxu2 }
  0xc8   : > { %v4616_v11 = vpop.f32.mrf.mxu0  ;;  %v4618_v12 = vpop.f32.mrf.mxu1 }
  0xc9   : > { %v4614_v8 = vpop.f32.mrf.mxu3  ;;  %v4622_v16 = vpop.f32.mrf.mxu2 }
  0xcb   : > { %887 = vmatmul.bf16.gmra.mxu1 %v3218_v9  ;;  %1681 = vmatmul.bf16.gmra.mxu0 %v3530_v10  ;;  %v3269_v9 = vld [vmem:[%s4339_s12 + $0xf8] sm:$0xf]  ;;  %v4061_v10 = vld [vmem:[%s4339_s12 + $0x100] sm:$0xf0] }
  0xce   : > { %1602 = vmatmul.bf16.gmra.mxu3 %v3526_v13  ;;  %976 = vmatmul.bf16.gmra.mxu2 %v3246_v17  ;;  %v3270_v17 = vor.u32 %v4061_v10, %v3269_v9 }
  0xd0   : > { %v4626_v19 = vpop.f32.mrf.mxu0  ;;  %v4628_v20 = vpop.f32.mrf.mxu1 }
  0xd1   : > { %v4624_v18 = vpop.f32.mrf.mxu3  ;;  %v937_v21 = vpop.f32.mrf.mxu2 }
  0xd8   : > { %v4639_v34 = vpop.f32.mrf.mxu0  ;;  %v4641_v35 = vpop.f32.mrf.mxu1 }
  0xd9   : > { %v4636_v28 = vpop.f32.mrf.mxu3  ;;  %v939_v44 = vpop.f32.mrf.mxu2 }
  0xdb   : > { %892 = vmatmul.bf16.gmra.mxu1 %v3230_v29  ;;  %1686 = vmatmul.bf16.gmra.mxu0 %v3542_v30  ;;  %v4204_v29 = vld [vmem:[%s5209_s1 + $0x188] sm:$0xff] }
  0xdc   : > { %v4212_v30 = vld [vmem:[%s5209_s1 + $0x1c8] sm:$0xff]  ;;  %2364 = vmatpush.bf16.msra.mxu2 %v4204_v29  ;;  %v4126_v29 = vld [vmem:[%s4339_s12 + $0x110] sm:$0xf0] }
  0xdd   : > { %2443 = vmatpush.bf16.msra.mxu3 %v4212_v30 }
  0xde   : > { %1607 = vmatmul.bf16.gmra.mxu3 %v3538_v36  ;;  %981 = vmatmul.bf16.gmra.mxu2 %v3258_v45  ;;  %v4122_v36 = vld [vmem:[%s4339_s12 + $0xf4] sm:$0xf] }
  0xdf   : > { %v3566_v45 = vor.u32 %v4122_v36, %v3563_v37 }
  0xe0   : > { %v4655_v49 = vpop.f32.mrf.mxu0  ;;  %v4657_v50 = vpop.f32.mrf.mxu1 }
  0xe1   : > { %v4653_v47 = vpop.f32.mrf.mxu3  ;;  %v942_v54 = vpop.f32.mrf.mxu2 }
  0xe8   : > { %v858_v5 = vpop.f32.mrf.mxu1  ;;  %v1652_v6 = vpop.f32.mrf.mxu0 }
  0xe9   : > { %v4668_v2 = vpop.f32.mrf.mxu3  ;;  %v859_v13 = vadd.f32 %v858_v5, %v4558_v32  ;;  %v944_v14 = vpop.f32.mrf.mxu2  ;;  %v4154_v5 = vld [vmem:[%s5209_s1 + $0x148] sm:$0xff] }
  0xea   : > { %1728 = vmatpush.bf16.msra.mxu1 %v4154_v5 }
  0xeb   : > { %v4673_v15 = vadd.f32 %v937_v21, %v859_v13  ;;  %897 = vmatmul.bf16.gmra.mxu1 %v3242_v3  ;;  %1691 = vmatmul.bf16.gmra.mxu0 %v3554_v4  ;;  %v3282_v4 = vor.u32 %v4064_v59, %v3281_v58 }
  0xee   : > { %1612 = vmatmul.bf16.gmra.mxu3 %v3550_v7  ;;  %986 = vmatmul.bf16.gmra.mxu2 %v3270_v17 }
  0xf0   : > { %v860_v24 = vpop.f32.mrf.mxu1  ;;  %v1654_v25 = vpop.f32.mrf.mxu0 }
  0xf1   : > { %v1573_v22 = vpop.f32.mrf.mxu3  ;;  %v861_v32 = vadd.f32 %v860_v24, %v4566_v39  ;;  %v947_v26 = vpop.f32.mrf.mxu2  ;;  %v3263_v24 = vld [vmem:[%s4339_s12 + $0xfc] sm:$0xf0] }
  0xf2   : > { %v4675_v23 = vadd.f32 %v1652_v6, %v1573_v22  ;;  %v4059_v22 = vld [vmem:[%s4339_s12 + $0xf4] sm:$0xf] }
  0xf3   : > { %v4678_v21 = vadd.f32 %v939_v44, %v861_v32  ;;  %v3254_v44 = vor.u32 %v4056_v27, %v3251_v31  ;;  %v3575_v32 = vld [vmem:[%s4339_s12 + $0x114] sm:$0xf0]  ;;  %v3573_v27 = vld [vmem:[%s4339_s12 + $0x108] sm:$0xf]  ;;  %v3266_v31 = vor.u32 %v4059_v22, %v3263_v24  ;;  %v3587_v22 = vld [vmem:[%s4339_s12 + $0x12c] sm:$0xf0] }
  0xf4   : > { %v3585_v24 = vld [vmem:[%s4339_s12 + $0x120] sm:$0xf] }
  0xf8   : > { %v863_v53 = vpop.f32.mrf.mxu1  ;;  %v1657_v55 = vpop.f32.mrf.mxu0 }
  0xf9   : > { %v1575_v39 = vpop.f32.mrf.mxu3  ;;  %v864_v63 = vadd.f32 %v863_v53, %v4580_v51  ;;  %v949_v0 = vpop.f32.mrf.mxu2  ;;  %v4220_v51 = vld [vmem:[%s5209_s1 + $0x208] sm:$0xff] }
  0xfa   : > { %v4692_v46 = vadd.f32 %v1654_v25, %v1575_v39  ;;  %2522 = vmatpush.bf16.msra.mxu0 %v4220_v51  ;;  %v4125_v25 = vld [vmem:[%s4339_s12 + $0x10c] sm:$0xf]  ;;  %v3574_v39 = vor.u32 %v4126_v29, %v3573_v27 }
  0xfb   : > { %v4697_v3 = vadd.f32 %v942_v54, %v864_v63  ;;  %902 = vmatmul.bf16.gmra.mxu1 %v3254_v44  ;;  %1696 = vmatmul.bf16.gmra.mxu0 %v3566_v45  ;;  %v3578_v36 = vor.u32 %v4125_v25, %v3575_v32  ;;  %v4067_v44 = vld [vmem:[%s4339_s12 + $0x130] sm:$0xf0]  ;;  %v4129_v25 = vld [vmem:[%s4339_s12 + $0x128] sm:$0xf0] }
  0xfe   : > { %1617 = vmatmul.bf16.gmra.mxu3 %v3562_v57  ;;  %991 = vmatmul.bf16.gmra.mxu2 %v3282_v4 }
 0x100   : > { %v865_v7 = vpop.f32.mrf.mxu1  ;;  %v1659_v9 = vpop.f32.mrf.mxu0 }
 0x101   : > { %v1578_v54 = vpop.f32.mrf.mxu3  ;;  %v866_v10 = vadd.f32 %v865_v7, %v4596_v61  ;;  %v952_v13 = vpop.f32.mrf.mxu2  ;;  %v3293_v61 = vld [vmem:[%s4339_s12 + $0x128] sm:$0xf]  ;;  %v4153_v7 = vld [vmem:[%s5209_s1 + $0x140] sm:$0xff] }
 0x102   : > { %v4705_v6 = vadd.f32 %v1657_v55, %v1578_v54  ;;  %v3294_v55 = vor.u32 %v4067_v44, %v3293_v61  ;;  %v4062_v54 = vld [vmem:[%s4339_s12 + $0x10c] sm:$0xf]  ;;  %1729 = vmatpush.bf16.msra.mxu1 %v4153_v7  ;;  %v3599_v7 = vld [vmem:[%s4339_s12 + $0x144] sm:$0xf0] }
 0x103   : > { %v4708_v17 = vadd.f32 %v944_v14, %v866_v10  ;;  %v4128_v10 = vld [vmem:[%s4339_s12 + $0x124] sm:$0xf] }
 0x104   : > { %v3590_v27 = vor.u32 %v4128_v10, %v3587_v22  ;;  %v4132_v10 = vld [vmem:[%s4339_s12 + $0x140] sm:$0xf0] }
 0x108   : > { %v868_v42 = vpop.f32.mrf.mxu1  ;;  %v1662_v43 = vpop.f32.mrf.mxu0 }
 0x109   : > { %v1580_v30 = vpop.f32.mrf.mxu3  ;;  %v869_v45 = vadd.f32 %v868_v42, %v4616_v11  ;;  %v954_v14 = vpop.f32.mrf.mxu2  ;;  %v4203_v11 = vld [vmem:[%s5209_s1 + $0x180] sm:$0xff]  ;;  %v4070_v42 = vld [vmem:[%s4339_s12 + $0x148] sm:$0xf0] }
 0x10a   : > { %v4716_v37 = vadd.f32 %v1659_v9, %v1580_v30  ;;  %2365 = vmatpush.bf16.msra.mxu2 %v4203_v11  ;;  %v3275_v9 = vld [vmem:[%s4339_s12 + $0x114] sm:$0xf0] }
 0x10b   : > { %v4721_v53 = vadd.f32 %v947_v26, %v869_v45  ;;  %907 = vmatmul.bf16.gmra.mxu1 %v3266_v31  ;;  %1701 = vmatmul.bf16.gmra.mxu0 %v3578_v36  ;;  %v4211_v26 = vld [vmem:[%s5209_s1 + $0x1c0] sm:$0xff]  ;;  %v3586_v31 = vor.u32 %v4129_v25, %v3585_v24 }
 0x10c   : > { %2444 = vmatpush.bf16.msra.mxu3 %v4211_v26  ;;  %v3305_v36 = vld [vmem:[%s4339_s12 + $0x140] sm:$0xf]  ;;  %v4065_v26 = vld [vmem:[%s4339_s12 + $0x124] sm:$0xf] }
 0x10d   : > { %v3306_v45 = vor.u32 %v4070_v42, %v3305_v36 }
 0x10e   : > { %1622 = vmatmul.bf16.gmra.mxu3 %v3574_v39  ;;  %996 = vmatmul.bf16.gmra.mxu2 %v3294_v55 }
 0x110   : > { %v870_v59 = vpop.f32.mrf.mxu1  ;;  %v1664_v63 = vpop.f32.mrf.mxu0 }
 0x111   : > { %v1583_v57 = vpop.f32.mrf.mxu3  ;;  %v871_v4 = vadd.f32 %v870_v59, %v4626_v19  ;;  %v957_v5 = vpop.f32.mrf.mxu2  ;;  %v3278_v19 = vor.u32 %v4062_v54, %v3275_v9  ;;  %v4131_v54 = vld [vmem:[%s4339_s12 + $0x13c] sm:$0xf]  ;;  %v3597_v9 = vld [vmem:[%s4339_s12 + $0x138] sm:$0xf] }
 0x112   : > { %v4723_v58 = vadd.f32 %v1662_v43, %v1583_v57  ;;  %v4219_v43 = vld [vmem:[%s5209_s1 + $0x200] sm:$0xff]  ;;  %v3602_v25 = vor.u32 %v4131_v54, %v3599_v7  ;;  %v3609_v54 = vld [vmem:[%s4339_s12 + $0x150] sm:$0xf]  ;;  %v4135_v7 = vld [vmem:[%s4339_s12 + $0x158] sm:$0xf0] }
 0x113   : > { %v4732_v51 = vadd.f32 %v949_v0, %v871_v4  ;;  %2523 = vmatpush.bf16.msra.mxu0 %v4219_v43  ;;  %v3287_v4 = vld [vmem:[%s4339_s12 + $0x12c] sm:$0xf0] }
 0x114   : > { %v3290_v24 = vor.u32 %v4065_v26, %v3287_v4  ;;  %v4134_v26 = vld [vmem:[%s4339_s12 + $0x154] sm:$0xf]  ;;  %v3611_v4 = vld [vmem:[%s4339_s12 + $0x15c] sm:$0xf0] }
 0x118   : > { %v873_v0 = vpop.f32.mrf.mxu1  ;;  %v1667_v30 = vpop.f32.mrf.mxu0 }
 0x119   : > { %v1585_v32 = vpop.f32.mrf.mxu3  ;;  %v874_v39 = vadd.f32 %v873_v0, %v4639_v34  ;;  %v959_v61 = vpop.f32.mrf.mxu2  ;;  %v3598_v0 = vor.u32 %v4132_v10, %v3597_v9 }
 0x11a   : > { %v4743_v29 = vadd.f32 %v1664_v63, %v1585_v32 }
 0x11b   : > { %v4751_v44 = vadd.f32 %v952_v13, %v874_v39  ;;  %912 = vmatmul.bf16.gmra.mxu1 %v3278_v19  ;;  %1706 = vmatmul.bf16.gmra.mxu0 %v3590_v27 }
 0x11e   : > { %1627 = vmatmul.bf16.gmra.mxu3 %v3586_v31  ;;  %1001 = vmatmul.bf16.gmra.mxu2 %v3306_v45 }
 0x120   : > { %v875_v59 = vpop.f32.mrf.mxu1  ;;  %v1669_v34 = vpop.f32.mrf.mxu0 }
 0x121   : > { %v1588_v55 = vpop.f32.mrf.mxu3  ;;  %v876_v63 = vadd.f32 %v875_v59, %v4655_v49  ;;  %v962_v11 = vpop.f32.mrf.mxu2  ;;  %v3765_v49 = vld [vmem:[%s4339_s12 + $0x30] sm:$0xf] }
 0x122   : > { %v4753_v57 = vadd.f32 %v1667_v30, %v1588_v55  ;;  %v4162_v30 = vld [vmem:[%s4339_s12 + $0x38] sm:$0xf0] }
 0x123   : > { %v4756_v13 = vadd.f32 %v954_v14, %v876_v63  ;;  %v3766_v42 = vor.u32 %v4162_v30, %v3765_v49  ;;  %v3299_v63 = vld [vmem:[%s4339_s12 + $0x144] sm:$0xf0] }
 0x128   : > { %v878_v19 = vpop.f32.mrf.mxu1  ;;  %v1672_v27 = vpop.f32.mrf.mxu0 }
 0x129   : > { %v1590_v22 = vpop.f32.mrf.mxu3  ;;  %v879_v14 = vadd.f32 %v878_v19, %v4560_v33  ;;  %v964_v31 = vpop.f32.mrf.mxu2 }
 0x12a   : > { %v4764_v32 = vadd.f32 %v1669_v34, %v1590_v22  ;;  %v4068_v34 = vld [vmem:[%s4339_s12 + $0x13c] sm:$0xf]  ;;  %v3614_v22 = vor.u32 %v4134_v26, %v3611_v4  ;;  %v3461_v26 = vld [vmem:[%s4339_s12 + $0x20] sm:$0xf]  ;;  %v4097_v4 = vld [vmem:[%s4339_s12 + $0x28] sm:$0xf0] }
 0x12b   : > { %v4769_v36 = vadd.f32 %v957_v5, %v879_v14  ;;  %917 = vmatmul.bf16.gmra.mxu1 %v3290_v24  ;;  %1711 = vmatmul.bf16.gmra.mxu0 %v3602_v25  ;;  %v3302_v10 = vor.u32 %v4068_v34, %v3299_v63  ;;  %v2707_v34 = vld [vmem:[%s5210_s2] sm:$0xff] }
 0x12e   : > { %1632 = vmatmul.bf16.gmra.mxu3 %v3598_v0  ;;  %2366 = vmatmul.bf16.vlgmr.msra.gmra.mxu2 %v3766_v42  ;;  %v4165_v0 = vld [vmem:[%s4339_s12 + $0x50] sm:$0xf0] }
 0x130   : > { %v880_v45 = vpop.f32.mrf.mxu1  ;;  %v1674_v55 = vpop.f32.mrf.mxu0 }
 0x131   : > { %v1593_v43 = vpop.f32.mrf.mxu3  ;;  %v881_v33 = vadd.f32 %v880_v45, %v4568_v40  ;;  %v967_v59 = vpop.f32.mrf.mxu2  ;;  %v3777_v40 = vld [vmem:[%s4339_s12 + $0x48] sm:$0xf] }
 0x132   : > { %v4771_v39 = vadd.f32 %v1672_v27, %v1593_v43  ;;  %v3610_v27 = vor.u32 %v4135_v7, %v3609_v54  ;;  %v3778_v14 = vor.u32 %v4165_v0, %v3777_v40  ;;  %v3773_v54 = vld [vmem:[%s4339_s12 + $0x38] sm:$0xf]  ;;  %v4163_v7 = vld [vmem:[%s4339_s12 + $0x40] sm:$0xf0] }
 0x133   : > { %v4774_v5 = vadd.f32 %v959_v61, %v881_v33  ;;  %v4273_v33 = vmov 0  }
 0x134   : > { %4262 = vset.pattern.permute.xlu0 %v4273_v33  ;;  %4263 = vset.pattern.permute.xlu1 %v4273_v33 }
 0x135   : > { %2737 = vperm.xlu0 %4262, %v2707_v34   ;;  %4264 = vset.pattern.permute.xlu2 %v4273_v33 }
 0x138   : > { %v883_v25 = vpop.f32.mrf.mxu1  ;;  %v1677_v19 = vpop.f32.mrf.mxu0 }
 0x139   : > { %v1595_v9 = vpop.f32.mrf.mxu3  ;;  %v884_v49 = vadd.f32 %v883_v25, %v4582_v52  ;;  %v969_v61 = vpop.f32.mrf.mxu2  ;;  %v3774_v25 = vor.u32 %v4163_v7, %v3773_v54  ;;  %v2709_v54 = vld [vmem:[%s5210_s2 + $0x10] sm:$0xff] }
 0x13a   : > { %v4782_v24 = vadd.f32 %v1674_v55, %v1595_v9  ;;  %v4161_v9 = vld [vmem:[%s4339_s12 + $0x34] sm:$0xf]  ;;  %2747 = vperm.xlu1 %4263, %v2709_v54  }
 0x13b   : > { %v4787_v30 = vadd.f32 %v962_v11, %v884_v49  ;;  %922 = vmatmul.bf16.gmra.mxu1 %v3302_v10  ;;  %1716 = vmatmul.bf16.gmra.mxu0 %v3614_v22  ;;  %v3462_v22 = vor.u32 %v4097_v4, %v3461_v26  ;;  %v4168_v49 = vld [vmem:[%s4339_s12 + $0x68] sm:$0xf0] }
 0x13e   : > { %1637 = vmatmul.bf16.gmra.mxu3 %v3610_v27  ;;  %2371 = vmatmul.bf16.gmra.mxu2 %v3778_v14 }
 0x140   : > { %v885_v45 = vpop.f32.mrf.mxu1  ;;  %v1679_v55 = vpop.f32.mrf.mxu0 }
 0x141   : > { %v1598_v42 = vpop.f32.mrf.mxu3  ;;  %v886_v52 = vadd.f32 %v885_v45, %v4598_v62  ;;  %v972_v11 = vpop.f32.mrf.mxu2  ;;  %v3767_v62 = vld [vmem:[%s4339_s12 + $0x3c] sm:$0xf0]  ;;  %v2708_v45 = vld [vmem:[%s5210_s2 + $0x8] sm:$0xff] }
 0x142   : > { %v4789_v43 = vadd.f32 %v1677_v19, %v1598_v42  ;;  %v3770_v0 = vor.u32 %v4161_v9, %v3767_v62  ;;  %2742 = vperm.xlu0 %4262, %v2708_v45   ;;  %v3473_v9 = vld [vmem:[%s4339_s12 + $0x38] sm:$0xf]  ;;  %v4100_v62 = vld [vmem:[%s4339_s12 + $0x40] sm:$0xf0] }
 0x143   : > { %v4795_v63 = vadd.f32 %v964_v31, %v886_v52  ;;  %v3789_v31 = vld [vmem:[%s4339_s12 + $0x60] sm:$0xf] }
 0x148   : > { %v888_v27 = vpop.f32.mrf.mxu1  ;;  %v1682_v40 = vpop.f32.mrf.mxu0 }
 0x149   : > { %v1600_v10 = vpop.f32.mrf.mxu3  ;;  %v889_v14 = vadd.f32 %v888_v27, %v4618_v12  ;;  %v974_v42 = vpop.f32.mrf.mxu2  ;;  %v3779_v27 = vld [vmem:[%s4339_s12 + $0x54] sm:$0xf0] }
 0x14a   : > { %v4803_v19 = vadd.f32 %v1679_v55, %v1600_v10  ;;  %v3790_v55 = vor.u32 %v4168_v49, %v3789_v31  ;;  %v3785_v10 = vld [vmem:[%s4339_s12 + $0x50] sm:$0xf] }
 0x14b   : > { %v4811_v52 = vadd.f32 %v967_v59, %v889_v14  ;;  %1730 = vmatmul.bf16.vlgmr.msra.gmra.mxu1 %v3462_v22  ;;  %2524 = vmatmul.bf16.vlgmr.msra.gmra.mxu0 %v3774_v25  ;;  %v4166_v22 = vld [vmem:[%s4339_s12 + $0x58] sm:$0xf0]  ;;  %v4164_v25 = vld [vmem:[%s4339_s12 + $0x4c] sm:$0xf] }
 0x14c   : > { %v3786_v31 = vor.u32 %v4166_v22, %v3785_v10  ;;  %v3782_v45 = vor.u32 %v4164_v25, %v3779_v27  ;;  %v3485_v27 = vld [vmem:[%s4339_s12 + $0x50] sm:$0xf] }
 0x14e   : > { %2445 = vmatmul.bf16.vlgmr.msra.gmra.mxu3 %v3770_v0  ;;  %2376 = vmatmul.bf16.gmra.mxu2 %v3790_v55  ;;  %v3474_v0 = vor.u32 %v4100_v62, %v3473_v9  ;;  %v3801_v55 = vld [vmem:[%s4339_s12 + $0x78] sm:$0xf] }
 0x150   : > { %v890_v34 = vpop.f32.mrf.mxu1  ;;  %v1684_v26 = vpop.f32.mrf.mxu0 }
 0x151   : > { %v1603_v33 = vpop.f32.mrf.mxu3  ;;  %v891_v4 = vadd.f32 %v890_v34, %v4628_v20  ;;  %v977_v59 = vpop.f32.mrf.mxu2 }
 0x152   : > { %v4813_v12 = vadd.f32 %v1682_v40, %v1603_v33  ;;  %v4171_v33 = vld [vmem:[%s4339_s12 + $0x80] sm:$0xf0] }
 0x153   : > { %v4819_v7 = vadd.f32 %v969_v61, %v891_v4  ;;  %v2710_v4 = vld [vmem:[%s5210_s2 + $0x18] sm:$0xff] }
 0x154   : > { %2752 = vperm.xlu1 %4263, %v2710_v4  }
 0x158   : > { %v893_v49 = vpop.f32.mrf.mxu1  ;;  %v1687_v14 = vpop.f32.mrf.mxu0 }
 0x159   : > { %v1605_v40 = vpop.f32.mrf.mxu3  ;;  %v894_v61 = vadd.f32 %v893_v49, %v4641_v35  ;;  %v979_v34 = vpop.f32.mrf.mxu2  ;;  %v4167_v49 = vld [vmem:[%s4339_s12 + $0x64] sm:$0xf] }
 0x15a   : > { %v4827_v20 = vadd.f32 %v1684_v26, %v1605_v40  ;;  %v3802_v26 = vor.u32 %v4171_v33, %v3801_v55  ;;  %v4103_v40 = vld [vmem:[%s4339_s12 + $0x58] sm:$0xf0] }
 0x15b   : > { %v4835_v54 = vadd.f32 %v972_v11, %v894_v61  ;;  %1735 = vmatmul.bf16.gmra.mxu1 %v3474_v0  ;;  %2529 = vmatmul.bf16.gmra.mxu0 %v3786_v31  ;;  %v3797_v0 = vld [vmem:[%s4339_s12 + $0x68] sm:$0xf]  ;;  %v4169_v31 = vld [vmem:[%s4339_s12 + $0x70] sm:$0xf0]  ;;  %v3486_v33 = vor.u32 %v4103_v40, %v3485_v27 }
 0x15c   : > { %v3798_v61 = vor.u32 %v4169_v31, %v3797_v0 }
 0x15d   : > { %5214 = vst [vmem:[#allocation3_spill] sm:$0xff] %v4835_v54 }
 0x15e   : > { %2450 = vmatmul.bf16.gmra.mxu3 %v3782_v45  ;;  %2381 = vmatmul.bf16.gmra.mxu2 %v3802_v26  ;;  %v3791_v45 = vld [vmem:[%s4339_s12 + $0x6c] sm:$0xf0] }
 0x160   : > { %v895_v62 = vpop.f32.mrf.mxu1  ;;  %v1689_v10 = vpop.f32.mrf.mxu0 }
 0x161   : > { %v1608_v9 = vpop.f32.mrf.mxu3  ;;  %v896_v22 = vadd.f32 %v895_v62, %v4657_v50  ;;  %v982_v11 = vpop.f32.mrf.mxu2  ;;  %v3813_v50 = vld [vmem:[%s4339_s12 + $0x90] sm:$0xf]  ;;  %v4174_v62 = vld [vmem:[%s4339_s12 + $0x98] sm:$0xf0] }
 0x162   : > { %v4837_v35 = vadd.f32 %v1687_v14, %v1608_v9  ;;  %v3794_v9 = vor.u32 %v4167_v49, %v3791_v45  ;;  %v3814_v27 = vor.u32 %v4174_v62, %v3813_v50  ;;  %v3497_v45 = vld [vmem:[%s4339_s12 + $0x68] sm:$0xf] }
 0x163   : > { %v4840_v25 = vadd.f32 %v974_v42, %v896_v22 }
 0x168   : > { %v898_v4 = vpop.f32.mrf.mxu1  ;;  %v1692_v26 = vpop.f32.mrf.mxu0 }
 0x169   : > { %v1610_v55 = vpop.f32.mrf.mxu3  ;;  %v899_v54 = vadd.f32 %v898_v4, %v4570_v41  ;;  %v984_v42 = vpop.f32.mrf.mxu2  ;;  %v4170_v4 = vld [vmem:[%s4339_s12 + $0x7c] sm:$0xf] }
 0x16a   : > { %v4848_v14 = vadd.f32 %v1689_v10, %v1610_v55  ;;  %v4106_v55 = vld [vmem:[%s4339_s12 + $0x70] sm:$0xf0] }
 0x16b   : > { %v4853_v22 = vadd.f32 %v977_v59, %v899_v54  ;;  %1740 = vmatmul.bf16.gmra.mxu1 %v3486_v33  ;;  %2534 = vmatmul.bf16.gmra.mxu0 %v3798_v61  ;;  %v2713_v59 = vld [vmem:[%s5210_s2 + $0x30] sm:$0xff]  ;;  %v3809_v33 = vld [vmem:[%s4339_s12 + $0x80] sm:$0xf]  ;;  %v4172_v61 = vld [vmem:[%s4339_s12 + $0x88] sm:$0xf0]  ;;  %v3498_v50 = vor.u32 %v4106_v55, %v3497_v45 }
 0x16c   : > { %2767 = vperm.xlu0 %4262, %v2713_v59   ;;  %v3810_v62 = vor.u32 %v4172_v61, %v3809_v33  ;;  %v2711_v59 = vld [vmem:[%s5210_s2 + $0x20] sm:$0xff] }
 0x16d   : > { %5215 = vst [vmem:[#allocation4_spill] sm:$0xff] %v4853_v22  ;;  %v3825_v22 = vld [vmem:[%s4339_s12 + $0xa8] sm:$0xf]  ;;  %2757 = vperm.xlu2 %4264, %v2711_v59  }
 0x16e   : > { %2455 = vmatmul.bf16.gmra.mxu3 %v3794_v9  ;;  %2386 = vmatmul.bf16.gmra.mxu2 %v3814_v27 }
 0x170   : > { %v900_v0 = vpop.f32.mrf.mxu1  ;;  %v1694_v31 = vpop.f32.mrf.mxu0 }
 0x171   : > { %v1613_v10 = vpop.f32.mrf.mxu3  ;;  %v901_v41 = vadd.f32 %v900_v0, %v4586_v56  ;;  %v987_v49 = vpop.f32.mrf.mxu2 }
 0x172   : > { %v4855_v40 = vadd.f32 %v1692_v26, %v1613_v10  ;;  %v3803_v26 = vld [vmem:[%s4339_s12 + $0x84] sm:$0xf0] }
 0x173   : > { %v4861_v54 = vadd.f32 %v979_v34, %v901_v41  ;;  %v3806_v0 = vor.u32 %v4170_v4, %v3803_v26  ;;  %v2712_v26 = vld [vmem:[%s5210_s2 + $0x28] sm:$0xff] }
 0x174   : > { %5216 = vst [vmem:[#allocation5_spill] sm:$0xff] %v4855_v40  ;;  %v4177_v40 = vld [vmem:[%s4339_s12 + $0xb0] sm:$0xf0] }
 0x175   : > { %5217 = vst [vmem:[#allocation6_spill] sm:$0xff] %v4861_v54  ;;  %v2714_v54 = vld [vmem:[%s5210_s2 + $0x38] sm:$0xff]  ;;  %2762 = vperm.xlu2 %4264, %v2712_v26  }
 0x176   : > { %2772 = vperm.xlu1 %4263, %v2714_v54   ;;  %v4109_v54 = vld [vmem:[%s4339_s12 + $0x88] sm:$0xf0] }
 0x178   : > { %v903_v27 = vpop.f32.mrf.mxu1  ;;  %v1697_v10 = vpop.f32.mrf.mxu0 }
 0x179   : > { %v1615_v9 = vpop.f32.mrf.mxu3  ;;  %v904_v34 = vadd.f32 %v903_v27, %v4606_v1  ;;  %v989_v41 = vpop.f32.mrf.mxu2  ;;  %v3815_v27 = vld [vmem:[%s4339_s12 + $0x9c] sm:$0xf0] }
 0x17a   : > { %v4869_v56 = vadd.f32 %v1694_v31, %v1615_v9  ;;  %v3826_v31 = vor.u32 %v4177_v40, %v3825_v22  ;;  %v3509_v40 = vld [vmem:[%s4339_s12 + $0x80] sm:$0xf]  ;;  %v3821_v9 = vld [vmem:[%s4339_s12 + $0x98] sm:$0xf] }
 0x17b   : > { %v4880_v45 = vadd.f32 %v982_v11, %v904_v34  ;;  %1745 = vmatmul.bf16.gmra.mxu1 %v3498_v50  ;;  %2539 = vmatmul.bf16.gmra.mxu0 %v3810_v62  ;;  %v4175_v50 = vld [vmem:[%s4339_s12 + $0xa0] sm:$0xf0]  ;;  %v4173_v62 = vld [vmem:[%s4339_s12 + $0x94] sm:$0xf] }
 0x17c   : > { %v3822_v34 = vor.u32 %v4175_v50, %v3821_v9 }
 0x17d   : > { %5218 = vst [vmem:[#allocation7_spill] sm:$0xff] %v4880_v45  ;;  %v4180_v45 = vld [vmem:[%s4339_s12 + $0xc8] sm:$0xf0] }
 0x17e   : > { %2460 = vmatmul.bf16.gmra.mxu3 %v3806_v0  ;;  %2391 = vmatmul.bf16.gmra.mxu2 %v3826_v31  ;;  %v3510_v0 = vor.u32 %v4109_v54, %v3509_v40 }
 0x180   : > { %v905_v33 = vpop.f32.mrf.mxu1  ;;  %v1699_v61 = vpop.f32.mrf.mxu0 }
 0x181   : > { %v1618_v1 = vpop.f32.mrf.mxu3  ;;  %v906_v11 = vadd.f32 %v905_v33, %v4622_v16  ;;  %v992_v4 = vpop.f32.mrf.mxu2  ;;  %v3837_v33 = vld [vmem:[%s4339_s12 + $0xc0] sm:$0xf] }
 0x182   : > { %v4882_v55 = vadd.f32 %v1697_v10, %v1618_v1  ;;  %v3818_v1 = vor.u32 %v4173_v62, %v3815_v27  ;;  %v2717_v62 = vld [vmem:[%s5210_s2 + $0x50] sm:$0xff]  ;;  %v3521_v27 = vld [vmem:[%s4339_s12 + $0x98] sm:$0xf] }
 0x183   : > { %v4888_v22 = vadd.f32 %v984_v42, %v906_v11  ;;  %2787 = vperm.xlu1 %4263, %v2717_v62   ;;  %v2715_v62 = vld [vmem:[%s5210_s2 + $0x40] sm:$0xff] }
 0x184   : > { %2777 = vperm.xlu2 %4264, %v2715_v62  }
 0x185   : > { %5219 = vst [vmem:[#allocation8_spill] sm:$0xff] %v4888_v22  ;;  %v2716_v22 = vld [vmem:[%s5210_s2 + $0x48] sm:$0xff] }
 0x186   : > { %2782 = vperm.xlu0 %4262, %v2716_v22   ;;  %v4112_v22 = vld [vmem:[%s4339_s12 + $0xa0] sm:$0xf0] }
 0x188   : > { %v908_v59 = vpop.f32.mrf.mxu1  ;;  %v1702_v31 = vpop.f32.mrf.mxu0 }
 0x189   : > { %v1620_v10 = vpop.f32.mrf.mxu3  ;;  %v909_v42 = vadd.f32 %v908_v59, %v4564_v38  ;;  %v994_v11 = vpop.f32.mrf.mxu2  ;;  %v3827_v59 = vld [vmem:[%s4339_s12 + $0xb4] sm:$0xf0] }
 0x18a   : > { %v4896_v16 = vadd.f32 %v1699_v61, %v1620_v10  ;;  %v3838_v61 = vor.u32 %v4180_v45, %v3837_v33  ;;  %v3833_v10 = vld [vmem:[%s4339_s12 + $0xb0] sm:$0xf] }
 0x18b   : > { %v4904_v26 = vadd.f32 %v987_v49, %v909_v42  ;;  %1750 = vmatmul.bf16.gmra.mxu1 %v3510_v0  ;;  %2544 = vmatmul.bf16.gmra.mxu0 %v3822_v34  ;;  %v4178_v0 = vld [vmem:[%s4339_s12 + $0xb8] sm:$0xf0]  ;;  %v4176_v34 = vld [vmem:[%s4339_s12 + $0xac] sm:$0xf] }
 0x18c   : > { %v3834_v33 = vor.u32 %v4178_v0, %v3833_v10 }
 0x18d   : > { %5220 = vst [vmem:[#allocation9_spill] sm:$0xff] %v4904_v26  ;;  %v4183_v26 = vld [vmem:[%s4339_s12 + $0xe0] sm:$0xf0] }
 0x18e   : > { %2465 = vmatmul.bf16.gmra.mxu3 %v3818_v1  ;;  %2396 = vmatmul.bf16.gmra.mxu2 %v3838_v61  ;;  %v3522_v1 = vor.u32 %v4112_v22, %v3521_v27 }
 0x190   : > { %v910_v54 = vpop.f32.mrf.mxu1  ;;  %v1704_v9 = vpop.f32.mrf.mxu0 }
 0x191   : > { %v1623_v40 = vpop.f32.mrf.mxu3  ;;  %v911_v50 = vadd.f32 %v910_v54, %v4578_v48  ;;  %v997_v49 = vpop.f32.mrf.mxu2  ;;  %v3849_v54 = vld [vmem:[%s4339_s12 + $0xd8] sm:$0xf] }
 0x192   : > { %v4906_v38 = vadd.f32 %v1702_v31, %v1623_v40  ;;  %v3830_v40 = vor.u32 %v4176_v34, %v3827_v59  ;;  %v2719_v34 = vld [vmem:[%s5210_s2 + $0x60] sm:$0xff]  ;;  %v3533_v59 = vld [vmem:[%s4339_s12 + $0xb0] sm:$0xf] }
 0x193   : > { %v4912_v45 = vadd.f32 %v989_v41, %v911_v50  ;;  %2797 = vperm.xlu0 %4262, %v2719_v34   ;;  %v2720_v34 = vld [vmem:[%s5210_s2 + $0x68] sm:$0xff] }
 0x194   : > { %2802 = vperm.xlu1 %4263, %v2720_v34  }
 0x195   : > { %5221 = vst [vmem:[#allocation10_spill] sm:$0xff] %v4912_v45 }
 0x198   : > { %v913_v42 = vpop.f32.mrf.mxu1  ;;  %v1707_v61 = vpop.f32.mrf.mxu0 }
 0x199   : > { %v1625_v31 = vpop.f32.mrf.mxu3  ;;  %v914_v41 = vadd.f32 %v913_v42, %v4594_v60  ;;  %v999_v50 = vpop.f32.mrf.mxu2  ;;  %v4179_v42 = vld [vmem:[%s4339_s12 + $0xc4] sm:$0xf] }
 0x19a   : > { %v4920_v48 = vadd.f32 %v1704_v9, %v1625_v31  ;;  %v3850_v9 = vor.u32 %v4183_v26, %v3849_v54  ;;  %v4115_v31 = vld [vmem:[%s4339_s12 + $0xb8] sm:$0xf0] }
 0x19b   : > { %v4928_v45 = vadd.f32 %v992_v4, %v914_v41  ;;  %1755 = vmatmul.bf16.gmra.mxu1 %v3522_v1  ;;  %2549 = vmatmul.bf16.gmra.mxu0 %v3834_v33  ;;  %v3845_v1 = vld [vmem:[%s4339_s12 + $0xc8] sm:$0xf]  ;;  %v4181_v33 = vld [vmem:[%s4339_s12 + $0xd0] sm:$0xf0]  ;;  %v3534_v54 = vor.u32 %v4115_v31, %v3533_v59 }
 0x19c   : > { %v3846_v41 = vor.u32 %v4181_v33, %v3845_v1 }
 0x19d   : > { %5222 = vst [vmem:[#allocation11_spill] sm:$0xff] %v4928_v45  ;;  %v4186_v45 = vld [vmem:[%s4339_s12 + $0xf8] sm:$0xf0] }
 0x19e   : > { %2470 = vmatmul.bf16.gmra.mxu3 %v3830_v40  ;;  %2401 = vmatmul.bf16.gmra.mxu2 %v3850_v9 }
 0x1a0   : > { %v915_v22 = vpop.f32.mrf.mxu1  ;;  %v1709_v10 = vpop.f32.mrf.mxu0 }
 0x1a1   : > { %v1628_v27 = vpop.f32.mrf.mxu3  ;;  %v916_v0 = vadd.f32 %v915_v22, %v4614_v8  ;;  %v1002_v4 = vpop.f32.mrf.mxu2  ;;  %v3861_v22 = vld [vmem:[%s4339_s12 + $0xf0] sm:$0xf] }
 0x1a2   : > { %v4930_v60 = vadd.f32 %v1707_v61, %v1628_v27  ;;  %v3839_v61 = vld [vmem:[%s4339_s12 + $0xcc] sm:$0xf0] }
 0x1a3   : > { %v4936_v26 = vadd.f32 %v994_v11, %v916_v0  ;;  %v3842_v27 = vor.u32 %v4179_v42, %v3839_v61  ;;  %v2718_v42 = vld [vmem:[%s5210_s2 + $0x58] sm:$0xff]  ;;  %v3545_v61 = vld [vmem:[%s4339_s12 + $0xc8] sm:$0xf] }
 0x1a4   : > { %2792 = vperm.xlu2 %4264, %v2718_v42  }
 0x1a5   : > { %5223 = vst [vmem:[#allocation12_spill] sm:$0xff] %v4936_v26 }
 0x1a8   : > { %v918_v62 = vpop.f32.mrf.mxu1  ;;  %v1712_v9 = vpop.f32.mrf.mxu0 }
 0x1a9   : > { %v1630_v40 = vpop.f32.mrf.mxu3  ;;  %v919_v11 = vadd.f32 %v918_v62, %v4624_v18  ;;  %v1004_v0 = vpop.f32.mrf.mxu2  ;;  %v2722_v62 = vld [vmem:[%s5210_s2 + $0x78] sm:$0xff] }
 0x1aa   : > { %v4944_v8 = vadd.f32 %v1709_v10, %v1630_v40  ;;  %v3862_v10 = vor.u32 %v4186_v45, %v3861_v22  ;;  %v4118_v40 = vld [vmem:[%s4339_s12 + $0xd0] sm:$0xf0]  ;;  %2812 = vperm.xlu0 %4262, %v2722_v62  }
 0x1ab   : > { %v4952_v26 = vadd.f32 %v997_v49, %v919_v11  ;;  %1760 = vmatmul.bf16.gmra.mxu1 %v3534_v54  ;;  %2554 = vmatmul.bf16.gmra.mxu0 %v3846_v41  ;;  %v3857_v54 = vld [vmem:[%s4339_s12 + $0xe0] sm:$0xf]  ;;  %v4184_v41 = vld [vmem:[%s4339_s12 + $0xe8] sm:$0xf0]  ;;  %v3546_v22 = vor.u32 %v4118_v40, %v3545_v61 }
 0x1ac   : > { %v3858_v11 = vor.u32 %v4184_v41, %v3857_v54  ;;  %v2723_v54 = vld [vmem:[%s5210_s2 + $0x80] sm:$0xff] }
 0x1ad   : > { %5224 = vst [vmem:[#allocation13_spill] sm:$0xff] %v4952_v26  ;;  %2817 = vperm.xlu1 %4263, %v2723_v54   ;;  %v4192_v54 = vld [vmem:[%s4339_s12 + $0x128] sm:$0xf0] }
 0x1ae   : > { %2475 = vmatmul.bf16.gmra.mxu3 %v3842_v27  ;;  %2406 = vmatmul.bf16.gmra.mxu2 %v3862_v10 }
 0x1b0   : > { %v920_v31 = vpop.f32.mrf.mxu1  ;;  %v1714_v1 = vpop.f32.mrf.mxu0 }
 0x1b1   : > { %v1633_v59 = vpop.f32.mrf.mxu3  ;;  %v921_v33 = vadd.f32 %v920_v31, %v4636_v28  ;;  %v4957_v49 = vpop.f32.mrf.mxu2  ;;  %v4182_v28 = vld [vmem:[%s4339_s12 + $0xdc] sm:$0xf]  ;;  %v3873_v31 = vld [vmem:[%s4339_s12 + $0x108] sm:$0xf] }
 0x1b2   : > { %v4954_v18 = vadd.f32 %v1712_v9, %v1633_v59  ;;  %v3851_v9 = vld [vmem:[%s4339_s12 + $0xe4] sm:$0xf0] }
 0x1b3   : > { %v4962_v45 = vadd.f32 %v999_v50, %v921_v33  ;;  %v3854_v59 = vor.u32 %v4182_v28, %v3851_v9  ;;  %v4189_v33 = vld [vmem:[%s4339_s12 + $0x110] sm:$0xf0] }
 0x1b4   : > { %v3874_v62 = vor.u32 %v4189_v33, %v3873_v31  ;;  %v3863_v31 = vld [vmem:[%s4339_s12 + $0xfc] sm:$0xf0] }
 0x1b5   : > { %5225 = vst [vmem:[#allocation14_spill] sm:$0xff] %v4962_v45 }
 0x1b8   : > { %v923_v50 = vpop.f32.mrf.mxu1  ;;  %v1717_v10 = vpop.f32.mrf.mxu0 }
 0x1b9   : > { %v1635_v27 = vpop.f32.mrf.mxu3  ;;  %v924_v42 = vadd.f32 %v923_v50, %v4653_v47  ;;  %v4978_v45 = vpop.f32.mrf.mxu2  ;;  %v4187_v50 = vld [vmem:[%s4339_s12 + $0x100] sm:$0xf0] }
 0x1ba   : > { %v4973_v34 = vadd.f32 %v1714_v1, %v1635_v27  ;;  %v2725_v1 = vld [vmem:[%s5210_s2 + $0x90] sm:$0xff]  ;;  %v3557_v27 = vld [vmem:[%s4339_s12 + $0xe0] sm:$0xf] }
 0x1bb   : > { %v4980_v26 = vadd.f32 %v1002_v4, %v924_v42  ;;  %1765 = vmatmul.bf16.gmra.mxu1 %v3546_v22  ;;  %2559 = vmatmul.bf16.gmra.mxu0 %v3858_v11  ;;  %v4121_v22 = vld [vmem:[%s4339_s12 + $0xe8] sm:$0xf0]  ;;  %v3869_v11 = vld [vmem:[%s4339_s12 + $0xf8] sm:$0xf] }
 0x1bc   : > { %5226 = vst [vmem:[#allocation15_spill] sm:$0xff] %v4973_v34  ;;  %2827 = vperm.xlu0 %4262, %v2725_v1   ;;  %v3870_v42 = vor.u32 %v4187_v50, %v3869_v11  ;;  %v2731_v11 = vld [vmem:[%s5210_s2 + $0xc0] sm:$0xff] }
 0x1bd   : > { %5227 = vst [vmem:[#allocation16_spill] sm:$0xff] %v4980_v26 }
 0x1be   : > { %2480 = vmatmul.bf16.gmra.mxu3 %v3854_v59  ;;  %2411 = vmatmul.bf16.gmra.mxu2 %v3874_v62  ;;  %v4185_v59 = vld [vmem:[%s4339_s12 + $0xf4] sm:$0xf] }
 0x1c0   : > { %v925_v4 = vpop.f32.mrf.mxu1  ;;  %v1719_v40 = vpop.f32.mrf.mxu0 }
 0x1c1   : > { %v1638_v61 = vpop.f32.mrf.mxu3  ;;  %v926_v41 = vadd.f32 %v925_v4, %v4668_v2  ;;  %v4991_v28 = vpop.f32.mrf.mxu2  ;;  %v3558_v2 = vor.u32 %v4121_v22, %v3557_v27  ;;  %v3885_v4 = vld [vmem:[%s4339_s12 + $0x120] sm:$0xf] }
 0x1c2   : > { %v4985_v47 = vadd.f32 %v1717_v10, %v1638_v61  ;;  %v2728_v10 = vld [vmem:[%s5210_s2 + $0xa8] sm:$0xff]  ;;  %v3866_v61 = vor.u32 %v4185_v59, %v3863_v31  ;;  %v3886_v22 = vor.u32 %v4192_v54, %v3885_v4  ;;  %v2738_v31 = vpop.permute.xlu0 %2737  ;;  %v3881_v4 = vld [vmem:[%s4339_s12 + $0x110] sm:$0xf] }
 0x1c3   : > { %v4993_v9 = vadd.f32 %v1004_v0, %v926_v41  ;;  %v2726_v41 = vld [vmem:[%s5210_s2 + $0x98] sm:$0xff]  ;;  %v4188_v54 = vld [vmem:[%s4339_s12 + $0x10c] sm:$0xf] }
 0x1c4   : > { %5228 = vst [vmem:[#allocation17_spill] sm:$0xff] %v4985_v47  ;;  %2842 = vperm.xlu0 %4262, %v2728_v10   ;;  %2832 = vperm.xlu1 %4263, %v2726_v41   ;;  %v2729_v10 = vld [vmem:[%s5210_s2 + $0xb0] sm:$0xff]  ;;  %v3875_v41 = vld [vmem:[%s4339_s12 + $0x114] sm:$0xf0] }
 0x1c5   : > { %5229 = vst [vmem:[#allocation18_spill] sm:$0xff] %v4993_v9 }
 0x1c8   : > { %v1731_v0 = vpop.f32.mrf.mxu1  ;;  %v2525_v1 = vpop.f32.mrf.mxu0 }
 0x1c9   : > { %v1640_v33 = vpop.f32.mrf.mxu3  ;;  %v1732_v9 = vadd.f32 %v1731_v0, %v4675_v23  ;;  %v5012_v26 = vpop.f32.mrf.mxu2  ;;  %v4124_v0 = vld [vmem:[%s4339_s12 + $0x100] sm:$0xf0] }
 0x1ca   : > { %v5004_v62 = vadd.f32 %v1719_v40, %v1640_v33  ;;  %v2721_v40 = vld [vmem:[%s5210_s2 + $0x70] sm:$0xff] }
 0x1cb   : > { %v1801_v27 = vadd.f32 %v1732_v9, %v4673_v15  ;;  %1770 = vmatmul.bf16.gmra.mxu1 %v3558_v2  ;;  %2564 = vmatmul.bf16.gmra.mxu0 %v3870_v42  ;;  %v3569_v42 = vld [vmem:[%s4339_s12 + $0xf8] sm:$0xf] }
 0x1cc   : > { %5230 = vst [vmem:[#allocation19_spill] sm:$0xff] %v5004_v62  ;;  %2807 = vperm.xlu2 %4264, %v2721_v40   ;;  %2857 = vperm.xlu0 %4262, %v2731_v11  }
 0x1cd   : > { %2847 = vperm.xlu1 %4263, %v2729_v10   ;;  %v4195_v10 = vld [vmem:[%s4339_s12 + $0x140] sm:$0xf0] }
 0x1ce   : > { %2485 = vmatmul.bf16.gmra.mxu3 %v3866_v61  ;;  %2416 = vmatmul.bf16.gmra.mxu2 %v3886_v22  ;;  %v3570_v22 = vor.u32 %v4124_v0, %v3569_v42  ;;  %v2743_v0 = vpop.permute.xlu0 %2742 }
 0x1d0   : > { %v1733_v15 = vpop.f32.mrf.mxu1  ;;  %v2527_v9 = vpop.f32.mrf.mxu0 }
 0x1d1   : > { %v2446_v23 = vpop.f32.mrf.mxu3  ;;  %v1734_v59 = vadd.f32 %v1733_v15, %v4692_v46  ;;  %v5027_v2 = vpop.f32.mrf.mxu2  ;;  %v4190_v46 = vld [vmem:[%s4339_s12 + $0x118] sm:$0xf0]  ;;  %v3878_v15 = vor.u32 %v4188_v54, %v3875_v41 }
 0x1d2   : > { %v2447_v50 = vadd.f32 %v2446_v23, %v4957_v49  ;;  %v3882_v11 = vor.u32 %v4190_v46, %v3881_v4 }
 0x1d3   : > { %v1802_v49 = vadd.f32 %v1734_v59, %v4678_v21  ;;  %v2732_v59 = vld [vmem:[%s5210_s2 + $0xc8] sm:$0xff] }
 0x1d4   : > { %v2526_v33 = vadd.f32 %v2525_v1, %v2447_v50  ;;  %v2734_v1 = vld [vmem:[%s5210_s2 + $0xd8] sm:$0xff] }
 0x1d5   : > { %2872 = vperm.xlu0 %4262, %v2734_v1   ;;  %2862 = vperm.xlu1 %4263, %v2732_v59  }
 0x1d6   : > { %v2595_v61 = vadd.f32 %v2526_v33, %v1801_v27  ;;  %v3897_v27 = vld [vmem:[%s4339_s12 + $0x138] sm:$0xf] }
 0x1d7   : > { %v3898_v4 = vor.u32 %v4195_v10, %v3897_v27 }
 0x1d8   : > { %2679 = vst [vmem:[%s5032_s14] sm:$0xff] %v2595_v61  ;;  %v1736_v23 = vpop.f32.mrf.mxu1  ;;  %v2530_v50 = vpop.f32.mrf.mxu0  ;;  %v2937_v46 = vmul.f32 %v2595_v61, %v2595_v61  ;;  %v2875_v41 = vmul.f32 %v2738_v31, %v2595_v61 }
 0x1d9   : > { %v2448_v40 = vpop.f32.mrf.mxu3  ;;  %v1737_v33 = vadd.f32 %v1736_v23, %v4705_v6  ;;  %v5052_v62 = vpop.f32.mrf.mxu2 }
 0x1da   : > { %v2449_v21 = vadd.f32 %v2448_v40, %v4978_v45  ;;  %v2724_v45 = vld [vmem:[%s5210_s2 + $0x88] sm:$0xff] }
 0x1db   : > { %v1803_v42 = vadd.f32 %v1737_v33, %v4697_v3  ;;  %1775 = vmatmul.bf16.gmra.mxu1 %v3570_v22  ;;  %2569 = vmatmul.bf16.gmra.mxu0 %v3882_v11 }
 0x1dc   : > { %v2528_v1 = vadd.f32 %v2527_v9, %v2449_v21  ;;  %2822 = vperm.xlu2 %4264, %v2724_v45   ;;  %v2965_v21 = vmul.f32 %v2937_v46, %v2738_v31  ;;  %v2727_v31 = vld [vmem:[%s5210_s2 + $0xa0] sm:$0xff]  ;;  %v4127_v45 = vld [vmem:[%s4339_s12 + $0x118] sm:$0xf0]  ;;  %v3887_v46 = vld [vmem:[%s4339_s12 + $0x12c] sm:$0xf0] }
 0x1de   : > { %v2596_v54 = vadd.f32 %v2528_v1, %v1802_v49  ;;  %2490 = vmatmul.bf16.gmra.mxu3 %v3878_v15  ;;  %2421 = vmatmul.bf16.gmra.mxu2 %v3898_v4  ;;  %v2748_v15 = vpop.permute.xlu1 %2747  ;;  %v3581_v1 = vld [vmem:[%s4339_s12 + $0x110] sm:$0xf]  ;;  %v4193_v4 = vld [vmem:[%s4339_s12 + $0x130] sm:$0xf0] }
 0x1e0   : > { %2680 = vst [vmem:[%s5032_s14 + $0x8] sm:$0xff] %v2596_v54  ;;  %v2876_v6 = vmul.f32 %v2743_v0, %v2596_v54  ;;  %v2938_v9 = vmul.f32 %v2596_v54, %v2596_v54  ;;  %v1738_v11 = vpop.f32.mrf.mxu1  ;;  %v2532_v49 = vpop.f32.mrf.mxu0 }
 0x1e1   : > { %v2451_v40 = vpop.f32.mrf.mxu3  ;;  %v1739_v61 = vadd.f32 %v1738_v11, %v4716_v37  ;;  %v5061_v59 = vpop.f32.mrf.mxu2  ;;  %v4191_v37 = vld [vmem:[%s4339_s12 + $0x124] sm:$0xf]  ;;  %v3909_v11 = vld [vmem:[%s4339_s12 + $0x150] sm:$0xf] }
 0x1e2   : > { %v2903_v23 = vadd.f32 %v2876_v6, %v2875_v41  ;;  %v2966_v3 = vmul.f32 %v2938_v9, %v2743_v0  ;;  %v2452_v22 = vadd.f32 %v2451_v40, %v4991_v28  ;;  %v3893_v0 = vld [vmem:[%s4339_s12 + $0x128] sm:$0xf]  ;;  %v3582_v6 = vor.u32 %v4127_v45, %v3581_v1  ;;  %v2730_v1 = vld [vmem:[%s5210_s2 + $0xb8] sm:$0xff] }
 0x1e3   : > { %v1804_v33 = vadd.f32 %v1739_v61, %v4708_v17  ;;  %v3894_v9 = vor.u32 %v4193_v4, %v3893_v0  ;;  %v4198_v61 = vld [vmem:[%s4339_s12 + $0x158] sm:$0xf0] }
 0x1e4   : > { %v2993_v27 = vadd.f32 %v2966_v3, %v2965_v21  ;;  %v2531_v10 = vadd.f32 %v2530_v50, %v2452_v22  ;;  %2837 = vperm.xlu2 %4264, %v2727_v31   ;;  %v3890_v22 = vor.u32 %v4191_v37, %v3887_v46 }
 0x1e6   : > { %v2597_v28 = vadd.f32 %v2531_v10, %v1803_v42 }
 0x1e8   : > { %2681 = vst [vmem:[%s5032_s14 + $0x10] sm:$0xff] %v2597_v28  ;;  %v2877_v50 = vmul.f32 %v2748_v15, %v2597_v28  ;;  %v2939_v54 = vmul.f32 %v2597_v28, %v2597_v28  ;;  %v1741_v3 = vpop.f32.mrf.mxu1  ;;  %v2535_v42 = vpop.f32.mrf.mxu0 }
 0x1e9   : > { %v2453_v41 = vpop.f32.mrf.mxu3  ;;  %v1742_v10 = vadd.f32 %v1741_v3, %v4723_v58  ;;  %v5078_v34 = vpop.f32.mrf.mxu2  ;;  %v3899_v3 = vld [vmem:[%s4339_s12 + $0x144] sm:$0xf0] }
 0x1ea   : > { %v2904_v40 = vadd.f32 %v2903_v23, %v2877_v50  ;;  %v2967_v21 = vmul.f32 %v2939_v54, %v2748_v15  ;;  %v2454_v17 = vadd.f32 %v2453_v41, %v5012_v26  ;;  %v2753_v26 = vpop.permute.xlu1 %2752  ;;  %v3910_v15 = vor.u32 %v4198_v61, %v3909_v11  ;;  %v2733_v41 = vld [vmem:[%s5210_s2 + $0xd0] sm:$0xff] }
 0x1eb   : > { %v1805_v23 = vadd.f32 %v1742_v10, %v4721_v53  ;;  %1780 = vmatmul.bf16.gmra.mxu1 %v3582_v6  ;;  %2574 = vmatmul.bf16.gmra.mxu0 %v3894_v9  ;;  %v3593_v9 = vld [vmem:[%s4339_s12 + $0x128] sm:$0xf] }
 0x1ec   : > { %v2994_v31 = vadd.f32 %v2993_v27, %v2967_v21  ;;  %v2533_v47 = vadd.f32 %v2532_v49, %v2454_v17  ;;  %2852 = vperm.xlu2 %4264, %v2730_v1   ;;  %v3905_v21 = vld [vmem:[%s4339_s12 + $0x140] sm:$0xf]  ;;  %v4196_v17 = vld [vmem:[%s4339_s12 + $0x148] sm:$0xf0] }
 0x1ed   : > { %v3906_v10 = vor.u32 %v4196_v17, %v3905_v21 }
 0x1ee   : > { %v2598_v28 = vadd.f32 %v2533_v47, %v1804_v33  ;;  %2495 = vmatmul.bf16.gmra.mxu3 %v3890_v22  ;;  %2426 = vmatmul.bf16.gmra.mxu2 %v3910_v15  ;;  %v2758_v33 = vpop.permute.xlu2 %2757 }
 0x1f0   : > { %2682 = vst [vmem:[%s5032_s14 + $0x18] sm:$0xff] %v2598_v28  ;;  %v2878_v45 = vmul.f32 %v2753_v26, %v2598_v28  ;;  %v2940_v58 = vmul.f32 %v2598_v28, %v2598_v28  ;;  %v1743_v4 = vpop.f32.mrf.mxu1  ;;  %v2537_v37 = vpop.f32.mrf.mxu0  ;;  %v3921_v28 = vld [vmem:[%s4339_s12 + $0x168] sm:$0xf] }
 0x1f1   : > { %v2456_v49 = vpop.f32.mrf.mxu3  ;;  %v1744_v47 = vadd.f32 %v1743_v4, %v4743_v29  ;;  %v5087_v54 = vpop.f32.mrf.mxu2  ;;  %v4194_v29 = vld [vmem:[%s4339_s12 + $0x13c] sm:$0xf] }
 0x1f2   : > { %v2905_v27 = vadd.f32 %v2904_v40, %v2878_v45  ;;  %v2968_v0 = vmul.f32 %v2940_v58, %v2753_v26  ;;  %v2457_v53 = vadd.f32 %v2456_v49, %v5027_v2  ;;  %v4130_v40 = vld [vmem:[%s4339_s12 + $0x130] sm:$0xf0]  ;;  %v3902_v15 = vor.u32 %v4194_v29, %v3899_v3  ;;  %v2768_v29 = vpop.permute.xlu0 %2767  ;;  %v3605_v3 = vld [vmem:[%s4339_s12 + $0x140] sm:$0xf] }
 0x1f3   : > { %v1806_v6 = vadd.f32 %v1744_v47, %v4732_v51  ;;  %v3594_v61 = vor.u32 %v4130_v40, %v3593_v9  ;;  %v4201_v45 = vld [vmem:[%s4339_s12 + $0x170] sm:$0xf0] }
 0x1f4   : > { %v2995_v46 = vadd.f32 %v2994_v31, %v2968_v0  ;;  %v2536_v50 = vadd.f32 %v2535_v42, %v2457_v53  ;;  %2867 = vperm.xlu2 %4264, %v2733_v41   ;;  %v3922_v47 = vor.u32 %v4201_v45, %v3921_v28 }
 0x1f6   : > { %v2599_v2 = vadd.f32 %v2536_v50, %v1805_v23 }
 0x1f8   : > { %2683 = vst [vmem:[%s5032_s14 + $0x20] sm:$0xff] %v2599_v2  ;;  %v2879_v42 = vmul.f32 %v2758_v33, %v2599_v2  ;;  %v2941_v22 = vmul.f32 %v2599_v2, %v2599_v2  ;;  %v1746_v26 = vpop.f32.mrf.mxu1  ;;  %v2540_v23 = vpop.f32.mrf.mxu0 }
 0x1f9   : > { %v2458_v11 = vpop.f32.mrf.mxu3  ;;  %v1747_v58 = vadd.f32 %v1746_v26, %v4753_v57  ;;  %v5104_v53 = vpop.f32.mrf.mxu2 }
 0x1fa   : > { %v2906_v31 = vadd.f32 %v2905_v27, %v2879_v42  ;;  %v2969_v1 = vmul.f32 %v2941_v22, %v2758_v33  ;;  %v2459_v51 = vadd.f32 %v2458_v11, %v5052_v62  ;;  %v2763_v27 = vpop.permute.xlu2 %2762  ;;  %v4133_v22 = vld [vmem:[%s4339_s12 + $0x148] sm:$0xf0]  ;;  %v3917_v11 = vld [vmem:[%s4339_s12 + $0x158] sm:$0xf] }
 0x1fb   : > { %v1807_v4 = vadd.f32 %v1747_v58, %v4751_v44  ;;  %1785 = vmatmul.bf16.gmra.mxu1 %v3594_v61  ;;  %2579 = vmatmul.bf16.gmra.mxu0 %v3906_v10  ;;  %v4199_v61 = vld [vmem:[%s4339_s12 + $0x160] sm:$0xf0]  ;;  %v4197_v10 = vld [vmem:[%s4339_s12 + $0x154] sm:$0xf]  ;;  %v3606_v26 = vor.u32 %v4133_v22, %v3605_v3  ;;  %v3929_v22 = vld [vmem:[%s4339_s12 + $0x170] sm:$0xf] }
 0x1fc   : > { %v2996_v49 = vadd.f32 %v2995_v46, %v2969_v1  ;;  %v2538_v0 = vadd.f32 %v2537_v37, %v2459_v51 }
 0x1fe   : > { %v2600_v33 = vadd.f32 %v2538_v0, %v1806_v6  ;;  %2500 = vmatmul.bf16.gmra.mxu3 %v3902_v15  ;;  %2431 = vmatmul.bf16.gmra.mxu2 %v3922_v47 }
 0x200   : > { %2684 = vst [vmem:[%s5032_s14 + $0x28] sm:$0xff] %v2600_v33  ;;  %v2880_v62 = vmul.f32 %v2763_v27, %v2600_v33  ;;  %v2942_v50 = vmul.f32 %v2600_v33, %v2600_v33  ;;  %v1748_v46 = vpop.f32.mrf.mxu1  ;;  %v2542_v9 = vpop.f32.mrf.mxu0 }
 0x201   : > { %v2461_v41 = vpop.f32.mrf.mxu3  ;;  %v1749_v6 = vadd.f32 %v1748_v46, %v4764_v32  ;;  %v5110_v21 = vpop.f32.mrf.mxu2  ;;  %v3918_v32 = vor.u32 %v4199_v61, %v3917_v11  ;;  %v4202_v11 = vld [vmem:[%s4339_s12 + $0x178] sm:$0xf0]  ;;  %v4200_v61 = vld [vmem:[%s4339_s12 + $0x16c] sm:$0xf] }
 0x202   : > { %v2907_v57 = vadd.f32 %v2906_v31, %v2880_v62  ;;  %v2970_v37 = vmul.f32 %v2942_v50, %v2763_v27  ;;  %v2462_v44 = vadd.f32 %v2461_v41, %v5061_v59  ;;  %v3911_v31 = vld [vmem:[%s4339_s12 + $0x15c] sm:$0xf0]  ;;  %v2773_v33 = vpop.permute.xlu1 %2772 }
 0x203   : > { %v1808_v17 = vadd.f32 %v1749_v6, %v4756_v13  ;;  %v3914_v58 = vor.u32 %v4197_v10, %v3911_v31  ;;  %v3923_v10 = vld [vmem:[%s4339_s12 + $0x174] sm:$0xf0] }
 0x204   : > { %v2997_v2 = vadd.f32 %v2996_v49, %v2970_v37  ;;  %v2541_v40 = vadd.f32 %v2540_v23, %v2462_v44 }
 0x206   : > { %v2601_v42 = vadd.f32 %v2541_v40, %v1807_v4 }
 0x208   : > { %2685 = vst [vmem:[%s5032_s14 + $0x30] sm:$0xff] %v2601_v42  ;;  %v2881_v59 = vmul.f32 %v2768_v29, %v2601_v42  ;;  %v2943_v1 = vmul.f32 %v2601_v42, %v2601_v42  ;;  %v1751_v13 = vpop.f32.mrf.mxu1  ;;  %v2545_v45 = vpop.f32.mrf.mxu0  ;;  %v4136_v42 = vld [vmem:[%s4339_s12 + $0x160] sm:$0xf0] }
 0x209   : > { %v2463_v51 = vpop.f32.mrf.mxu3  ;;  %v1752_v49 = vadd.f32 %v1751_v13, %v4771_v39  ;;  %v5122_v27 = vpop.f32.mrf.mxu2 }
 0x20a   : > { %v2908_v15 = vadd.f32 %v2907_v57, %v2881_v59  ;;  %v2971_v23 = vmul.f32 %v2943_v1, %v2768_v29  ;;  %v2464_v28 = vadd.f32 %v2463_v51, %v5078_v34  ;;  %v3617_v29 = vld [vmem:[%s4339_s12 + $0x158] sm:$0xf] }
 0x20b   : > { %v1809_v47 = vadd.f32 %v1752_v49, %v4769_v36  ;;  %1790 = vmatmul.bf16.gmra.mxu1 %v3606_v26  ;;  %2584 = vmatmul.bf16.gmra.mxu0 %v3918_v32  ;;  %v3618_v1 = vor.u32 %v4136_v42, %v3617_v29  ;;  %v2783_v49 = vpop.permute.xlu0 %2782 }
 0x20c   : > { %v2998_v0 = vadd.f32 %v2997_v2, %v2971_v23  ;;  %v2543_v4 = vadd.f32 %v2542_v9, %v2464_v28  ;;  %v3926_v23 = vor.u32 %v4200_v61, %v3923_v10 }
 0x20e   : > { %v2602_v62 = vadd.f32 %v2543_v4, %v1808_v17  ;;  %2505 = vmatmul.bf16.gmra.mxu3 %v3914_v58  ;;  %v2778_v17 = vpop.permute.xlu2 %2777 }
 0x210   : > { %2686 = vst [vmem:[%s5032_s14 + $0x38] sm:$0xff] %v2602_v62  ;;  %v2882_v50 = vmul.f32 %v2773_v33, %v2602_v62  ;;  %v2944_v34 = vmul.f32 %v2602_v62, %v2602_v62  ;;  %v1753_v36 = vpop.f32.mrf.mxu1  ;;  %v2547_v44 = vpop.f32.mrf.mxu0 }
 0x211   : > { %v2466_v41 = vpop.f32.mrf.mxu3  ;;  %v1754_v46 = vadd.f32 %v1753_v36, %v4782_v24  ;;  %v5128_v2 = vpop.f32.mrf.mxu2  ;;  %v3930_v24 = vor.u32 %v4202_v11, %v3929_v22 }
 0x212   : > { %v2909_v39 = vadd.f32 %v2908_v15, %v2882_v50  ;;  %v2972_v57 = vmul.f32 %v2944_v34, %v2773_v33  ;;  %v2467_v37 = vadd.f32 %v2466_v41, %v5087_v54  ;;  %v2788_v36 = vpop.permute.xlu1 %2787 }
 0x213   : > { %v1810_v40 = vadd.f32 %v1754_v46, %v4774_v5 }
 0x214   : > { %v2999_v9 = vadd.f32 %v2998_v0, %v2972_v57  ;;  %v2546_v6 = vadd.f32 %v2545_v45, %v2467_v37 }
 0x216   : > { %v2603_v3 = vadd.f32 %v2546_v6, %v1809_v47  ;;  %v2793_v61 = vpop.permute.xlu2 %2792 }
 0x218   : > { %2687 = vst [vmem:[%s5032_s14 + $0x40] sm:$0xff] %v2603_v3  ;;  %v2883_v54 = vmul.f32 %v2778_v17, %v2603_v3  ;;  %v2945_v31 = vmul.f32 %v2603_v3, %v2603_v3  ;;  %v1756_v5 = vpop.f32.mrf.mxu1  ;;  %v2550_v15 = vpop.f32.mrf.mxu0 }
 0x219   : > { %v2468_v59 = vpop.f32.mrf.mxu3  ;;  %v1757_v28 = vadd.f32 %v1756_v5, %v4789_v43  ;;  %v2399_v0 = vpop.f32.mrf.mxu2 }
 0x21a   : > { %v2910_v51 = vadd.f32 %v2909_v39, %v2883_v54  ;;  %v2973_v26 = vmul.f32 %v2945_v31, %v2778_v17  ;;  %v2469_v32 = vadd.f32 %v2468_v59, %v5104_v53 }
 0x21b   : > { %v1811_v58 = vadd.f32 %v1757_v28, %v4787_v30  ;;  %1795 = vmatmul.bf16.gmra.mxu1 %v3618_v1  ;;  %2589 = vmatmul.bf16.gmra.mxu0 %v3930_v24 }
 0x21c   : > { %v3000_v13 = vadd.f32 %v2999_v9, %v2973_v26  ;;  %v2548_v45 = vadd.f32 %v2547_v44, %v2469_v32 }
 0x21e   : > { %v2604_v4 = vadd.f32 %v2548_v45, %v1810_v40  ;;  %2510 = vmatmul.bf16.gmra.mxu3 %v3926_v23  ;;  %v2798_v23 = vpop.permute.xlu0 %2797 }
 0x220   : > { %2688 = vst [vmem:[%s5032_s14 + $0x48] sm:$0xff] %v2604_v4  ;;  %v2884_v47 = vmul.f32 %v2783_v49, %v2604_v4  ;;  %v2946_v33 = vmul.f32 %v2604_v4, %v2604_v4  ;;  %v1758_v43 = vpop.f32.mrf.mxu1  ;;  %v2552_v41 = vpop.f32.mrf.mxu0 }
 0x221   : > { %v2471_v53 = vpop.f32.mrf.mxu3  ;;  %v1759_v39 = vadd.f32 %v1758_v43, %v4803_v19  ;;  %v2402_v46 = vpop.f32.mrf.mxu2 }
 0x222   : > { %v2911_v62 = vadd.f32 %v2910_v51, %v2884_v47  ;;  %v2974_v50 = vmul.f32 %v2946_v33, %v2783_v49  ;;  %v2472_v34 = vadd.f32 %v2471_v53, %v5110_v21 }
 0x223   : > { %v1812_v37 = vadd.f32 %v1759_v39, %v4795_v63 }
 0x224   : > { %v3001_v30 = vadd.f32 %v3000_v13, %v2974_v50  ;;  %v2551_v57 = vadd.f32 %v2550_v15, %v2472_v34  ;;  %v5231_v34 = vld [vmem:[#allocation3_spill] sm:$0xff] }
 0x226   : > { %v2605_v44 = vadd.f32 %v2551_v57, %v1811_v58 }
 0x228   : > { %2689 = vst [vmem:[%s5032_s14 + $0x50] sm:$0xff] %v2605_v44  ;;  %v2885_v9 = vmul.f32 %v2788_v36, %v2605_v44  ;;  %v2947_v6 = vmul.f32 %v2605_v44, %v2605_v44  ;;  %v1761_v3 = vpop.f32.mrf.mxu1  ;;  %v2555_v42 = vpop.f32.mrf.mxu0 }
 0x229   : > { %v2473_v40 = vpop.f32.mrf.mxu3  ;;  %v1762_v19 = vadd.f32 %v1761_v3, %v4813_v12  ;;  %v2404_v1 = vpop.f32.mrf.mxu2 }
 0x22a   : > { %v2912_v17 = vadd.f32 %v2911_v62, %v2885_v9  ;;  %v2975_v29 = vmul.f32 %v2947_v6, %v2788_v36  ;;  %v2474_v21 = vadd.f32 %v2473_v40, %v5122_v27 }
 0x22b   : > { %v1813_v63 = vadd.f32 %v1762_v19, %v4811_v52 }
 0x22c   : > { %v3002_v22 = vadd.f32 %v3001_v30, %v2975_v29  ;;  %v2553_v11 = vadd.f32 %v2552_v41, %v2474_v21  ;;  %v2808_v29 = vpop.permute.xlu2 %2807 }
 0x22e   : > { %v2606_v10 = vadd.f32 %v2553_v11, %v1812_v37 }
 0x230   : > { %2690 = vst [vmem:[%s5032_s14 + $0x58] sm:$0xff] %v2606_v10  ;;  %v2886_v54 = vmul.f32 %v2793_v61, %v2606_v10  ;;  %v2948_v31 = vmul.f32 %v2606_v10, %v2606_v10  ;;  %v1763_v26 = vpop.f32.mrf.mxu1  ;;  %v2557_v32 = vpop.f32.mrf.mxu0 }
 0x231   : > { %v2476_v59 = vpop.f32.mrf.mxu3  ;;  %v1764_v12 = vadd.f32 %v1763_v26, %v4827_v20  ;;  %v2407_v62 = vpop.f32.mrf.mxu2 }
 0x232   : > { %v2913_v24 = vadd.f32 %v2912_v17, %v2886_v54  ;;  %v2976_v51 = vmul.f32 %v2948_v31, %v2793_v61  ;;  %v2477_v27 = vadd.f32 %v2476_v59, %v5128_v2  ;;  %v5232_v54 = vld [vmem:[#allocation5_spill] sm:$0xff] }
 0x233   : > { %v1814_v52 = vadd.f32 %v1764_v12, %v4819_v7  ;;  %v2803_v7 = vpop.permute.xlu1 %2802 }
 0x234   : > { %v3003_v5 = vadd.f32 %v3002_v22, %v2976_v51  ;;  %v2556_v15 = vadd.f32 %v2555_v42, %v2477_v27  ;;  %v2813_v27 = vpop.permute.xlu0 %2812 }
 0x236   : > { %v2607_v28 = vadd.f32 %v2556_v15, %v1813_v63 }
 0x238   : > { %2691 = vst [vmem:[%s5032_s14 + $0x60] sm:$0xff] %v2607_v28  ;;  %v2887_v13 = vmul.f32 %v2798_v23, %v2607_v28  ;;  %v2949_v45 = vmul.f32 %v2607_v28, %v2607_v28  ;;  %v1766_v33 = vpop.f32.mrf.mxu1  ;;  %v2560_v2 = vpop.f32.mrf.mxu0 }
 0x239   : > { %v2478_v58 = vpop.f32.mrf.mxu3  ;;  %v1767_v53 = vadd.f32 %v1766_v33, %v4837_v35  ;;  %v2409_v21 = vpop.f32.mrf.mxu2 }
 0x23a   : > { %v2914_v49 = vadd.f32 %v2913_v24, %v2887_v13  ;;  %v2977_v4 = vmul.f32 %v2949_v45, %v2798_v23  ;;  %v2479_v47 = vadd.f32 %v2478_v58, %v2399_v0  ;;  %v5233_v24 = vld [vmem:[#allocation4_spill] sm:$0xff] }
 0x23b   : > { %v1815_v43 = vadd.f32 %v1767_v53, %v5231_v34  ;;  %v2818_v33 = vpop.permute.xlu1 %2817 }
 0x23c   : > { %v3004_v20 = vadd.f32 %v3003_v5, %v2977_v4  ;;  %v2558_v50 = vadd.f32 %v2557_v32, %v2479_v47 }
 0x23e   : > { %v2608_v41 = vadd.f32 %v2558_v50, %v1814_v52 }
 0x240   : > { %2692 = vst [vmem:[%s5032_s14 + $0x68] sm:$0xff] %v2608_v41  ;;  %v2888_v39 = vmul.f32 %v2803_v7, %v2608_v41  ;;  %v2950_v30 = vmul.f32 %v2608_v41, %v2608_v41  ;;  %v1768_v0 = vpop.f32.mrf.mxu1  ;;  %v2562_v9 = vpop.f32.mrf.mxu0 }
 0x241   : > { %v2481_v57 = vpop.f32.mrf.mxu3  ;;  %v1769_v6 = vadd.f32 %v1768_v0, %v4848_v14  ;;  %v2412_v26 = vpop.f32.mrf.mxu2 }
 0x242   : > { %v2915_v37 = vadd.f32 %v2914_v49, %v2888_v39  ;;  %v2978_v36 = vmul.f32 %v2950_v30, %v2803_v7  ;;  %v2482_v44 = vadd.f32 %v2481_v57, %v2402_v46  ;;  %v5234_v49 = vld [vmem:[#allocation6_spill] sm:$0xff]  ;;  %v5235_v57 = vld [vmem:[#allocation7_spill] sm:$0xff] }
 0x243   : > { %v1816_v17 = vadd.f32 %v1769_v6, %v4840_v25 }
 0x244   : > { %v3005_v35 = vadd.f32 %v3004_v20, %v2978_v36  ;;  %v2561_v40 = vadd.f32 %v2560_v2, %v2482_v44  ;;  %v2823_v44 = vpop.permute.xlu2 %2822 }
 0x246   : > { %v2609_v3 = vadd.f32 %v2561_v40, %v1815_v43 }
 0x248   : > { %2693 = vst [vmem:[%s5032_s14 + $0x70] sm:$0xff] %v2609_v3  ;;  %v2889_v42 = vmul.f32 %v2808_v29, %v2609_v3  ;;  %v2951_v19 = vmul.f32 %v2609_v3, %v2609_v3  ;;  %v1771_v46 = vpop.f32.mrf.mxu1  ;;  %v2565_v10 = vpop.f32.mrf.mxu0 }
 0x249   : > { %v2483_v22 = vpop.f32.mrf.mxu3  ;;  %v1772_v31 = vadd.f32 %v1771_v46, %v5232_v54  ;;  %v2414_v50 = vpop.f32.mrf.mxu2 }
 0x24a   : > { %v2916_v11 = vadd.f32 %v2915_v37, %v2889_v42  ;;  %v2979_v63 = vmul.f32 %v2951_v19, %v2808_v29  ;;  %v2484_v61 = vadd.f32 %v2483_v22, %v2404_v1  ;;  %v5236_v22 = vld [vmem:[#allocation8_spill] sm:$0xff] }
 0x24b   : > { %v1817_v51 = vadd.f32 %v1772_v31, %v5233_v24 }
 0x24c   : > { %v3006_v14 = vadd.f32 %v3005_v35, %v2979_v63  ;;  %v2563_v59 = vadd.f32 %v2562_v9, %v2484_v61  ;;  %v2828_v61 = vpop.permute.xlu0 %2827 }
 0x24e   : > { %v2610_v25 = vadd.f32 %v2563_v59, %v1816_v17 }
 0x250   : > { %2694 = vst [vmem:[%s5032_s14 + $0x78] sm:$0xff] %v2610_v25  ;;  %v2952_v32 = vmul.f32 %v2610_v25, %v2610_v25  ;;  %v2890_v12 = vmul.f32 %v2813_v27, %v2610_v25  ;;  %v1773_v52 = vpop.f32.mrf.mxu1  ;;  %v2567_v23 = vpop.f32.mrf.mxu0 }
 0x251   : > { %v2486_v5 = vpop.f32.mrf.mxu3  ;;  %v1774_v13 = vadd.f32 %v1773_v52, %v4869_v56  ;;  %v2417_v42 = vpop.f32.mrf.mxu2 }
 0x252   : > { %v2487_v15 = vadd.f32 %v2486_v5, %v2407_v62  ;;  %v2917_v1 = vadd.f32 %v2916_v11, %v2890_v12  ;;  %v2980_v28 = vmul.f32 %v2952_v32, %v2813_v27 }
 0x253   : > { %v1818_v4 = vadd.f32 %v1774_v13, %v5234_v49 }
 0x254   : > { %v2566_v45 = vadd.f32 %v2565_v10, %v2487_v15  ;;  %v3007_v58 = vadd.f32 %v3006_v14, %v2980_v28  ;;  %v2833_v15 = vpop.permute.xlu1 %2832 }
 0x256   : > { %v2611_v47 = vadd.f32 %v2566_v45, %v1817_v51 }
 0x258   : > { %2695 = vst [vmem:[%s5032_s14 + $0x80] sm:$0xff] %v2611_v47  ;;  %v2891_v2 = vmul.f32 %v2818_v33, %v2611_v47  ;;  %v2953_v53 = vmul.f32 %v2611_v47, %v2611_v47  ;;  %v1776_v7 = vpop.f32.mrf.mxu1  ;;  %v2570_v41 = vpop.f32.mrf.mxu0 }
 0x259   : > { %v2488_v20 = vpop.f32.mrf.mxu3  ;;  %v1777_v39 = vadd.f32 %v1776_v7, %v4882_v55  ;;  %v2419_v12 = vpop.f32.mrf.mxu2 }
 0x25a   : > { %v2918_v34 = vadd.f32 %v2917_v1, %v2891_v2  ;;  %v2981_v62 = vmul.f32 %v2953_v53, %v2818_v33  ;;  %v2489_v43 = vadd.f32 %v2488_v20, %v2409_v21  ;;  %v5238_v33 = vld [vmem:[#allocation10_spill] sm:$0xff]  ;;  %v2838_v20 = vpop.permute.xlu2 %2837 }
 0x25b   : > { %v1819_v37 = vadd.f32 %v1777_v39, %v5235_v57 }
 0x25c   : > { %v3008_v56 = vadd.f32 %v3007_v58, %v2981_v62  ;;  %v2568_v30 = vadd.f32 %v2567_v23, %v2489_v43 }
 0x25e   : > { %v2612_v36 = vadd.f32 %v2568_v30, %v1818_v4 }
 0x260   : > { %2696 = vst [vmem:[%s5032_s14 + $0x88] sm:$0xff] %v2612_v36  ;;  %v2892_v0 = vmul.f32 %v2823_v44, %v2612_v36  ;;  %v2954_v9 = vmul.f32 %v2612_v36, %v2612_v36  ;;  %v1778_v29 = vpop.f32.mrf.mxu1  ;;  %v2572_v21 = vpop.f32.mrf.mxu0  ;;  %v5239_v36 = vld [vmem:[#allocation11_spill] sm:$0xff] }
 0x261   : > { %v2491_v6 = vpop.f32.mrf.mxu3  ;;  %v1779_v3 = vadd.f32 %v1778_v29, %v4896_v16 }
 0x262   : > { %v2919_v35 = vadd.f32 %v2918_v34, %v2892_v0  ;;  %v2982_v40 = vmul.f32 %v2954_v9, %v2823_v44  ;;  %v2492_v17 = vadd.f32 %v2491_v6, %v2412_v26  ;;  %v5237_v26 = vld [vmem:[#allocation9_spill] sm:$0xff]  ;;  %v2843_v9 = vpop.permute.xlu0 %2842 }
 0x263   : > { %v1820_v11 = vadd.f32 %v1779_v3, %v5236_v22 }
 0x264   : > { %v3009_v55 = vadd.f32 %v3008_v56, %v2982_v40  ;;  %v2571_v19 = vadd.f32 %v2570_v41, %v2492_v17 }
 0x266   : > { %v2613_v63 = vadd.f32 %v2571_v19, %v1819_v37 }
 0x268   : > { %2697 = vst [vmem:[%s5032_s14 + $0x90] sm:$0xff] %v2613_v63  ;;  %v2893_v46 = vmul.f32 %v2828_v61, %v2613_v63  ;;  %v2955_v10 = vmul.f32 %v2613_v63, %v2613_v63  ;;  %v1781_v24 = vpop.f32.mrf.mxu1  ;;  %v2575_v51 = vpop.f32.mrf.mxu0 }
 0x269   : > { %v2493_v54 = vpop.f32.mrf.mxu3  ;;  %v1782_v25 = vadd.f32 %v1781_v24, %v4906_v38 }
 0x26a   : > { %v2920_v31 = vadd.f32 %v2919_v35, %v2893_v46  ;;  %v2983_v14 = vmul.f32 %v2955_v10, %v2828_v61  ;;  %v2494_v59 = vadd.f32 %v2493_v54, %v2414_v50  ;;  %v2422_v50 = vpop.f32.mrf.mxu2  ;;  %v2848_v46 = vpop.permute.xlu1 %2847 }
 0x26b   : > { %v1821_v32 = vadd.f32 %v1782_v25, %v5237_v26  ;;  %v5241_v26 = vld [vmem:[#allocation13_spill] sm:$0xff] }
 0x26c   : > { %v3010_v16 = vadd.f32 %v3009_v55, %v2983_v14  ;;  %v2573_v27 = vadd.f32 %v2572_v21, %v2494_v59 }
 0x26e   : > { %v2614_v5 = vadd.f32 %v2573_v27, %v1820_v11  ;;  %v5240_v11 = vld [vmem:[#allocation12_spill] sm:$0xff] }
 0x270   : > { %2698 = vst [vmem:[%s5032_s14 + $0x98] sm:$0xff] %v2614_v5  ;;  %v2894_v52 = vmul.f32 %v2833_v15, %v2614_v5  ;;  %v2956_v23 = vmul.f32 %v2614_v5, %v2614_v5  ;;  %v1783_v58 = vpop.f32.mrf.mxu1  ;;  %v2577_v49 = vpop.f32.mrf.mxu0 }
 0x271   : > { %v2496_v1 = vpop.f32.mrf.mxu3  ;;  %v1784_v4 = vadd.f32 %v1783_v58, %v4920_v48 }
 0x272   : > { %v2921_v28 = vadd.f32 %v2920_v31, %v2894_v52  ;;  %v2984_v13 = vmul.f32 %v2956_v23, %v2833_v15  ;;  %v2497_v45 = vadd.f32 %v2496_v1, %v2417_v42  ;;  %v2424_v40 = vpop.f32.mrf.mxu2  ;;  %v2853_v15 = vpop.permute.xlu2 %2852 }
 0x273   : > { %v1822_v2 = vadd.f32 %v1784_v4, %v5238_v33  ;;  %v5243_v33 = vld [vmem:[#allocation14_spill] sm:$0xff] }
 0x274   : > { %v3011_v38 = vadd.f32 %v3010_v16, %v2984_v13  ;;  %v2576_v47 = vadd.f32 %v2575_v51, %v2497_v45 }
 0x276   : > { %v2615_v53 = vadd.f32 %v2576_v47, %v1821_v32 }
 0x278   : > { %2699 = vst [vmem:[%s5032_s14 + $0xa0] sm:$0xff] %v2615_v53  ;;  %v2895_v34 = vmul.f32 %v2838_v20, %v2615_v53  ;;  %v2957_v62 = vmul.f32 %v2615_v53, %v2615_v53  ;;  %v1786_v56 = vpop.f32.mrf.mxu1  ;;  %v2580_v30 = vpop.f32.mrf.mxu0 }
 0x279   : > { %v2498_v43 = vpop.f32.mrf.mxu3  ;;  %v1787_v57 = vadd.f32 %v1786_v56, %v4930_v60 }
 0x27a   : > { %v2922_v7 = vadd.f32 %v2921_v28, %v2895_v34  ;;  %v2985_v41 = vmul.f32 %v2957_v62, %v2838_v20  ;;  %v2499_v39 = vadd.f32 %v2498_v43, %v2419_v12  ;;  %v2427_v25 = vpop.f32.mrf.mxu2  ;;  %v2858_v20 = vpop.permute.xlu0 %2857 }
 0x27b   : > { %v1823_v44 = vadd.f32 %v1787_v57, %v5239_v36  ;;  %v5245_v36 = vld [vmem:[#allocation16_spill] sm:$0xff] }
 0x27c   : > { %v3012_v48 = vadd.f32 %v3011_v38, %v2985_v41  ;;  %v2578_v37 = vadd.f32 %v2577_v49, %v2499_v39  ;;  %v5242_v49 = vld [vmem:[#allocation15_spill] sm:$0xff] }
 0x27e   : > { %v2616_v0 = vadd.f32 %v2578_v37, %v1822_v2 }
 0x280   : > { %2700 = vst [vmem:[%s5032_s14 + $0xa8] sm:$0xff] %v2616_v0  ;;  %v2896_v6 = vmul.f32 %v2843_v9, %v2616_v0  ;;  %v2958_v35 = vmul.f32 %v2616_v0, %v2616_v0  ;;  %v1788_v42 = vpop.f32.mrf.mxu1  ;;  %v2582_v19 = vpop.f32.mrf.mxu0 }
 0x281   : > { %v2501_v17 = vpop.f32.mrf.mxu3  ;;  %v1789_v55 = vadd.f32 %v1788_v42, %v4944_v8 }
 0x282   : > { %v2923_v29 = vadd.f32 %v2922_v7, %v2896_v6  ;;  %v2986_v21 = vmul.f32 %v2958_v35, %v2843_v9  ;;  %v2502_v3 = vadd.f32 %v2501_v17, %v2422_v50  ;;  %v2429_v47 = vpop.f32.mrf.mxu2  ;;  %v2863_v9 = vpop.permute.xlu1 %2862 }
 0x283   : > { %v1824_v63 = vadd.f32 %v1789_v55, %v5240_v11 }
 0x284   : > { %v3013_v60 = vadd.f32 %v3012_v48, %v2986_v21  ;;  %v2581_v22 = vadd.f32 %v2580_v30, %v2502_v3  ;;  %v5244_v30 = vld [vmem:[#allocation17_spill] sm:$0xff] }
 0x286   : > { %v2617_v61 = vadd.f32 %v2581_v22, %v1823_v44 }
 0x288   : > { %2701 = vst [vmem:[%s5032_s14 + $0xb0] sm:$0xff] %v2617_v61  ;;  %v2897_v10 = vmul.f32 %v2848_v46, %v2617_v61  ;;  %v2959_v54 = vmul.f32 %v2617_v61, %v2617_v61  ;;  %v1791_v51 = vpop.f32.mrf.mxu1  ;;  %v2585_v12 = vpop.f32.mrf.mxu0 }
 0x289   : > { %v2503_v31 = vpop.f32.mrf.mxu3  ;;  %v1792_v16 = vadd.f32 %v1791_v51, %v4954_v18 }
 0x28a   : > { %v2924_v14 = vadd.f32 %v2923_v29, %v2897_v10  ;;  %v2987_v59 = vmul.f32 %v2959_v54, %v2848_v46  ;;  %v2504_v24 = vadd.f32 %v2503_v31, %v2424_v40  ;;  %v2432_v6 = vpop.f32.mrf.mxu2  ;;  %v2868_v10 = vpop.permute.xlu2 %2867 }
 0x28b   : > { %v1825_v32 = vadd.f32 %v1792_v16, %v5241_v26 }
 0x28c   : > { %v3014_v8 = vadd.f32 %v3013_v60, %v2987_v59  ;;  %v2583_v27 = vadd.f32 %v2582_v19, %v2504_v24  ;;  %v5246_v19 = vld [vmem:[#allocation19_spill] sm:$0xff] }
 0x28e   : > { %v2618_v5 = vadd.f32 %v2583_v27, %v1824_v63  ;;  %v5247_v63 = vld [vmem:[#allocation18_spill] sm:$0xff] }
 0x290   : > { %2702 = vst [vmem:[%s5032_s14 + $0xb8] sm:$0xff] %v2618_v5  ;;  %v2898_v52 = vmul.f32 %v2853_v15, %v2618_v5  ;;  %v2960_v23 = vmul.f32 %v2618_v5, %v2618_v5  ;;  %v1793_v58 = vpop.f32.mrf.mxu1  ;;  %v2587_v50 = vpop.f32.mrf.mxu0 }
 0x291   : > { %v2506_v1 = vpop.f32.mrf.mxu3  ;;  %v1794_v4 = vadd.f32 %v1793_v58, %v5242_v49 }
 0x292   : > { %v2925_v28 = vadd.f32 %v2924_v14, %v2898_v52  ;;  %v2988_v13 = vmul.f32 %v2960_v23, %v2853_v15  ;;  %v2507_v45 = vadd.f32 %v2506_v1, %v2427_v25  ;;  %v2434_v14 = vpop.f32.mrf.mxu2 }
 0x293   : > { %v1826_v2 = vadd.f32 %v1794_v4, %v5243_v33 }
 0x294   : > { %v3015_v38 = vadd.f32 %v3014_v8, %v2988_v13  ;;  %v2586_v18 = vadd.f32 %v2585_v12, %v2507_v45 }
 0x296   : > { %v2619_v53 = vadd.f32 %v2586_v18, %v1825_v32  ;;  %v2873_v32 = vpop.permute.xlu0 %2872 }
 0x298   : > { %2703 = vst [vmem:[%s5032_s14 + $0xc0] sm:$0xff] %v2619_v53  ;;  %v2899_v34 = vmul.f32 %v2858_v20, %v2619_v53  ;;  %v2961_v62 = vmul.f32 %v2619_v53, %v2619_v53  ;;  %v1796_v56 = vpop.f32.mrf.mxu1  ;;  %v2590_v17 = vpop.f32.mrf.mxu0 }
 0x299   : > { %v2508_v43 = vpop.f32.mrf.mxu3  ;;  %v1797_v57 = vadd.f32 %v1796_v56, %v5244_v30 }
 0x29a   : > { %v2926_v7 = vadd.f32 %v2925_v28, %v2899_v34  ;;  %v2989_v41 = vmul.f32 %v2961_v62, %v2858_v20  ;;  %v2509_v39 = vadd.f32 %v2508_v43, %v2429_v47 }
 0x29b   : > { %v1827_v44 = vadd.f32 %v1797_v57, %v5245_v36 }
 0x29c   : > { %v3016_v48 = vadd.f32 %v3015_v38, %v2989_v41  ;;  %v2588_v37 = vadd.f32 %v2587_v50, %v2509_v39 }
 0x29e   : > { %v2620_v0 = vadd.f32 %v2588_v37, %v1826_v2 }
 0x2a0   : > { %2704 = vst [vmem:[%s5032_s14 + $0xc8] sm:$0xff] %v2620_v0  ;;  %v2900_v35 = vmul.f32 %v2863_v9, %v2620_v0  ;;  %v2962_v40 = vmul.f32 %v2620_v0, %v2620_v0  ;;  %v1798_v55 = vpop.f32.mrf.mxu1  ;;  %v2592_v16 = vpop.f32.mrf.mxu0 }
 0x2a1   : > { %v2511_v29 = vpop.f32.mrf.mxu3  ;;  %v1799_v60 = vadd.f32 %v1798_v55, %v5246_v19 }
 0x2a2   : > { %v2927_v21 = vadd.f32 %v2926_v7, %v2900_v35  ;;  %v2990_v3 = vmul.f32 %v2962_v40, %v2863_v9  ;;  %v2512_v42 = vadd.f32 %v2511_v29, %v2432_v6 }
 0x2a3   : > { %v1828_v61 = vadd.f32 %v1799_v60, %v5247_v63 }
 0x2a4   : > { %v3017_v22 = vadd.f32 %v3016_v48, %v2990_v3  ;;  %v2591_v11 = vadd.f32 %v2590_v17, %v2512_v42 }
 0x2a6   : > { %v2621_v46 = vadd.f32 %v2591_v11, %v1827_v44 }
 0x2a8   : > { %2705 = vst [vmem:[%s5032_s14 + $0xd0] sm:$0xff] %v2621_v46  ;;  %v2901_v54 = vmul.f32 %v2868_v10, %v2621_v46  ;;  %v2963_v31 = vmul.f32 %v2621_v46, %v2621_v46 }
 0x2a9   : > { %v2513_v59 = vpop.f32.mrf.mxu3 }
 0x2aa   : > { %v2928_v24 = vadd.f32 %v2927_v21, %v2901_v54  ;;  %v2991_v51 = vmul.f32 %v2963_v31, %v2868_v10  ;;  %v2514_v25 = vadd.f32 %v2513_v59, %v2434_v14 }
 0x2ac   : > { %v3018_v8 = vadd.f32 %v3017_v22, %v2991_v51  ;;  %v2593_v27 = vadd.f32 %v2592_v16, %v2514_v25 }
 0x2ae   : > { %v2622_v26 = vadd.f32 %v2593_v27, %v1828_v61 }
 0x2b0   : > { %2706 = vst [vmem:[%s5032_s14 + $0xd8] sm:$0xff] %v2622_v26  ;;  %v2902_v12 = vmul.f32 %v2873_v32, %v2622_v26  ;;  %v2964_v5 = vmul.f32 %v2622_v26, %v2622_v26 }
 0x2b2   : > { %v2929_v15 = vadd.f32 %v2928_v24, %v2902_v12  ;;  %v2992_v52 = vmul.f32 %v2964_v5, %v2873_v32 }
 0x2b4   : > { %v2930_v23 = vrot.slane %v2929_v15, 4  ;;  %v3019_v1 = vadd.f32 %v3018_v8, %v2992_v52 }
 0x2b6   : > { %v2931_v28 = vadd.f32 %v2930_v23, %v2929_v15  ;;  %v3020_v13 = vrot.slane %v3019_v1, 4 }
 0x2b8   : > { %v2932_v45 = vrot.slane %v2931_v28, 2  ;;  %v3021_v58 = vadd.f32 %v3020_v13, %v3019_v1 }
 0x2ba   : > { %v2933_v49 = vadd.f32 %v2932_v45, %v2931_v28  ;;  %v3022_v4 = vrot.slane %v3021_v58, 2 }
 0x2bc   : > { %v2934_v38 = vrot.slane %v2933_v49, 1  ;;  %v3023_v18 = vadd.f32 %v3022_v4, %v3021_v58 }
 0x2be   : > { %v2935_v47 = vadd.f32 %v2934_v38, %v2933_v49  ;;  %v3024_v33 = vrot.slane %v3023_v18, 1 }
 0x2c0   : > { %2936 = vst [vmem:[%s238_s30] sm:$0x1] %v2935_v47  ;;  %v3025_v2 = vadd.f32 %v3024_v33, %v3023_v18 }
 0x2c2   : > { %3026 = vst [vmem:[%s241_s8] sm:$0x1] %v3025_v2 }
 0x2c3 PF: > { %s16_s18 = sadd.s32 1, %s4271_s18  }
 0x2c4   : > { %p13_p4 = scmp.ge.s32.totalorder %s16_s18, 4  }
 0x2c6   :  { %15 = sbr.rel (!%p13_p4) target bundleno = 1 (0x1), region = 88 }

</bundles_post_ra>
